<compile_context>
chip_gen: v5e
topology: v5e:2x2
jax: 0.10.0
libtpu: 0.0.40
codegen_flags: <defaults>
</compile_context>

<pallas_src>
import functools

import jax
import jax.numpy as jnp
from jax import lax
from jax.experimental import pallas as pl
from jax.experimental.pallas import tpu as pltpu


# ----------------------------------------------------------------------------
# Pallas kernels
# ----------------------------------------------------------------------------
def _lstm_layer_kernel(x_ref, w_ih_ref, w_hh_ref, b_ref, out_ref,
                       h_scr, c_scr, g_scr):
    """One (batch-block, time-chunk) step of an intermediate LSTM layer.

    x_ref   : (TC, BB, D)   bf16 time-major input chunk
    w_ih_ref: (D, 4H)       bf16 (PyTorch weight_ih transposed)
    w_hh_ref: (H, 4H)       bf16 (PyTorch weight_hh transposed)
    b_ref   : (1, 4H)       f32  (b_ih + b_hh)
    out_ref : (TC, BB, H)   bf16 hidden-sequence chunk
    h_scr   : (BB, H) f32   persistent hidden carry
    c_scr   : (BB, H) f32   persistent cell carry
    g_scr   : (TC, BB, 4H) f32  hoisted input projection

    Gate order matches PyTorch: [i, f, g, o].
    """
    TC, BB, D = x_ref.shape
    H = h_scr.shape[1]

    # Zero the carries only at the first time-chunk of each batch block.
    @pl.when(pl.program_id(1) == 0)
    def _():
        h_scr[...] = jnp.zeros_like(h_scr)
        c_scr[...] = jnp.zeros_like(c_scr)

    # Hoisted input projection (no recurrent dependency): one big MXU matmul
    # per chunk instead of one small one per timestep.
    pre = jnp.dot(x_ref[...].reshape(TC * BB, D), w_ih_ref[...],
                  preferred_element_type=jnp.float32) + b_ref[...]
    g_scr[...] = pre.reshape(TC, BB, 4 * H)

    def step(t, carry):
        del carry
        h = h_scr[...]
        c = c_scr[...]
        gates = g_scr[t] + jnp.dot(h.astype(w_hh_ref.dtype), w_hh_ref[...],
                                   preferred_element_type=jnp.float32)
        i = jax.nn.sigmoid(gates[:, 0 * H:1 * H])
        f = jax.nn.sigmoid(gates[:, 1 * H:2 * H])
        g = jnp.tanh(gates[:, 2 * H:3 * H])
        o = jax.nn.sigmoid(gates[:, 3 * H:4 * H])
        c_new = f * c + i * g
        h_new = o * jnp.tanh(c_new)
        h_scr[...] = h_new
        c_scr[...] = c_new
        out_ref[t] = h_new.astype(out_ref.dtype)
        return 0

    lax.fori_loop(0, TC, step, 0, unroll=True)


def _lstm_last_proj_kernel(x_ref, w_ih_ref, w_hh_ref, b_ref, w_p_ref, b_p_ref,
                           out_ref, h_scr, c_scr, g_scr):
    """Last LSTM layer fused with projection + L2 normalization.

    Identical recurrence to `_lstm_layer_kernel`, but the (TC, BB, H) hidden
    sequence is never written to HBM; at the last time-chunk the final hidden
    state is projected and normalized into the (BB, E) output block.
    """
    TC, BB, D = x_ref.shape
    H = h_scr.shape[1]

    @pl.when(pl.program_id(1) == 0)
    def _():
        h_scr[...] = jnp.zeros_like(h_scr)
        c_scr[...] = jnp.zeros_like(c_scr)

    pre = jnp.dot(x_ref[...].reshape(TC * BB, D), w_ih_ref[...],
                  preferred_element_type=jnp.float32) + b_ref[...]
    g_scr[...] = pre.reshape(TC, BB, 4 * H)

    def step(t, carry):
        del carry
        h = h_scr[...]
        c = c_scr[...]
        gates = g_scr[t] + jnp.dot(h.astype(w_hh_ref.dtype), w_hh_ref[...],
                                   preferred_element_type=jnp.float32)
        i = jax.nn.sigmoid(gates[:, 0 * H:1 * H])
        f = jax.nn.sigmoid(gates[:, 1 * H:2 * H])
        g = jnp.tanh(gates[:, 2 * H:3 * H])
        o = jax.nn.sigmoid(gates[:, 3 * H:4 * H])
        c_new = f * c + i * g
        h_scr[...] = o * jnp.tanh(c_new)
        c_scr[...] = c_new
        return 0

    lax.fori_loop(0, TC, step, 0, unroll=True)

    # Projection + L2 normalize, only once all timesteps have been consumed.
    @pl.when(pl.program_id(1) == pl.num_programs(1) - 1)
    def _():
        h_last = h_scr[...]
        y = jnp.dot(h_last.astype(w_p_ref.dtype), w_p_ref[...],
                    preferred_element_type=jnp.float32) + b_p_ref[...]
        # rsqrt goes to the otherwise-idle EUP; eps guards the all-zero row.
        inv = lax.rsqrt(jnp.sum(y * y, axis=1, keepdims=True) + 1e-12)
        out_ref[...] = (y * inv).astype(out_ref.dtype)


# ----------------------------------------------------------------------------
# Wrappers
# ----------------------------------------------------------------------------
def _largest_divisor_at_most(n, target):
    for d in range(min(n, target), 0, -1):
        if n % d == 0:
            return d
    return 1


def _mosaic_params(vmem_estimate_bytes):
    limit = int(min(max(3 * vmem_estimate_bytes, 16 * 1024 * 1024),
                    48 * 1024 * 1024))
    return pltpu.CompilerParams(
        dimension_semantics=("parallel", "arbitrary"),
        vmem_limit_bytes=limit,
    )


def _run_lstm_layer(x_tm, w_ih_t, w_hh_t, b, *, time_chunk, batch_block):
    T, B, D = x_tm.shape
    H = w_hh_t.shape[0]
    TC, BB = time_chunk, batch_block
    assert T % TC == 0 and B % BB == 0

    est = (2 * TC * BB * D * 2            # input chunks (bf16, double-buffered)
           + 2 * TC * BB * H * 2          # output chunks (bf16)
           + 2 * (D + H) * 4 * H * 2      # weights (bf16)
           + 2 * 4 * H * 4                # bias
           + 2 * BB * H * 4               # h / c carries
           + TC * BB * 4 * H * 4)         # hoisted pre-gates scratch

    return pl.pallas_call(
        _lstm_layer_kernel,
        out_shape=jax.ShapeDtypeStruct((T, B, H), jnp.bfloat16),
        grid_spec=pltpu.PrefetchScalarGridSpec(
            num_scalar_prefetch=0,
            grid=(B // BB, T // TC),
            in_specs=[
                pl.BlockSpec((TC, BB, D), lambda bb, tt: (tt, bb, 0)),
                pl.BlockSpec((D, 4 * H), lambda bb, tt: (0, 0)),
                pl.BlockSpec((H, 4 * H), lambda bb, tt: (0, 0)),
                pl.BlockSpec((1, 4 * H), lambda bb, tt: (0, 0)),
            ],
            out_specs=pl.BlockSpec((TC, BB, H), lambda bb, tt: (tt, bb, 0)),
            scratch_shapes=[
                pltpu.VMEM((BB, H), jnp.float32),           # h carry
                pltpu.VMEM((BB, H), jnp.float32),           # c carry
                pltpu.VMEM((TC, BB, 4 * H), jnp.float32),   # pre-gates
            ],
        ),
        compiler_params=_mosaic_params(est),
    )(x_tm, w_ih_t, w_hh_t, b)


def _run_lstm_last_proj(x_tm, w_ih_t, w_hh_t, b, w_p_t, b_p, *,
                        time_chunk, batch_block):
    T, B, D = x_tm.shape
    H = w_hh_t.shape[0]
    E = w_p_t.shape[1]
    TC, BB = time_chunk, batch_block
    assert T % TC == 0 and B % BB == 0

    est = (2 * TC * BB * D * 2
           + 2 * BB * E * 4
           + 2 * (D + H) * 4 * H * 2
           + 2 * H * E * 2
           + 2 * (4 * H + E) * 4
           + 2 * BB * H * 4
           + TC * BB * 4 * H * 4)

    return pl.pallas_call(
        _lstm_last_proj_kernel,
        out_shape=jax.ShapeDtypeStruct((B, E), jnp.float32),
        grid_spec=pltpu.PrefetchScalarGridSpec(
            num_scalar_prefetch=0,
            grid=(B // BB, T // TC),
            in_specs=[
                pl.BlockSpec((TC, BB, D), lambda bb, tt: (tt, bb, 0)),
                pl.BlockSpec((D, 4 * H), lambda bb, tt: (0, 0)),
                pl.BlockSpec((H, 4 * H), lambda bb, tt: (0, 0)),
                pl.BlockSpec((1, 4 * H), lambda bb, tt: (0, 0)),
                pl.BlockSpec((H, E), lambda bb, tt: (0, 0)),
                pl.BlockSpec((1, E), lambda bb, tt: (0, 0)),
            ],
            out_specs=pl.BlockSpec((BB, E), lambda bb, tt: (bb, 0)),
            scratch_shapes=[
                pltpu.VMEM((BB, H), jnp.float32),
                pltpu.VMEM((BB, H), jnp.float32),
                pltpu.VMEM((TC, BB, 4 * H), jnp.float32),
            ],
        ),
        compiler_params=_mosaic_params(est),
    )(x_tm, w_ih_t, w_hh_t, b, w_p_t, b_p)


def init_speech_embedder_params(key, n_mels, lstm_hidden, lstm_layers, emb_dim):
    """Synthetic parameters mirroring the PyTorch module (stored transposed, f32)."""
    params = {"lstm": [], "proj": {}}
    H = lstm_hidden
    for layer in range(lstm_layers):
        in_dim = n_mels if layer == 0 else H
        key, k1, k2 = jax.random.split(key, 3)
        std_ih = (2.0 / (4 * H + in_dim)) ** 0.5
        std_hh = (2.0 / (4 * H + H)) ** 0.5
        w_ih = jax.random.normal(k1, (4 * H, in_dim), jnp.float32) * std_ih
        w_hh = jax.random.normal(k2, (4 * H, H), jnp.float32) * std_hh
        b = jnp.zeros((1, 4 * H), jnp.float32)  # b_ih + b_hh, both constant 0
        params["lstm"].append({"w_ih_t": w_ih.T, "w_hh_t": w_hh.T, "b": b})
    key, k3, k4 = jax.random.split(key, 3)
    bound = 1.0 / (H ** 0.5)
    w_p = jax.random.uniform(k3, (emb_dim, H), jnp.float32, -bound, bound)
    b_p = jax.random.uniform(k4, (1, emb_dim), jnp.float32, -bound, bound)
    params["proj"] = {"w_t": w_p.T, "b": b_p}
    return params


@functools.partial(jax.jit, static_argnames=("time_chunk", "batch_block"))
def speech_embedder_forward(x, params, *, time_chunk=None, batch_block=None):
    """Forward pass equivalent to SpeechEmbedder.forward.

    x: (B, T, n_mels) float32 (batch_first, like the PyTorch module).
    returns: (B, emb_dim) L2-normalized embeddings (f32).
    """
    x = x.astype(jnp.float32)
    B, T, _ = x.shape
    if time_chunk is None:
        time_chunk = _largest_divisor_at_most(T, 16)
    if batch_block is None:
        batch_block = _largest_divisor_at_most(B, 16)

    # time-major (T, B, D), bf16 MXU operands / inter-layer activations.
    seq = jnp.transpose(x, (1, 0, 2)).astype(jnp.bfloat16)

    for layer in params["lstm"][:-1]:
        seq = _run_lstm_layer(
            seq,
            layer["w_ih_t"].astype(jnp.bfloat16),
            layer["w_hh_t"].astype(jnp.bfloat16),
            layer["b"],
            time_chunk=time_chunk, batch_block=batch_block)

    last = params["lstm"][-1]
    proj = params["proj"]
    return _run_lstm_last_proj(
        seq,
        last["w_ih_t"].astype(jnp.bfloat16),
        last["w_hh_t"].astype(jnp.bfloat16),
        last["b"],
        proj["w_t"].astype(jnp.bfloat16),
        proj["b"],
        time_chunk=time_chunk, batch_block=batch_block)


# ----------------------------------------------------------------------------
# Pure-JAX f32 reference (for correctness checking)
# ----------------------------------------------------------------------------
def speech_embedder_reference(x, params):
    x = x.astype(jnp.float32)
    B, T, _ = x.shape
    seq = jnp.transpose(x, (1, 0, 2))  # (T, B, D)
    for layer in params["lstm"]:
        w_ih_t, w_hh_t, b = layer["w_ih_t"], layer["w_hh_t"], layer["b"]
        H = w_hh_t.shape[0]

        def step(carry, x_t, w_ih_t=w_ih_t, w_hh_t=w_hh_t, b=b, H=H):
            h, c = carry
            gates = x_t @ w_ih_t + h @ w_hh_t + b
            i = jax.nn.sigmoid(gates[:, 0 * H:1 * H])
            f = jax.nn.sigmoid(gates[:, 1 * H:2 * H])
            g = jnp.tanh(gates[:, 2 * H:3 * H])
            o = jax.nn.sigmoid(gates[:, 3 * H:4 * H])
            c = f * c + i * g
            h = o * jnp.tanh(c)
            return (h, c), h

        init = (jnp.zeros((B, H), jnp.float32), jnp.zeros((B, H), jnp.float32))
        _, seq = lax.scan(step, init, seq)
    h_last = seq[-1]
    y = h_last @ params["proj"]["w_t"] + params["proj"]["b"]
    return y / jnp.linalg.norm(y, axis=1, keepdims=True)


# ----------------------------------------------------------------------------
# Demo
# ----------------------------------------------------------------------------
if __name__ == "__main__":
    # Small but TPU-friendly shapes: H multiple of 128 (lane-aligned gate
    # slices), batch block multiple of 16 (bf16 sublane packing).
    n_mels, lstm_hidden, lstm_layers, emb_dim = 64, 128, 2, 64
    B, T = 32, 8

    key = jax.random.PRNGKey(0)
    key, kx, kp = jax.random.split(key, 3)
    x = jax.random.normal(kx, (B, T, n_mels), jnp.float32)
    params = init_speech_embedder_params(kp, n_mels, lstm_hidden, lstm_layers,
                                         emb_dim)

    # grid = (B/16, T/4) = (2, 2): exercises carry across time-chunks and the
    # per-batch-block state reset.
    out = speech_embedder_forward(x, params, time_chunk=4, batch_block=16)
    out = jax.block_until_ready(out)

    assert out.shape == (B, emb_dim), out.shape
    assert bool(jnp.all(jnp.isfinite(out)))
    norms = jnp.linalg.norm(out, axis=1)
    assert bool(jnp.allclose(norms, 1.0, atol=1e-4)), norms

    ref = speech_embedder_reference(x, params)
    max_diff = float(jnp.max(jnp.abs(out - ref)))
    assert max_diff < 1e-1, max_diff  # bf16 MXU operands vs f32 reference

    print("KERNEL_OK")
</pallas_src>

<mosaic_0001>
module attributes {stable_mosaic.version = 11 : i64} {
  func.func @_lstm_last_proj_kernel(%arg0: i32, %arg1: i32, %arg2: memref<4x16x128xbf16, #tpu.memory_space<vmem>>, %arg3: memref<128x512xbf16, #tpu.memory_space<vmem>>, %arg4: memref<128x512xbf16, #tpu.memory_space<vmem>>, %arg5: memref<1x512xf32, #tpu.memory_space<vmem>>, %arg6: memref<128x64xbf16, #tpu.memory_space<vmem>>, %arg7: memref<1x64xf32, #tpu.memory_space<vmem>>, %arg8: memref<16x64xf32, #tpu.memory_space<vmem>>, %arg9: memref<16x128xf32, #tpu.memory_space<vmem>>, %arg10: memref<16x128xf32, #tpu.memory_space<vmem>>, %arg11: memref<4x16x512xf32, #tpu.memory_space<vmem>>) attributes {dimension_semantics = [#tpu.dimension_semantics<parallel>, #tpu.dimension_semantics<arbitrary>], iteration_bounds = array<i64: 2, 2>, scalar_prefetch = 0 : i64, scratch_operands = 3 : i64, tpu.core_type = #tpu.core_type<tc>, window_params = [{transform_indices = @transform_0, window_bounds = array<i64: 4, 16, 128>}, {pipeline_mode = #tpu.pipeline_mode<synchronous>, transform_indices = @transform_1, window_bounds = array<i64: 128, 512>}, {pipeline_mode = #tpu.pipeline_mode<synchronous>, transform_indices = @transform_2, window_bounds = array<i64: 128, 512>}, {pipeline_mode = #tpu.pipeline_mode<synchronous>, transform_indices = @transform_3, window_bounds = array<i64: 1, 512>}, {pipeline_mode = #tpu.pipeline_mode<synchronous>, transform_indices = @transform_4, window_bounds = array<i64: 128, 64>}, {pipeline_mode = #tpu.pipeline_mode<synchronous>, transform_indices = @transform_5, window_bounds = array<i64: 1, 64>}, {transform_indices = @transform_6, window_bounds = array<i64: 16, 64>}]} {
    %c0_i32 = arith.constant 0 : i32
    %0 = arith.cmpi eq, %arg1, %c0_i32 : i32
    %1 = arith.extui %0 : i1 to i32
    %c0_i32_0 = arith.constant 0 : i32
    %2 = arith.cmpi ne, %1, %c0_i32_0 : i32
    scf.if %2 {
      %cst_77 = arith.constant 0.000000e+00 : f32
      %159 = vector.broadcast %cst_77 : f32 to vector<16x128xf32>
      %c0_78 = arith.constant 0 : index
      %c0_79 = arith.constant 0 : index
      %160 = vector.load %arg9[%c0_78, %c0_79] : memref<16x128xf32, #tpu.memory_space<vmem>>, vector<16x128xf32>
      tpu.vector_store %arg9[%c0_78, %c0_79], %159 {strides = array<i32>} : memref<16x128xf32, #tpu.memory_space<vmem>>, vector<16x128xf32>,
      %cst_80 = arith.constant 0.000000e+00 : f32
      %161 = vector.broadcast %cst_80 : f32 to vector<16x128xf32>
      %c0_81 = arith.constant 0 : index
      %c0_82 = arith.constant 0 : index
      %162 = vector.load %arg10[%c0_81, %c0_82] : memref<16x128xf32, #tpu.memory_space<vmem>>, vector<16x128xf32>
      tpu.vector_store %arg10[%c0_81, %c0_82], %161 {strides = array<i32>} : memref<16x128xf32, #tpu.memory_space<vmem>>, vector<16x128xf32>,
    } else {
    }
    %c0 = arith.constant 0 : index
    %c0_1 = arith.constant 0 : index
    %c0_2 = arith.constant 0 : index
    %3 = vector.load %arg2[%c0, %c0_1, %c0_2] : memref<4x16x128xbf16, #tpu.memory_space<vmem>>, vector<4x16x128xbf16>
    %4 = vector.shape_cast %3 : vector<4x16x128xbf16> to vector<64x128xbf16>
    %c0_3 = arith.constant 0 : index
    %c0_4 = arith.constant 0 : index
    %5 = vector.load %arg3[%c0_3, %c0_4] : memref<128x512xbf16, #tpu.memory_space<vmem>>, vector<128x512xbf16>
    %cst = arith.constant dense<0.000000e+00> : vector<64x512xf32>
    %6 = tpu.matmul %4, %5, %cst {dimension_numbers = #tpu.dot_dimension_numbers<[1], [0], [0], [1], [0, 0, 1, 1], [], []>} : vector<64x128xbf16>, vector<128x512xbf16>, vector<64x512xf32> -> vector<64x512xf32>
    %c0_5 = arith.constant 0 : index
    %c0_6 = arith.constant 0 : index
    %7 = vector.load %arg5[%c0_5, %c0_6] : memref<1x512xf32, #tpu.memory_space<vmem>>, vector<1x512xf32>
    %8 = vector.broadcast %7 : vector<1x512xf32> to vector<64x512xf32>
    %9 = arith.addf %6, %8 : vector<64x512xf32>
    %10 = vector.shape_cast %9 : vector<64x512xf32> to vector<4x16x512xf32>
    %c0_7 = arith.constant 0 : index
    %c0_8 = arith.constant 0 : index
    %c0_9 = arith.constant 0 : index
    %11 = vector.load %arg11[%c0_7, %c0_8, %c0_9] : memref<4x16x512xf32, #tpu.memory_space<vmem>>, vector<4x16x512xf32>
    tpu.vector_store %arg11[%c0_7, %c0_8, %c0_9], %10 {strides = array<i32>} : memref<4x16x512xf32, #tpu.memory_space<vmem>>, vector<4x16x512xf32>,
    %c0_i32_10 = arith.constant 0 : i32
    %c0_11 = arith.constant 0 : index
    %c0_12 = arith.constant 0 : index
    %12 = vector.load %arg9[%c0_11, %c0_12] : memref<16x128xf32, #tpu.memory_space<vmem>>, vector<16x128xf32>
    %c0_13 = arith.constant 0 : index
    %c0_14 = arith.constant 0 : index
    %13 = vector.load %arg10[%c0_13, %c0_14] : memref<16x128xf32, #tpu.memory_space<vmem>>, vector<16x128xf32>
    %14 = arith.index_cast %c0_i32_10 : i32 to index
    %c0_15 = arith.constant 0 : index
    %c0_16 = arith.constant 0 : index
    %15 = vector.load %arg11[%14, %c0_15, %c0_16] : memref<4x16x512xf32, #tpu.memory_space<vmem>>, vector<1x16x512xf32>
    %16 = vector.shape_cast %15 : vector<1x16x512xf32> to vector<16x512xf32>
    %17 = arith.truncf %12 : vector<16x128xf32> to vector<16x128xbf16>
    %c0_17 = arith.constant 0 : index
    %c0_18 = arith.constant 0 : index
    %18 = vector.load %arg4[%c0_17, %c0_18] : memref<128x512xbf16, #tpu.memory_space<vmem>>, vector<128x512xbf16>
    %cst_19 = arith.constant dense<0.000000e+00> : vector<16x512xf32>
    %19 = tpu.matmul %17, %18, %cst_19 {dimension_numbers = #tpu.dot_dimension_numbers<[1], [0], [0], [1], [0, 0, 1, 1], [], []>} : vector<16x128xbf16>, vector<128x512xbf16>, vector<16x512xf32> -> vector<16x512xf32>
    %20 = arith.addf %16, %19 : vector<16x512xf32>
    %21 = vector.extract_strided_slice %20 {offsets = [0, 0], sizes = [16, 128], strides = [1, 1]} : vector<16x512xf32> to vector<16x128xf32>
    %22 = arith.negf %21 : vector<16x128xf32>
    %23 = math.exp %22 : vector<16x128xf32>
    %cst_20 = arith.constant 1.000000e+00 : f32
    %24 = vector.broadcast %cst_20 : f32 to vector<16x128xf32>
    %25 = arith.addf %24, %23 : vector<16x128xf32>
    %26 = arith.divf %24, %25 : vector<16x128xf32>
    %27 = vector.extract_strided_slice %20 {offsets = [0, 128], sizes = [16, 128], strides = [1, 1]} : vector<16x512xf32> to vector<16x128xf32>
    %28 = arith.negf %27 : vector<16x128xf32>
    %29 = math.exp %28 : vector<16x128xf32>
    %cst_21 = arith.constant 1.000000e+00 : f32
    %30 = vector.broadcast %cst_21 : f32 to vector<16x128xf32>
    %31 = arith.addf %30, %29 : vector<16x128xf32>
    %32 = arith.divf %30, %31 : vector<16x128xf32>
    %33 = vector.extract_strided_slice %20 {offsets = [0, 256], sizes = [16, 128], strides = [1, 1]} : vector<16x512xf32> to vector<16x128xf32>
    %34 = math.tanh %33 : vector<16x128xf32>
    %35 = vector.extract_strided_slice %20 {offsets = [0, 384], sizes = [16, 128], strides = [1, 1]} : vector<16x512xf32> to vector<16x128xf32>
    %36 = arith.negf %35 : vector<16x128xf32>
    %37 = math.exp %36 : vector<16x128xf32>
    %cst_22 = arith.constant 1.000000e+00 : f32
    %38 = vector.broadcast %cst_22 : f32 to vector<16x128xf32>
    %39 = arith.addf %38, %37 : vector<16x128xf32>
    %40 = arith.divf %38, %39 : vector<16x128xf32>
    %41 = arith.mulf %32, %13 : vector<16x128xf32>
    %42 = arith.mulf %26, %34 : vector<16x128xf32>
    %43 = arith.addf %41, %42 : vector<16x128xf32>
    %44 = math.tanh %43 : vector<16x128xf32>
    %45 = arith.mulf %40, %44 : vector<16x128xf32>
    %c0_23 = arith.constant 0 : index
    %c0_24 = arith.constant 0 : index
    %46 = vector.load %arg9[%c0_23, %c0_24] : memref<16x128xf32, #tpu.memory_space<vmem>>, vector<16x128xf32>
    tpu.vector_store %arg9[%c0_23, %c0_24], %45 {strides = array<i32>} : memref<16x128xf32, #tpu.memory_space<vmem>>, vector<16x128xf32>,
    %c0_25 = arith.constant 0 : index
    %c0_26 = arith.constant 0 : index
    %47 = vector.load %arg10[%c0_25, %c0_26] : memref<16x128xf32, #tpu.memory_space<vmem>>, vector<16x128xf32>
    tpu.vector_store %arg10[%c0_25, %c0_26], %43 {strides = array<i32>} : memref<16x128xf32, #tpu.memory_space<vmem>>, vector<16x128xf32>,
    %c1_i32 = arith.constant 1 : i32
    %c0_27 = arith.constant 0 : index
    %c0_28 = arith.constant 0 : index
    %48 = vector.load %arg9[%c0_27, %c0_28] : memref<16x128xf32, #tpu.memory_space<vmem>>, vector<16x128xf32>
    %c0_29 = arith.constant 0 : index
    %c0_30 = arith.constant 0 : index
    %49 = vector.load %arg10[%c0_29, %c0_30] : memref<16x128xf32, #tpu.memory_space<vmem>>, vector<16x128xf32>
    %50 = arith.index_cast %c1_i32 : i32 to index
    %c0_31 = arith.constant 0 : index
    %c0_32 = arith.constant 0 : index
    %51 = vector.load %arg11[%50, %c0_31, %c0_32] : memref<4x16x512xf32, #tpu.memory_space<vmem>>, vector<1x16x512xf32>
    %52 = vector.shape_cast %51 : vector<1x16x512xf32> to vector<16x512xf32>
    %53 = arith.truncf %48 : vector<16x128xf32> to vector<16x128xbf16>
    %c0_33 = arith.constant 0 : index
    %c0_34 = arith.constant 0 : index
    %54 = vector.load %arg4[%c0_33, %c0_34] : memref<128x512xbf16, #tpu.memory_space<vmem>>, vector<128x512xbf16>
    %cst_35 = arith.constant dense<0.000000e+00> : vector<16x512xf32>
    %55 = tpu.matmul %53, %54, %cst_35 {dimension_numbers = #tpu.dot_dimension_numbers<[1], [0], [0], [1], [0, 0, 1, 1], [], []>} : vector<16x128xbf16>, vector<128x512xbf16>, vector<16x512xf32> -> vector<16x512xf32>
    %56 = arith.addf %52, %55 : vector<16x512xf32>
    %57 = vector.extract_strided_slice %56 {offsets = [0, 0], sizes = [16, 128], strides = [1, 1]} : vector<16x512xf32> to vector<16x128xf32>
    %58 = arith.negf %57 : vector<16x128xf32>
    %59 = math.exp %58 : vector<16x128xf32>
    %cst_36 = arith.constant 1.000000e+00 : f32
    %60 = vector.broadcast %cst_36 : f32 to vector<16x128xf32>
    %61 = arith.addf %60, %59 : vector<16x128xf32>
    %62 = arith.divf %60, %61 : vector<16x128xf32>
    %63 = vector.extract_strided_slice %56 {offsets = [0, 128], sizes = [16, 128], strides = [1, 1]} : vector<16x512xf32> to vector<16x128xf32>
    %64 = arith.negf %63 : vector<16x128xf32>
    %65 = math.exp %64 : vector<16x128xf32>
    %cst_37 = arith.constant 1.000000e+00 : f32
    %66 = vector.broadcast %cst_37 : f32 to vector<16x128xf32>
    %67 = arith.addf %66, %65 : vector<16x128xf32>
    %68 = arith.divf %66, %67 : vector<16x128xf32>
    %69 = vector.extract_strided_slice %56 {offsets = [0, 256], sizes = [16, 128], strides = [1, 1]} : vector<16x512xf32> to vector<16x128xf32>
    %70 = math.tanh %69 : vector<16x128xf32>
    %71 = vector.extract_strided_slice %56 {offsets = [0, 384], sizes = [16, 128], strides = [1, 1]} : vector<16x512xf32> to vector<16x128xf32>
    %72 = arith.negf %71 : vector<16x128xf32>
    %73 = math.exp %72 : vector<16x128xf32>
    %cst_38 = arith.constant 1.000000e+00 : f32
    %74 = vector.broadcast %cst_38 : f32 to vector<16x128xf32>
    %75 = arith.addf %74, %73 : vector<16x128xf32>
    %76 = arith.divf %74, %75 : vector<16x128xf32>
    %77 = arith.mulf %68, %49 : vector<16x128xf32>
    %78 = arith.mulf %62, %70 : vector<16x128xf32>
    %79 = arith.addf %77, %78 : vector<16x128xf32>
    %80 = math.tanh %79 : vector<16x128xf32>
    %81 = arith.mulf %76, %80 : vector<16x128xf32>
    %c0_39 = arith.constant 0 : index
    %c0_40 = arith.constant 0 : index
    %82 = vector.load %arg9[%c0_39, %c0_40] : memref<16x128xf32, #tpu.memory_space<vmem>>, vector<16x128xf32>
    tpu.vector_store %arg9[%c0_39, %c0_40], %81 {strides = array<i32>} : memref<16x128xf32, #tpu.memory_space<vmem>>, vector<16x128xf32>,
    %c0_41 = arith.constant 0 : index
    %c0_42 = arith.constant 0 : index
    %83 = vector.load %arg10[%c0_41, %c0_42] : memref<16x128xf32, #tpu.memory_space<vmem>>, vector<16x128xf32>
    tpu.vector_store %arg10[%c0_41, %c0_42], %79 {strides = array<i32>} : memref<16x128xf32, #tpu.memory_space<vmem>>, vector<16x128xf32>,
    %c2_i32 = arith.constant 2 : i32
    %c0_43 = arith.constant 0 : index
    %c0_44 = arith.constant 0 : index
    %84 = vector.load %arg9[%c0_43, %c0_44] : memref<16x128xf32, #tpu.memory_space<vmem>>, vector<16x128xf32>
    %c0_45 = arith.constant 0 : index
    %c0_46 = arith.constant 0 : index
    %85 = vector.load %arg10[%c0_45, %c0_46] : memref<16x128xf32, #tpu.memory_space<vmem>>, vector<16x128xf32>
    %86 = arith.index_cast %c2_i32 : i32 to index
    %c0_47 = arith.constant 0 : index
    %c0_48 = arith.constant 0 : index
    %87 = vector.load %arg11[%86, %c0_47, %c0_48] : memref<4x16x512xf32, #tpu.memory_space<vmem>>, vector<1x16x512xf32>
    %88 = vector.shape_cast %87 : vector<1x16x512xf32> to vector<16x512xf32>
    %89 = arith.truncf %84 : vector<16x128xf32> to vector<16x128xbf16>
    %c0_49 = arith.constant 0 : index
    %c0_50 = arith.constant 0 : index
    %90 = vector.load %arg4[%c0_49, %c0_50] : memref<128x512xbf16, #tpu.memory_space<vmem>>, vector<128x512xbf16>
    %cst_51 = arith.constant dense<0.000000e+00> : vector<16x512xf32>
    %91 = tpu.matmul %89, %90, %cst_51 {dimension_numbers = #tpu.dot_dimension_numbers<[1], [0], [0], [1], [0, 0, 1, 1], [], []>} : vector<16x128xbf16>, vector<128x512xbf16>, vector<16x512xf32> -> vector<16x512xf32>
    %92 = arith.addf %88, %91 : vector<16x512xf32>
    %93 = vector.extract_strided_slice %92 {offsets = [0, 0], sizes = [16, 128], strides = [1, 1]} : vector<16x512xf32> to vector<16x128xf32>
    %94 = arith.negf %93 : vector<16x128xf32>
    %95 = math.exp %94 : vector<16x128xf32>
    %cst_52 = arith.constant 1.000000e+00 : f32
    %96 = vector.broadcast %cst_52 : f32 to vector<16x128xf32>
    %97 = arith.addf %96, %95 : vector<16x128xf32>
    %98 = arith.divf %96, %97 : vector<16x128xf32>
    %99 = vector.extract_strided_slice %92 {offsets = [0, 128], sizes = [16, 128], strides = [1, 1]} : vector<16x512xf32> to vector<16x128xf32>
    %100 = arith.negf %99 : vector<16x128xf32>
    %101 = math.exp %100 : vector<16x128xf32>
    %cst_53 = arith.constant 1.000000e+00 : f32
    %102 = vector.broadcast %cst_53 : f32 to vector<16x128xf32>
    %103 = arith.addf %102, %101 : vector<16x128xf32>
    %104 = arith.divf %102, %103 : vector<16x128xf32>
    %105 = vector.extract_strided_slice %92 {offsets = [0, 256], sizes = [16, 128], strides = [1, 1]} : vector<16x512xf32> to vector<16x128xf32>
    %106 = math.tanh %105 : vector<16x128xf32>
    %107 = vector.extract_strided_slice %92 {offsets = [0, 384], sizes = [16, 128], strides = [1, 1]} : vector<16x512xf32> to vector<16x128xf32>
    %108 = arith.negf %107 : vector<16x128xf32>
    %109 = math.exp %108 : vector<16x128xf32>
    %cst_54 = arith.constant 1.000000e+00 : f32
    %110 = vector.broadcast %cst_54 : f32 to vector<16x128xf32>
    %111 = arith.addf %110, %109 : vector<16x128xf32>
    %112 = arith.divf %110, %111 : vector<16x128xf32>
    %113 = arith.mulf %104, %85 : vector<16x128xf32>
    %114 = arith.mulf %98, %106 : vector<16x128xf32>
    %115 = arith.addf %113, %114 : vector<16x128xf32>
    %116 = math.tanh %115 : vector<16x128xf32>
    %117 = arith.mulf %112, %116 : vector<16x128xf32>
    %c0_55 = arith.constant 0 : index
    %c0_56 = arith.constant 0 : index
    %118 = vector.load %arg9[%c0_55, %c0_56] : memref<16x128xf32, #tpu.memory_space<vmem>>, vector<16x128xf32>
    tpu.vector_store %arg9[%c0_55, %c0_56], %117 {strides = array<i32>} : memref<16x128xf32, #tpu.memory_space<vmem>>, vector<16x128xf32>,
    %c0_57 = arith.constant 0 : index
    %c0_58 = arith.constant 0 : index
    %119 = vector.load %arg10[%c0_57, %c0_58] : memref<16x128xf32, #tpu.memory_space<vmem>>, vector<16x128xf32>
    tpu.vector_store %arg10[%c0_57, %c0_58], %115 {strides = array<i32>} : memref<16x128xf32, #tpu.memory_space<vmem>>, vector<16x128xf32>,
    %c3_i32 = arith.constant 3 : i32
    %c0_59 = arith.constant 0 : index
    %c0_60 = arith.constant 0 : index
    %120 = vector.load %arg9[%c0_59, %c0_60] : memref<16x128xf32, #tpu.memory_space<vmem>>, vector<16x128xf32>
    %c0_61 = arith.constant 0 : index
    %c0_62 = arith.constant 0 : index
    %121 = vector.load %arg10[%c0_61, %c0_62] : memref<16x128xf32, #tpu.memory_space<vmem>>, vector<16x128xf32>
    %122 = arith.index_cast %c3_i32 : i32 to index
    %c0_63 = arith.constant 0 : index
    %c0_64 = arith.constant 0 : index
    %123 = vector.load %arg11[%122, %c0_63, %c0_64] : memref<4x16x512xf32, #tpu.memory_space<vmem>>, vector<1x16x512xf32>
    %124 = vector.shape_cast %123 : vector<1x16x512xf32> to vector<16x512xf32>
    %125 = arith.truncf %120 : vector<16x128xf32> to vector<16x128xbf16>
    %c0_65 = arith.constant 0 : index
    %c0_66 = arith.constant 0 : index
    %126 = vector.load %arg4[%c0_65, %c0_66] : memref<128x512xbf16, #tpu.memory_space<vmem>>, vector<128x512xbf16>
    %cst_67 = arith.constant dense<0.000000e+00> : vector<16x512xf32>
    %127 = tpu.matmul %125, %126, %cst_67 {dimension_numbers = #tpu.dot_dimension_numbers<[1], [0], [0], [1], [0, 0, 1, 1], [], []>} : vector<16x128xbf16>, vector<128x512xbf16>, vector<16x512xf32> -> vector<16x512xf32>
    %128 = arith.addf %124, %127 : vector<16x512xf32>
    %129 = vector.extract_strided_slice %128 {offsets = [0, 0], sizes = [16, 128], strides = [1, 1]} : vector<16x512xf32> to vector<16x128xf32>
    %130 = arith.negf %129 : vector<16x128xf32>
    %131 = math.exp %130 : vector<16x128xf32>
    %cst_68 = arith.constant 1.000000e+00 : f32
    %132 = vector.broadcast %cst_68 : f32 to vector<16x128xf32>
    %133 = arith.addf %132, %131 : vector<16x128xf32>
    %134 = arith.divf %132, %133 : vector<16x128xf32>
    %135 = vector.extract_strided_slice %128 {offsets = [0, 128], sizes = [16, 128], strides = [1, 1]} : vector<16x512xf32> to vector<16x128xf32>
    %136 = arith.negf %135 : vector<16x128xf32>
    %137 = math.exp %136 : vector<16x128xf32>
    %cst_69 = arith.constant 1.000000e+00 : f32
    %138 = vector.broadcast %cst_69 : f32 to vector<16x128xf32>
    %139 = arith.addf %138, %137 : vector<16x128xf32>
    %140 = arith.divf %138, %139 : vector<16x128xf32>
    %141 = vector.extract_strided_slice %128 {offsets = [0, 256], sizes = [16, 128], strides = [1, 1]} : vector<16x512xf32> to vector<16x128xf32>
    %142 = math.tanh %141 : vector<16x128xf32>
    %143 = vector.extract_strided_slice %128 {offsets = [0, 384], sizes = [16, 128], strides = [1, 1]} : vector<16x512xf32> to vector<16x128xf32>
    %144 = arith.negf %143 : vector<16x128xf32>
    %145 = math.exp %144 : vector<16x128xf32>
    %cst_70 = arith.constant 1.000000e+00 : f32
    %146 = vector.broadcast %cst_70 : f32 to vector<16x128xf32>
    %147 = arith.addf %146, %145 : vector<16x128xf32>
    %148 = arith.divf %146, %147 : vector<16x128xf32>
    %149 = arith.mulf %140, %121 : vector<16x128xf32>
    %150 = arith.mulf %134, %142 : vector<16x128xf32>
    %151 = arith.addf %149, %150 : vector<16x128xf32>
    %152 = math.tanh %151 : vector<16x128xf32>
    %153 = arith.mulf %148, %152 : vector<16x128xf32>
    %c0_71 = arith.constant 0 : index
    %c0_72 = arith.constant 0 : index
    %154 = vector.load %arg9[%c0_71, %c0_72] : memref<16x128xf32, #tpu.memory_space<vmem>>, vector<16x128xf32>
    tpu.vector_store %arg9[%c0_71, %c0_72], %153 {strides = array<i32>} : memref<16x128xf32, #tpu.memory_space<vmem>>, vector<16x128xf32>,
    %c0_73 = arith.constant 0 : index
    %c0_74 = arith.constant 0 : index
    %155 = vector.load %arg10[%c0_73, %c0_74] : memref<16x128xf32, #tpu.memory_space<vmem>>, vector<16x128xf32>
    tpu.vector_store %arg10[%c0_73, %c0_74], %151 {strides = array<i32>} : memref<16x128xf32, #tpu.memory_space<vmem>>, vector<16x128xf32>,
    %c4_i32 = arith.constant 4 : i32
    %c1_i32_75 = arith.constant 1 : i32
    %156 = arith.cmpi eq, %arg1, %c1_i32_75 : i32
    %157 = arith.extui %156 : i1 to i32
    %c0_i32_76 = arith.constant 0 : i32
    %158 = arith.cmpi ne, %157, %c0_i32_76 : i32
    scf.if %158 {
      %c0_77 = arith.constant 0 : index
      %c0_78 = arith.constant 0 : index
      %159 = vector.load %arg9[%c0_77, %c0_78] : memref<16x128xf32, #tpu.memory_space<vmem>>, vector<16x128xf32>
      %160 = arith.truncf %159 : vector<16x128xf32> to vector<16x128xbf16>
      %c0_79 = arith.constant 0 : index
      %c0_80 = arith.constant 0 : index
      %161 = vector.load %arg6[%c0_79, %c0_80] : memref<128x64xbf16, #tpu.memory_space<vmem>>, vector<128x64xbf16>
      %cst_81 = arith.constant dense<0.000000e+00> : vector<16x64xf32>
      %162 = tpu.matmul %160, %161, %cst_81 {dimension_numbers = #tpu.dot_dimension_numbers<[1], [0], [0], [1], [0, 0, 1, 1], [], []>} : vector<16x128xbf16>, vector<128x64xbf16>, vector<16x64xf32> -> vector<16x64xf32>
      %c0_82 = arith.constant 0 : index
      %c0_83 = arith.constant 0 : index
      %163 = vector.load %arg7[%c0_82, %c0_83] : memref<1x64xf32, #tpu.memory_space<vmem>>, vector<1x64xf32>
      %164 = vector.broadcast %163 : vector<1x64xf32> to vector<16x64xf32>
      %165 = arith.addf %162, %164 : vector<16x64xf32>
      %166 = arith.mulf %165, %165 : vector<16x64xf32>
      %cst_84 = arith.constant dense<0.000000e+00> : vector<16xf32>
      %167 = vector.multi_reduction <add>, %166, %cst_84 [1] : vector<16x64xf32> to vector<16xf32>
      %168 = vector.shape_cast %167 : vector<16xf32> to vector<16x1xf32>
      %cst_85 = arith.constant 9.99999996E-13 : f32
      %169 = vector.broadcast %cst_85 : f32 to vector<16x1xf32>
      %170 = arith.addf %168, %169 : vector<16x1xf32>
      %171 = math.rsqrt %170 : vector<16x1xf32>
      %172 = vector.broadcast %171 : vector<16x1xf32> to vector<16x64xf32>
      %173 = arith.mulf %165, %172 : vector<16x64xf32>
      %c0_86 = arith.constant 0 : index
      %c0_87 = arith.constant 0 : index
      %174 = vector.load %arg8[%c0_86, %c0_87] : memref<16x64xf32, #tpu.memory_space<vmem>>, vector<16x64xf32>
      tpu.vector_store %arg8[%c0_86, %c0_87], %173 {strides = array<i32>} : memref<16x64xf32, #tpu.memory_space<vmem>>, vector<16x64xf32>,
    } else {
    }
    return
  }
  func.func @transform_0(%arg0: i32, %arg1: i32) -> (i32, i32, i32) {
    %c0_i32 = arith.constant 0 : i32
    %c0_i32_0 = arith.constant 0 : i32
    return %arg1, %arg0, %c0_i32 : i32, i32, i32
  }
  func.func @transform_1(%arg0: i32, %arg1: i32) -> (i32, i32) {
    %c0_i32 = arith.constant 0 : i32
    %c0_i32_0 = arith.constant 0 : i32
    %c0_i32_1 = arith.constant 0 : i32
    return %c0_i32, %c0_i32_0 : i32, i32
  }
  func.func @transform_2(%arg0: i32, %arg1: i32) -> (i32, i32) {
    %c0_i32 = arith.constant 0 : i32
    %c0_i32_0 = arith.constant 0 : i32
    %c0_i32_1 = arith.constant 0 : i32
    return %c0_i32, %c0_i32_0 : i32, i32
  }
  func.func @transform_3(%arg0: i32, %arg1: i32) -> (i32, i32) {
    %c0_i32 = arith.constant 0 : i32
    %c0_i32_0 = arith.constant 0 : i32
    %c0_i32_1 = arith.constant 0 : i32
    return %c0_i32, %c0_i32_0 : i32, i32
  }
  func.func @transform_4(%arg0: i32, %arg1: i32) -> (i32, i32) {
    %c0_i32 = arith.constant 0 : i32
    %c0_i32_0 = arith.constant 0 : i32
    %c0_i32_1 = arith.constant 0 : i32
    return %c0_i32, %c0_i32_0 : i32, i32
  }
  func.func @transform_5(%arg0: i32, %arg1: i32) -> (i32, i32) {
    %c0_i32 = arith.constant 0 : i32
    %c0_i32_0 = arith.constant 0 : i32
    %c0_i32_1 = arith.constant 0 : i32
    return %c0_i32, %c0_i32_0 : i32, i32
  }
  func.func @transform_6(%arg0: i32, %arg1: i32) -> (i32, i32) {
    %c0_i32 = arith.constant 0 : i32
    %c0_i32_0 = arith.constant 0 : i32
    return %arg0, %c0_i32 : i32, i32
  }
}

module attributes {stable_mosaic.version = 11 : i64} {
  func.func @_lstm_layer_kernel(%arg0: i32, %arg1: i32, %arg2: memref<4x16x64xbf16, #tpu.memory_space<vmem>>, %arg3: memref<64x512xbf16, #tpu.memory_space<vmem>>, %arg4: memref<128x512xbf16, #tpu.memory_space<vmem>>, %arg5: memref<1x512xf32, #tpu.memory_space<vmem>>, %arg6: memref<4x16x128xbf16, #tpu.memory_space<vmem>>, %arg7: memref<16x128xf32, #tpu.memory_space<vmem>>, %arg8: memref<16x128xf32, #tpu.memory_space<vmem>>, %arg9: memref<4x16x512xf32, #tpu.memory_space<vmem>>) attributes {dimension_semantics = [#tpu.dimension_semantics<parallel>, #tpu.dimension_semantics<arbitrary>], iteration_bounds = array<i64: 2, 2>, scalar_prefetch = 0 : i64, scratch_operands = 3 : i64, tpu.core_type = #tpu.core_type<tc>, window_params = [{transform_indices = @transform_0, window_bounds = array<i64: 4, 16, 64>}, {pipeline_mode = #tpu.pipeline_mode<synchronous>, transform_indices = @transform_1, window_bounds = array<i64: 64, 512>}, {pipeline_mode = #tpu.pipeline_mode<synchronous>, transform_indices = @transform_2, window_bounds = array<i64: 128, 512>}, {pipeline_mode = #tpu.pipeline_mode<synchronous>, transform_indices = @transform_3, window_bounds = array<i64: 1, 512>}, {transform_indices = @transform_4, window_bounds = array<i64: 4, 16, 128>}]} {
    %c0_i32 = arith.constant 0 : i32
    %0 = arith.cmpi eq, %arg1, %c0_i32 : i32
    %1 = arith.extui %0 : i1 to i32
    %c0_i32_0 = arith.constant 0 : i32
    %2 = arith.cmpi ne, %1, %c0_i32_0 : i32
    scf.if %2 {
      %cst_83 = arith.constant 0.000000e+00 : f32
      %176 = vector.broadcast %cst_83 : f32 to vector<16x128xf32>
      %c0_84 = arith.constant 0 : index
      %c0_85 = arith.constant 0 : index
      %177 = vector.load %arg7[%c0_84, %c0_85] : memref<16x128xf32, #tpu.memory_space<vmem>>, vector<16x128xf32>
      tpu.vector_store %arg7[%c0_84, %c0_85], %176 {strides = array<i32>} : memref<16x128xf32, #tpu.memory_space<vmem>>, vector<16x128xf32>,
      %cst_86 = arith.constant 0.000000e+00 : f32
      %178 = vector.broadcast %cst_86 : f32 to vector<16x128xf32>
      %c0_87 = arith.constant 0 : index
      %c0_88 = arith.constant 0 : index
      %179 = vector.load %arg8[%c0_87, %c0_88] : memref<16x128xf32, #tpu.memory_space<vmem>>, vector<16x128xf32>
      tpu.vector_store %arg8[%c0_87, %c0_88], %178 {strides = array<i32>} : memref<16x128xf32, #tpu.memory_space<vmem>>, vector<16x128xf32>,
    } else {
    }
    %c0 = arith.constant 0 : index
    %c0_1 = arith.constant 0 : index
    %c0_2 = arith.constant 0 : index
    %3 = vector.load %arg2[%c0, %c0_1, %c0_2] : memref<4x16x64xbf16, #tpu.memory_space<vmem>>, vector<4x16x64xbf16>
    %4 = vector.shape_cast %3 : vector<4x16x64xbf16> to vector<64x64xbf16>
    %c0_3 = arith.constant 0 : index
    %c0_4 = arith.constant 0 : index
    %5 = vector.load %arg3[%c0_3, %c0_4] : memref<64x512xbf16, #tpu.memory_space<vmem>>, vector<64x512xbf16>
    %cst = arith.constant dense<0.000000e+00> : vector<64x512xf32>
    %6 = tpu.matmul %4, %5, %cst {dimension_numbers = #tpu.dot_dimension_numbers<[1], [0], [0], [1], [0, 0, 1, 1], [], []>} : vector<64x64xbf16>, vector<64x512xbf16>, vector<64x512xf32> -> vector<64x512xf32>
    %c0_5 = arith.constant 0 : index
    %c0_6 = arith.constant 0 : index
    %7 = vector.load %arg5[%c0_5, %c0_6] : memref<1x512xf32, #tpu.memory_space<vmem>>, vector<1x512xf32>
    %8 = vector.broadcast %7 : vector<1x512xf32> to vector<64x512xf32>
    %9 = arith.addf %6, %8 : vector<64x512xf32>
    %10 = vector.shape_cast %9 : vector<64x512xf32> to vector<4x16x512xf32>
    %c0_7 = arith.constant 0 : index
    %c0_8 = arith.constant 0 : index
    %c0_9 = arith.constant 0 : index
    %11 = vector.load %arg9[%c0_7, %c0_8, %c0_9] : memref<4x16x512xf32, #tpu.memory_space<vmem>>, vector<4x16x512xf32>
    tpu.vector_store %arg9[%c0_7, %c0_8, %c0_9], %10 {strides = array<i32>} : memref<4x16x512xf32, #tpu.memory_space<vmem>>, vector<4x16x512xf32>,
    %c0_i32_10 = arith.constant 0 : i32
    %c0_11 = arith.constant 0 : index
    %c0_12 = arith.constant 0 : index
    %12 = vector.load %arg7[%c0_11, %c0_12] : memref<16x128xf32, #tpu.memory_space<vmem>>, vector<16x128xf32>
    %c0_13 = arith.constant 0 : index
    %c0_14 = arith.constant 0 : index
    %13 = vector.load %arg8[%c0_13, %c0_14] : memref<16x128xf32, #tpu.memory_space<vmem>>, vector<16x128xf32>
    %14 = arith.index_cast %c0_i32_10 : i32 to index
    %c0_15 = arith.constant 0 : index
    %c0_16 = arith.constant 0 : index
    %15 = vector.load %arg9[%14, %c0_15, %c0_16] : memref<4x16x512xf32, #tpu.memory_space<vmem>>, vector<1x16x512xf32>
    %16 = vector.shape_cast %15 : vector<1x16x512xf32> to vector<16x512xf32>
    %17 = arith.truncf %12 : vector<16x128xf32> to vector<16x128xbf16>
    %c0_17 = arith.constant 0 : index
    %c0_18 = arith.constant 0 : index
    %18 = vector.load %arg4[%c0_17, %c0_18] : memref<128x512xbf16, #tpu.memory_space<vmem>>, vector<128x512xbf16>
    %cst_19 = arith.constant dense<0.000000e+00> : vector<16x512xf32>
    %19 = tpu.matmul %17, %18, %cst_19 {dimension_numbers = #tpu.dot_dimension_numbers<[1], [0], [0], [1], [0, 0, 1, 1], [], []>} : vector<16x128xbf16>, vector<128x512xbf16>, vector<16x512xf32> -> vector<16x512xf32>
    %20 = arith.addf %16, %19 : vector<16x512xf32>
    %21 = vector.extract_strided_slice %20 {offsets = [0, 0], sizes = [16, 128], strides = [1, 1]} : vector<16x512xf32> to vector<16x128xf32>
    %22 = arith.negf %21 : vector<16x128xf32>
    %23 = math.exp %22 : vector<16x128xf32>
    %cst_20 = arith.constant 1.000000e+00 : f32
    %24 = vector.broadcast %cst_20 : f32 to vector<16x128xf32>
    %25 = arith.addf %24, %23 : vector<16x128xf32>
    %26 = arith.divf %24, %25 : vector<16x128xf32>
    %27 = vector.extract_strided_slice %20 {offsets = [0, 128], sizes = [16, 128], strides = [1, 1]} : vector<16x512xf32> to vector<16x128xf32>
    %28 = arith.negf %27 : vector<16x128xf32>
    %29 = math.exp %28 : vector<16x128xf32>
    %cst_21 = arith.constant 1.000000e+00 : f32
    %30 = vector.broadcast %cst_21 : f32 to vector<16x128xf32>
    %31 = arith.addf %30, %29 : vector<16x128xf32>
    %32 = arith.divf %30, %31 : vector<16x128xf32>
    %33 = vector.extract_strided_slice %20 {offsets = [0, 256], sizes = [16, 128], strides = [1, 1]} : vector<16x512xf32> to vector<16x128xf32>
    %34 = math.tanh %33 : vector<16x128xf32>
    %35 = vector.extract_strided_slice %20 {offsets = [0, 384], sizes = [16, 128], strides = [1, 1]} : vector<16x512xf32> to vector<16x128xf32>
    %36 = arith.negf %35 : vector<16x128xf32>
    %37 = math.exp %36 : vector<16x128xf32>
    %cst_22 = arith.constant 1.000000e+00 : f32
    %38 = vector.broadcast %cst_22 : f32 to vector<16x128xf32>
    %39 = arith.addf %38, %37 : vector<16x128xf32>
    %40 = arith.divf %38, %39 : vector<16x128xf32>
    %41 = arith.mulf %32, %13 : vector<16x128xf32>
    %42 = arith.mulf %26, %34 : vector<16x128xf32>
    %43 = arith.addf %41, %42 : vector<16x128xf32>
    %44 = math.tanh %43 : vector<16x128xf32>
    %45 = arith.mulf %40, %44 : vector<16x128xf32>
    %c0_23 = arith.constant 0 : index
    %c0_24 = arith.constant 0 : index
    %46 = vector.load %arg7[%c0_23, %c0_24] : memref<16x128xf32, #tpu.memory_space<vmem>>, vector<16x128xf32>
    tpu.vector_store %arg7[%c0_23, %c0_24], %45 {strides = array<i32>} : memref<16x128xf32, #tpu.memory_space<vmem>>, vector<16x128xf32>,
    %c0_25 = arith.constant 0 : index
    %c0_26 = arith.constant 0 : index
    %47 = vector.load %arg8[%c0_25, %c0_26] : memref<16x128xf32, #tpu.memory_space<vmem>>, vector<16x128xf32>
    tpu.vector_store %arg8[%c0_25, %c0_26], %43 {strides = array<i32>} : memref<16x128xf32, #tpu.memory_space<vmem>>, vector<16x128xf32>,
    %48 = arith.truncf %45 : vector<16x128xf32> to vector<16x128xbf16>
    %49 = arith.index_cast %c0_i32_10 : i32 to index
    %c0_27 = arith.constant 0 : index
    %c0_28 = arith.constant 0 : index
    %50 = vector.load %arg6[%49, %c0_27, %c0_28] : memref<4x16x128xbf16, #tpu.memory_space<vmem>>, vector<1x16x128xbf16>
    %51 = vector.shape_cast %50 : vector<1x16x128xbf16> to vector<16x128xbf16>
    %52 = vector.shape_cast %48 : vector<16x128xbf16> to vector<1x16x128xbf16>
    tpu.vector_store %arg6[%49, %c0_27, %c0_28], %52 {strides = array<i32>} : memref<4x16x128xbf16, #tpu.memory_space<vmem>>, vector<1x16x128xbf16>,
    %c1_i32 = arith.constant 1 : i32
    %c0_29 = arith.constant 0 : index
    %c0_30 = arith.constant 0 : index
    %53 = vector.load %arg7[%c0_29, %c0_30] : memref<16x128xf32, #tpu.memory_space<vmem>>, vector<16x128xf32>
    %c0_31 = arith.constant 0 : index
    %c0_32 = arith.constant 0 : index
    %54 = vector.load %arg8[%c0_31, %c0_32] : memref<16x128xf32, #tpu.memory_space<vmem>>, vector<16x128xf32>
    %55 = arith.index_cast %c1_i32 : i32 to index
    %c0_33 = arith.constant 0 : index
    %c0_34 = arith.constant 0 : index
    %56 = vector.load %arg9[%55, %c0_33, %c0_34] : memref<4x16x512xf32, #tpu.memory_space<vmem>>, vector<1x16x512xf32>
    %57 = vector.shape_cast %56 : vector<1x16x512xf32> to vector<16x512xf32>
    %58 = arith.truncf %53 : vector<16x128xf32> to vector<16x128xbf16>
    %c0_35 = arith.constant 0 : index
    %c0_36 = arith.constant 0 : index
    %59 = vector.load %arg4[%c0_35, %c0_36] : memref<128x512xbf16, #tpu.memory_space<vmem>>, vector<128x512xbf16>
    %cst_37 = arith.constant dense<0.000000e+00> : vector<16x512xf32>
    %60 = tpu.matmul %58, %59, %cst_37 {dimension_numbers = #tpu.dot_dimension_numbers<[1], [0], [0], [1], [0, 0, 1, 1], [], []>} : vector<16x128xbf16>, vector<128x512xbf16>, vector<16x512xf32> -> vector<16x512xf32>
    %61 = arith.addf %57, %60 : vector<16x512xf32>
    %62 = vector.extract_strided_slice %61 {offsets = [0, 0], sizes = [16, 128], strides = [1, 1]} : vector<16x512xf32> to vector<16x128xf32>
    %63 = arith.negf %62 : vector<16x128xf32>
    %64 = math.exp %63 : vector<16x128xf32>
    %cst_38 = arith.constant 1.000000e+00 : f32
    %65 = vector.broadcast %cst_38 : f32 to vector<16x128xf32>
    %66 = arith.addf %65, %64 : vector<16x128xf32>
    %67 = arith.divf %65, %66 : vector<16x128xf32>
    %68 = vector.extract_strided_slice %61 {offsets = [0, 128], sizes = [16, 128], strides = [1, 1]} : vector<16x512xf32> to vector<16x128xf32>
    %69 = arith.negf %68 : vector<16x128xf32>
    %70 = math.exp %69 : vector<16x128xf32>
    %cst_39 = arith.constant 1.000000e+00 : f32
    %71 = vector.broadcast %cst_39 : f32 to vector<16x128xf32>
    %72 = arith.addf %71, %70 : vector<16x128xf32>
    %73 = arith.divf %71, %72 : vector<16x128xf32>
    %74 = vector.extract_strided_slice %61 {offsets = [0, 256], sizes = [16, 128], strides = [1, 1]} : vector<16x512xf32> to vector<16x128xf32>
    %75 = math.tanh %74 : vector<16x128xf32>
    %76 = vector.extract_strided_slice %61 {offsets = [0, 384], sizes = [16, 128], strides = [1, 1]} : vector<16x512xf32> to vector<16x128xf32>
    %77 = arith.negf %76 : vector<16x128xf32>
    %78 = math.exp %77 : vector<16x128xf32>
    %cst_40 = arith.constant 1.000000e+00 : f32
    %79 = vector.broadcast %cst_40 : f32 to vector<16x128xf32>
    %80 = arith.addf %79, %78 : vector<16x128xf32>
    %81 = arith.divf %79, %80 : vector<16x128xf32>
    %82 = arith.mulf %73, %54 : vector<16x128xf32>
    %83 = arith.mulf %67, %75 : vector<16x128xf32>
    %84 = arith.addf %82, %83 : vector<16x128xf32>
    %85 = math.tanh %84 : vector<16x128xf32>
    %86 = arith.mulf %81, %85 : vector<16x128xf32>
    %c0_41 = arith.constant 0 : index
    %c0_42 = arith.constant 0 : index
    %87 = vector.load %arg7[%c0_41, %c0_42] : memref<16x128xf32, #tpu.memory_space<vmem>>, vector<16x128xf32>
    tpu.vector_store %arg7[%c0_41, %c0_42], %86 {strides = array<i32>} : memref<16x128xf32, #tpu.memory_space<vmem>>, vector<16x128xf32>,
    %c0_43 = arith.constant 0 : index
    %c0_44 = arith.constant 0 : index
    %88 = vector.load %arg8[%c0_43, %c0_44] : memref<16x128xf32, #tpu.memory_space<vmem>>, vector<16x128xf32>
    tpu.vector_store %arg8[%c0_43, %c0_44], %84 {strides = array<i32>} : memref<16x128xf32, #tpu.memory_space<vmem>>, vector<16x128xf32>,
    %89 = arith.truncf %86 : vector<16x128xf32> to vector<16x128xbf16>
    %90 = arith.index_cast %c1_i32 : i32 to index
    %c0_45 = arith.constant 0 : index
    %c0_46 = arith.constant 0 : index
    %91 = vector.load %arg6[%90, %c0_45, %c0_46] : memref<4x16x128xbf16, #tpu.memory_space<vmem>>, vector<1x16x128xbf16>
    %92 = vector.shape_cast %91 : vector<1x16x128xbf16> to vector<16x128xbf16>
    %93 = vector.shape_cast %89 : vector<16x128xbf16> to vector<1x16x128xbf16>
    tpu.vector_store %arg6[%90, %c0_45, %c0_46], %93 {strides = array<i32>} : memref<4x16x128xbf16, #tpu.memory_space<vmem>>, vector<1x16x128xbf16>,
    %c2_i32 = arith.constant 2 : i32
    %c0_47 = arith.constant 0 : index
    %c0_48 = arith.constant 0 : index
    %94 = vector.load %arg7[%c0_47, %c0_48] : memref<16x128xf32, #tpu.memory_space<vmem>>, vector<16x128xf32>
    %c0_49 = arith.constant 0 : index
    %c0_50 = arith.constant 0 : index
    %95 = vector.load %arg8[%c0_49, %c0_50] : memref<16x128xf32, #tpu.memory_space<vmem>>, vector<16x128xf32>
    %96 = arith.index_cast %c2_i32 : i32 to index
    %c0_51 = arith.constant 0 : index
    %c0_52 = arith.constant 0 : index
    %97 = vector.load %arg9[%96, %c0_51, %c0_52] : memref<4x16x512xf32, #tpu.memory_space<vmem>>, vector<1x16x512xf32>
    %98 = vector.shape_cast %97 : vector<1x16x512xf32> to vector<16x512xf32>
    %99 = arith.truncf %94 : vector<16x128xf32> to vector<16x128xbf16>
    %c0_53 = arith.constant 0 : index
    %c0_54 = arith.constant 0 : index
    %100 = vector.load %arg4[%c0_53, %c0_54] : memref<128x512xbf16, #tpu.memory_space<vmem>>, vector<128x512xbf16>
    %cst_55 = arith.constant dense<0.000000e+00> : vector<16x512xf32>
    %101 = tpu.matmul %99, %100, %cst_55 {dimension_numbers = #tpu.dot_dimension_numbers<[1], [0], [0], [1], [0, 0, 1, 1], [], []>} : vector<16x128xbf16>, vector<128x512xbf16>, vector<16x512xf32> -> vector<16x512xf32>
    %102 = arith.addf %98, %101 : vector<16x512xf32>
    %103 = vector.extract_strided_slice %102 {offsets = [0, 0], sizes = [16, 128], strides = [1, 1]} : vector<16x512xf32> to vector<16x128xf32>
    %104 = arith.negf %103 : vector<16x128xf32>
    %105 = math.exp %104 : vector<16x128xf32>
    %cst_56 = arith.constant 1.000000e+00 : f32
    %106 = vector.broadcast %cst_56 : f32 to vector<16x128xf32>
    %107 = arith.addf %106, %105 : vector<16x128xf32>
    %108 = arith.divf %106, %107 : vector<16x128xf32>
    %109 = vector.extract_strided_slice %102 {offsets = [0, 128], sizes = [16, 128], strides = [1, 1]} : vector<16x512xf32> to vector<16x128xf32>
    %110 = arith.negf %109 : vector<16x128xf32>
    %111 = math.exp %110 : vector<16x128xf32>
    %cst_57 = arith.constant 1.000000e+00 : f32
    %112 = vector.broadcast %cst_57 : f32 to vector<16x128xf32>
    %113 = arith.addf %112, %111 : vector<16x128xf32>
    %114 = arith.divf %112, %113 : vector<16x128xf32>
    %115 = vector.extract_strided_slice %102 {offsets = [0, 256], sizes = [16, 128], strides = [1, 1]} : vector<16x512xf32> to vector<16x128xf32>
    %116 = math.tanh %115 : vector<16x128xf32>
    %117 = vector.extract_strided_slice %102 {offsets = [0, 384], sizes = [16, 128], strides = [1, 1]} : vector<16x512xf32> to vector<16x128xf32>
    %118 = arith.negf %117 : vector<16x128xf32>
    %119 = math.exp %118 : vector<16x128xf32>
    %cst_58 = arith.constant 1.000000e+00 : f32
    %120 = vector.broadcast %cst_58 : f32 to vector<16x128xf32>
    %121 = arith.addf %120, %119 : vector<16x128xf32>
    %122 = arith.divf %120, %121 : vector<16x128xf32>
    %123 = arith.mulf %114, %95 : vector<16x128xf32>
    %124 = arith.mulf %108, %116 : vector<16x128xf32>
    %125 = arith.addf %123, %124 : vector<16x128xf32>
    %126 = math.tanh %125 : vector<16x128xf32>
    %127 = arith.mulf %122, %126 : vector<16x128xf32>
    %c0_59 = arith.constant 0 : index
    %c0_60 = arith.constant 0 : index
    %128 = vector.load %arg7[%c0_59, %c0_60] : memref<16x128xf32, #tpu.memory_space<vmem>>, vector<16x128xf32>
    tpu.vector_store %arg7[%c0_59, %c0_60], %127 {strides = array<i32>} : memref<16x128xf32, #tpu.memory_space<vmem>>, vector<16x128xf32>,
    %c0_61 = arith.constant 0 : index
    %c0_62 = arith.constant 0 : index
    %129 = vector.load %arg8[%c0_61, %c0_62] : memref<16x128xf32, #tpu.memory_space<vmem>>, vector<16x128xf32>
    tpu.vector_store %arg8[%c0_61, %c0_62], %125 {strides = array<i32>} : memref<16x128xf32, #tpu.memory_space<vmem>>, vector<16x128xf32>,
    %130 = arith.truncf %127 : vector<16x128xf32> to vector<16x128xbf16>
    %131 = arith.index_cast %c2_i32 : i32 to index
    %c0_63 = arith.constant 0 : index
    %c0_64 = arith.constant 0 : index
    %132 = vector.load %arg6[%131, %c0_63, %c0_64] : memref<4x16x128xbf16, #tpu.memory_space<vmem>>, vector<1x16x128xbf16>
    %133 = vector.shape_cast %132 : vector<1x16x128xbf16> to vector<16x128xbf16>
    %134 = vector.shape_cast %130 : vector<16x128xbf16> to vector<1x16x128xbf16>
    tpu.vector_store %arg6[%131, %c0_63, %c0_64], %134 {strides = array<i32>} : memref<4x16x128xbf16, #tpu.memory_space<vmem>>, vector<1x16x128xbf16>,
    %c3_i32 = arith.constant 3 : i32
    %c0_65 = arith.constant 0 : index
    %c0_66 = arith.constant 0 : index
    %135 = vector.load %arg7[%c0_65, %c0_66] : memref<16x128xf32, #tpu.memory_space<vmem>>, vector<16x128xf32>
    %c0_67 = arith.constant 0 : index
    %c0_68 = arith.constant 0 : index
    %136 = vector.load %arg8[%c0_67, %c0_68] : memref<16x128xf32, #tpu.memory_space<vmem>>, vector<16x128xf32>
    %137 = arith.index_cast %c3_i32 : i32 to index
    %c0_69 = arith.constant 0 : index
    %c0_70 = arith.constant 0 : index
    %138 = vector.load %arg9[%137, %c0_69, %c0_70] : memref<4x16x512xf32, #tpu.memory_space<vmem>>, vector<1x16x512xf32>
    %139 = vector.shape_cast %138 : vector<1x16x512xf32> to vector<16x512xf32>
    %140 = arith.truncf %135 : vector<16x128xf32> to vector<16x128xbf16>
    %c0_71 = arith.constant 0 : index
    %c0_72 = arith.constant 0 : index
    %141 = vector.load %arg4[%c0_71, %c0_72] : memref<128x512xbf16, #tpu.memory_space<vmem>>, vector<128x512xbf16>
    %cst_73 = arith.constant dense<0.000000e+00> : vector<16x512xf32>
    %142 = tpu.matmul %140, %141, %cst_73 {dimension_numbers = #tpu.dot_dimension_numbers<[1], [0], [0], [1], [0, 0, 1, 1], [], []>} : vector<16x128xbf16>, vector<128x512xbf16>, vector<16x512xf32> -> vector<16x512xf32>
    %143 = arith.addf %139, %142 : vector<16x512xf32>
    %144 = vector.extract_strided_slice %143 {offsets = [0, 0], sizes = [16, 128], strides = [1, 1]} : vector<16x512xf32> to vector<16x128xf32>
    %145 = arith.negf %144 : vector<16x128xf32>
    %146 = math.exp %145 : vector<16x128xf32>
    %cst_74 = arith.constant 1.000000e+00 : f32
    %147 = vector.broadcast %cst_74 : f32 to vector<16x128xf32>
    %148 = arith.addf %147, %146 : vector<16x128xf32>
    %149 = arith.divf %147, %148 : vector<16x128xf32>
    %150 = vector.extract_strided_slice %143 {offsets = [0, 128], sizes = [16, 128], strides = [1, 1]} : vector<16x512xf32> to vector<16x128xf32>
    %151 = arith.negf %150 : vector<16x128xf32>
    %152 = math.exp %151 : vector<16x128xf32>
    %cst_75 = arith.constant 1.000000e+00 : f32
    %153 = vector.broadcast %cst_75 : f32 to vector<16x128xf32>
    %154 = arith.addf %153, %152 : vector<16x128xf32>
    %155 = arith.divf %153, %154 : vector<16x128xf32>
    %156 = vector.extract_strided_slice %143 {offsets = [0, 256], sizes = [16, 128], strides = [1, 1]} : vector<16x512xf32> to vector<16x128xf32>
    %157 = math.tanh %156 : vector<16x128xf32>
    %158 = vector.extract_strided_slice %143 {offsets = [0, 384], sizes = [16, 128], strides = [1, 1]} : vector<16x512xf32> to vector<16x128xf32>
    %159 = arith.negf %158 : vector<16x128xf32>
    %160 = math.exp %159 : vector<16x128xf32>
    %cst_76 = arith.constant 1.000000e+00 : f32
    %161 = vector.broadcast %cst_76 : f32 to vector<16x128xf32>
    %162 = arith.addf %161, %160 : vector<16x128xf32>
    %163 = arith.divf %161, %162 : vector<16x128xf32>
    %164 = arith.mulf %155, %136 : vector<16x128xf32>
    %165 = arith.mulf %149, %157 : vector<16x128xf32>
    %166 = arith.addf %164, %165 : vector<16x128xf32>
    %167 = math.tanh %166 : vector<16x128xf32>
    %168 = arith.mulf %163, %167 : vector<16x128xf32>
    %c0_77 = arith.constant 0 : index
    %c0_78 = arith.constant 0 : index
    %169 = vector.load %arg7[%c0_77, %c0_78] : memref<16x128xf32, #tpu.memory_space<vmem>>, vector<16x128xf32>
    tpu.vector_store %arg7[%c0_77, %c0_78], %168 {strides = array<i32>} : memref<16x128xf32, #tpu.memory_space<vmem>>, vector<16x128xf32>,
    %c0_79 = arith.constant 0 : index
    %c0_80 = arith.constant 0 : index
    %170 = vector.load %arg8[%c0_79, %c0_80] : memref<16x128xf32, #tpu.memory_space<vmem>>, vector<16x128xf32>
    tpu.vector_store %arg8[%c0_79, %c0_80], %166 {strides = array<i32>} : memref<16x128xf32, #tpu.memory_space<vmem>>, vector<16x128xf32>,
    %171 = arith.truncf %168 : vector<16x128xf32> to vector<16x128xbf16>
    %172 = arith.index_cast %c3_i32 : i32 to index
    %c0_81 = arith.constant 0 : index
    %c0_82 = arith.constant 0 : index
    %173 = vector.load %arg6[%172, %c0_81, %c0_82] : memref<4x16x128xbf16, #tpu.memory_space<vmem>>, vector<1x16x128xbf16>
    %174 = vector.shape_cast %173 : vector<1x16x128xbf16> to vector<16x128xbf16>
    %175 = vector.shape_cast %171 : vector<16x128xbf16> to vector<1x16x128xbf16>
    tpu.vector_store %arg6[%172, %c0_81, %c0_82], %175 {strides = array<i32>} : memref<4x16x128xbf16, #tpu.memory_space<vmem>>, vector<1x16x128xbf16>,
    %c4_i32 = arith.constant 4 : i32
    return
  }
  func.func @transform_0(%arg0: i32, %arg1: i32) -> (i32, i32, i32) {
    %c0_i32 = arith.constant 0 : i32
    %c0_i32_0 = arith.constant 0 : i32
    return %arg1, %arg0, %c0_i32 : i32, i32, i32
  }
  func.func @transform_1(%arg0: i32, %arg1: i32) -> (i32, i32) {
    %c0_i32 = arith.constant 0 : i32
    %c0_i32_0 = arith.constant 0 : i32
    %c0_i32_1 = arith.constant 0 : i32
    return %c0_i32, %c0_i32_0 : i32, i32
  }
  func.func @transform_2(%arg0: i32, %arg1: i32) -> (i32, i32) {
    %c0_i32 = arith.constant 0 : i32
    %c0_i32_0 = arith.constant 0 : i32
    %c0_i32_1 = arith.constant 0 : i32
    return %c0_i32, %c0_i32_0 : i32, i32
  }
  func.func @transform_3(%arg0: i32, %arg1: i32) -> (i32, i32) {
    %c0_i32 = arith.constant 0 : i32
    %c0_i32_0 = arith.constant 0 : i32
    %c0_i32_1 = arith.constant 0 : i32
    return %c0_i32, %c0_i32_0 : i32, i32
  }
  func.func @transform_4(%arg0: i32, %arg1: i32) -> (i32, i32, i32) {
    %c0_i32 = arith.constant 0 : i32
    %c0_i32_0 = arith.constant 0 : i32
    return %arg1, %arg0, %c0_i32 : i32, i32, i32
  }
}

</mosaic_0001>

<bundles_post_ra>
// kernel: speech_embedder_forward.2
= control target key start
LH: loop header
LB: loop body
LE: loop exit
PB: predicated region body
PF: predicated region fallthrough
CT: control target
= control target key end

     0   :  { %s3463_s15 = smov 0   ;;  %s3465_s16 = smov 0   ;;  %s4942_s0 = inlined_call_operand.vmem [shape: bf16[8,32,64], index: 0, kind: input, shape index: {}]   ;;  %s4943_s1 = inlined_call_operand.vmem [shape: bf16[64,512], index: 1, kind: input, shape index: {}]   ;;  %s4944_s2 = inlined_call_operand.vmem [shape: bf16[128,512], index: 2, kind: input, shape index: {}]   ;;  %s4945_s3 = inlined_call_operand.vmem [shape: f32[1,512], index: 3, kind: input, shape index: {}]   ;;  %s4946_s4 = inlined_call_operand.vmem [shape: bf16[8,32,128], index: 4, kind: output, shape index: {}]  }
   0x1   :  { %s3467_s17 = smov 0   ;;  %s3469_s18 = smov 0  }
   0x2   :  { %s3471_s19 = smov 0   ;;  %s3473_s20 = smov 0  }
   0x3   :  { %s3475_s21 = smov 0  }
   0x4 LB: > { %s23_s22 = sadd.s32 1, %s3427_s19  ;;  %s26_s23 = sadd.s32 1, %s3431_s20  ;;  %s3435_s21 = sphi %s3475_s21, %s14_s21   ;;  %s3431_s20 = sphi %s3473_s20, %s4971_s20   ;;  %s3427_s19 = sphi %s3471_s19, %s4970_s19   ;;  %s3423_s18 = sphi %s3469_s18, %s4969_s18   ;;  %s3419_s17 = sphi %s3467_s17, %s4968_s17   ;;  %s3415_s16 = sphi %s3465_s16, %s4967_s16   ;;  %s3411_s15 = sphi %s3463_s15, %s4966_s15  }
   0x5   : > { %p24_p0 = scmp.ge.s32.totalorder %s23_s22, 2  ;;  %s2365_s24 = sadd.s32 4294967295, %s3435_s21  }
   0x6   : > { %p42_p1 = scmp.ne.s32.totalorder %s3415_s16, %s3411_s15  ;;  %p43_p2 = scmp.eq.s32.totalorder %s3435_s21, 0 }
   0x7   : > { %s4973_s22 = smov (%p24_p0, %s23_s22), 0  ;;  %s4975_s23 = smov (!%p24_p0, %s26_s23), %s3431_s20 }
   0x8   : > { %p28_p3 = scmp.ge.s32.totalorder %s4975_s23, 2  ;;  %p137_p4 = scmp.eq.s32.totalorder %s2365_s24, 3 }
   0x9   : > { %s30_s25 = ssub.s32 %s3427_s19, %s4973_s22  ;;  %p44_p5 = por %p43_p2, %p42_p1 }
   0xa   : > { %s4977_s23 = smov (%p28_p3, %s4975_s23), 0  ;;  %p3511_p6 = por %p137_p4, %p42_p1 }
   0xb   : > { %s31_s27 = ssub.s32 %s3431_s20, %s4977_s23  ;;  %s35_s29 = sadd.s32 1, %s3415_s16 }
   0xc   : > { %s32_s28 = sor.u32 %s31_s27, %s30_s25  ;;  %p2368_p8 = scmp.ge.s32.totalorder %s3435_s21, 4 }
   0xd   : > { %p33_p7 = scmp.eq.s32.totalorder %s32_s28, 0 }
   0xe   : > { %168 = sbr.rel (%p2368_p8) target bundleno = 30 (0x1e), region = 28 }
   0xf   : > { %s3519_s30 = scalar_select %p33_p7, %s3415_s16, %s35_s29  }
  0x13   : > { %171 = sbr.rel (!%p44_p5) target bundleno = 30 (0x1e), region = 32  ;;  %s173_s5 = sand.u32 (%p44_p5), 1, %s3415_s16  }
  0x14   : > { %s2371_s6 = sshll.u32 (%p44_p5), %s3431_s20, 1  ;;  %s2369_s7 = sshll.u32 (%p44_p5), %s173_s5, 5 }
  0x15   : > { %s3023_s8 = sshll.u32 (%p44_p5), %s3427_s19, 4  ;;  %s175_s14 = scalar_lea.vmem (%p44_p5), [#allocation5], %s2369_s7 }
  0x16   : > { %s179_s9 = sadd.s32 (%p44_p5), %s3023_s8, %s2371_s6 }
  0x17   : > { %s2373_s10 = sshll.u32 (%p44_p5), %s179_s9, 2 }
  0x18   : > { %s181_s13 = scalar_lea.vmem %s4942_s0, %s2373_s10 }
  0x19   : > { %v198_v0 = vld [vmem:[%s181_s13] sm:$0xff]   ;;  %v202_v1 = vld [vmem:[%s181_s13 + $0x10] sm:$0xff]  }
  0x1a   : > { %v206_v2 = vld [vmem:[%s181_s13 + $0x20] sm:$0xff]   ;;  %199 = vst [vmem:[%s175_s14] sm:$0xff] %v198_v0   ;;  %v210_v3 = vld [vmem:[%s181_s13 + $0x30] sm:$0xff]  }
  0x1b   : > { %203 = vst [vmem:[%s175_s14 + $0x8] sm:$0xff] %v202_v1  }
  0x1c   : > { %207 = vst [vmem:[%s175_s14 + $0x10] sm:$0xff] %v206_v2  }
  0x1d   : > { %211 = vst [vmem:[%s175_s14 + $0x18] sm:$0xff] %v210_v3  }
  0x1e PF: > { %p2374_p9 = scmp.ge.s32.totalorder %s3435_s21, 1  ;;  %p252_p10 = scmp.lt.s32.totalorder %s3435_s21, 5 }
  0x20   : > { %p253_p11 = pnand %p2374_p9, %p252_p10 }
  0x21   : > { %s259_s24 = sand.u32 (!%p253_p11), 1, %s3411_s15   ;;  %p2377_p12 = scmp.ne.s32.totalorder (!%p253_p11), %s3419_s17, 0 }
  0x22   : > { %256 = sbr.rel (%p253_p11) target bundleno = 871 (0x367), region = 73  ;;  %s2375_s25 = sshll.u32 (!%p253_p11), %s259_s24, 5 }
  0x23   : > { %s3531_s27 = scalar_lea.vmem (!%p253_p11), [#allocation5], %s2375_s25  ;;  %s3533_s28 = scalar_lea.vmem (!%p253_p11), [#allocation6], %s2375_s25 }
  0x27   : > { %291 = sbr.rel (%p2377_p12) target bundleno = 49 (0x31), region = 81 }
  0x2c   : > { %v3437_v4 = vmov 0.0  }
  0x2d   : > { %292 = vst [vmem:[#allocation2] sm:$0xff] %v3437_v4 }
  0x2e   : > { %293 = vst [vmem:[#allocation2 + $0x8] sm:$0xff] %v3437_v4 }
  0x2f   : > { %294 = vst [vmem:[#allocation3 + $0x8] sm:$0xff] %v3437_v4 }
  0x30   : > { %295 = vst [vmem:[#allocation3] sm:$0xff] %v3437_v4 }
  0x31 PF: > { %v2444_v5 = vld [vmem:[%s4943_s1 + $0x60] sm:$0xf]  ;;  %v3042_v6 = vld [vmem:[%s4943_s1 + $0x6c] sm:$0xf0]  ;;  %v3040_v7 = vld [vmem:[%s4943_s1 + $0x64] sm:$0xf] }
  0x32   : > { %v2445_v8 = vor.u32 %v3042_v6, %v2444_v5  ;;  %v2446_v9 = vld [vmem:[%s4943_s1 + $0x70] sm:$0xf0]  ;;  %v2452_v10 = vld [vmem:[%s4943_s1 + $0x68] sm:$0xf]  ;;  %v3043_v11 = vld [vmem:[%s4943_s1 + $0x74] sm:$0xf0] }
  0x33   : > { %v2449_v12 = vor.u32 %v3040_v7, %v2446_v9  ;;  %v2453_v13 = vor.u32 %v3043_v11, %v2452_v10  ;;  %v3041_v14 = vld [vmem:[%s4943_s1 + $0x6c] sm:$0xf]  ;;  %v2454_v15 = vld [vmem:[%s4943_s1 + $0x78] sm:$0xf0]  ;;  %v2428_v16 = vld [vmem:[%s4943_s1 + $0x40] sm:$0xf] }
  0x34   : > { %447 = vmatpush.bf16.msra.mxu0 %v2445_v8  ;;  %v2457_v17 = vor.u32 %v3041_v14, %v2454_v15  ;;  %v3038_v18 = vld [vmem:[%s4943_s1 + $0x4c] sm:$0xf0]  ;;  %v3036_v19 = vld [vmem:[%s4943_s1 + $0x44] sm:$0xf]  ;;  %v2430_v20 = vld [vmem:[%s4943_s1 + $0x50] sm:$0xf0] }
  0x35   : > { %476 = vmatpush.bf16.msra.mxu1 %v2449_v12  ;;  %505 = vmatpush.bf16.msra.mxu2 %v2453_v13  ;;  %v2429_v21 = vor.u32 %v3038_v18, %v2428_v16  ;;  %v2433_v22 = vor.u32 %v3036_v19, %v2430_v20  ;;  %v2436_v23 = vld [vmem:[%s4943_s1 + $0x48] sm:$0xf]  ;;  %v3039_v24 = vld [vmem:[%s4943_s1 + $0x54] sm:$0xf0]  ;;  %v3037_v25 = vld [vmem:[%s4943_s1 + $0x4c] sm:$0xf] }
  0x36   : > { %534 = vmatpush.bf16.msra.mxu3 %v2457_v17  ;;  %v2437_v26 = vor.u32 %v3039_v24, %v2436_v23  ;;  %v2438_v27 = vld [vmem:[%s4943_s1 + $0x58] sm:$0xf0]  ;;  %v2412_v28 = vld [vmem:[%s4943_s1 + $0x20] sm:$0xf]  ;;  %v3034_v29 = vld [vmem:[%s4943_s1 + $0x2c] sm:$0xf0] }
  0x37   : > { %v2441_v30 = vor.u32 %v3037_v25, %v2438_v27  ;;  %v3032_v31 = vld [vmem:[%s4943_s1 + $0x24] sm:$0xf]  ;;  %v2414_v32 = vld [vmem:[%s4943_s1 + $0x30] sm:$0xf0]  ;;  %v2420_v33 = vld [vmem:[%s4943_s1 + $0x28] sm:$0xf]  ;;  %v2413_v34 = vor.u32 %v3034_v29, %v2412_v28 }
  0x38   : > { %448 = vmatpush.bf16.msra.mxu0 %v2429_v21  ;;  %v3035_v35 = vld [vmem:[%s4943_s1 + $0x34] sm:$0xf0]  ;;  %v3033_v36 = vld [vmem:[%s4943_s1 + $0x2c] sm:$0xf]  ;;  %v2422_v37 = vld [vmem:[%s4943_s1 + $0x38] sm:$0xf0]  ;;  %v2417_v38 = vor.u32 %v3032_v31, %v2414_v32 }
  0x39   : > { %477 = vmatpush.bf16.msra.mxu1 %v2433_v22  ;;  %506 = vmatpush.bf16.msra.mxu2 %v2437_v26  ;;  %v2421_v39 = vor.u32 %v3035_v35, %v2420_v33  ;;  %v2396_v40 = vld [vmem:[%s4943_s1] sm:$0xf]  ;;  %v3030_v41 = vld [vmem:[%s4943_s1 + $0xc] sm:$0xf0]  ;;  %v3028_v42 = vld [vmem:[%s4943_s1 + $0x4] sm:$0xf]  ;;  %v2425_v43 = vor.u32 %v3033_v36, %v2422_v37 }
  0x3a   : > { %535 = vmatpush.bf16.msra.mxu3 %v2441_v30  ;;  %v2398_v44 = vld [vmem:[%s4943_s1 + $0x10] sm:$0xf0]  ;;  %v2404_v45 = vld [vmem:[%s4943_s1 + $0x8] sm:$0xf]  ;;  %v3031_v46 = vld [vmem:[%s4943_s1 + $0x14] sm:$0xf0]  ;;  %v2397_v49 = vor.u32 %v3030_v41, %v2396_v40 }
  0x3b   : > { %v3029_v47 = vld [vmem:[%s4943_s1 + $0xc] sm:$0xf]  ;;  %v2406_v48 = vld [vmem:[%s4943_s1 + $0x18] sm:$0xf0]  ;;  %v2588_v50 = vld [vmem:[%s4944_s2 + $0xe0] sm:$0xf]  ;;  %v2401_v53 = vor.u32 %v3028_v42, %v2398_v44  ;;  %v2405_v54 = vor.u32 %v3031_v46, %v2404_v45 }
  0x3c   : > { %449 = vmatpush.bf16.msra.mxu0 %v2413_v34  ;;  %v3074_v51 = vld [vmem:[%s4944_s2 + $0xec] sm:$0xf0]  ;;  %v3072_v52 = vld [vmem:[%s4944_s2 + $0xe4] sm:$0xf]  ;;  %v2590_v55 = vld [vmem:[%s4944_s2 + $0xf0] sm:$0xf0]  ;;  %v2409_v56 = vor.u32 %v3029_v47, %v2406_v48 }
  0x3d   : > { %478 = vmatpush.bf16.msra.mxu1 %v2417_v38  ;;  %507 = vmatpush.bf16.msra.mxu2 %v2421_v39  ;;  %v3024_v57 = vld [vmem:[%s3531_s27] sm:$0xff]  ;;  %vm430_vm0 = vcmask 523264   ;;  %v2589_v58 = vor.u32 %v3074_v51, %v2588_v50  ;;  %v3073_v59 = vld [vmem:[%s4944_s2 + $0xec] sm:$0xf]  ;;  %v2598_v60 = vld [vmem:[%s4944_s2 + $0xf8] sm:$0xf0]  ;;  %v2593_v61 = vor.u32 %v3072_v52, %v2590_v55 }
  0x3e   : > { %536 = vmatpush.bf16.msra.mxu3 %v2425_v43  ;;  %v2572_v62 = vld [vmem:[%s4944_s2 + $0xc0] sm:$0xf]  ;;  %v3070_v63 = vld [vmem:[%s4944_s2 + $0xcc] sm:$0xf0]  ;;  %v3068_v0 = vld [vmem:[%s4944_s2 + $0xc4] sm:$0xf]  ;;  %v2601_v5 = vor.u32 %v3073_v59, %v2598_v60 }
  0x3f   : > { %v2574_v1 = vld [vmem:[%s4944_s2 + $0xd0] sm:$0xf0]  ;;  %v2596_v2 = vld [vmem:[%s4944_s2 + $0xe8] sm:$0xf]  ;;  %v3075_v3 = vld [vmem:[%s4944_s2 + $0xf4] sm:$0xf0]  ;;  %v2573_v6 = vor.u32 %v3070_v63, %v2572_v62 }
  0x40   : > { %450 = vmatpush.bf16.msra.mxu0 %v2397_v49  ;;  %v2597_v4 = vor.u32 %v3075_v3, %v2596_v2  ;;  %v3069_v7 = vld [vmem:[%s4944_s2 + $0xcc] sm:$0xf]  ;;  %v2582_v8 = vld [vmem:[%s4944_s2 + $0xd8] sm:$0xf0]  ;;  %v2556_v9 = vld [vmem:[%s4944_s2 + $0xa0] sm:$0xf]  ;;  %v2577_v10 = vor.u32 %v3068_v0, %v2574_v1 }
  0x41   : > { %479 = vmatpush.bf16.msra.mxu1 %v2401_v53  ;;  %508 = vmatpush.bf16.msra.mxu2 %v2405_v54  ;;  %v3066_v11 = vld [vmem:[%s4944_s2 + $0xac] sm:$0xf0]  ;;  %v2580_v12 = vld [vmem:[%s4944_s2 + $0xc8] sm:$0xf]  ;;  %v3071_v13 = vld [vmem:[%s4944_s2 + $0xd4] sm:$0xf0]  ;;  %v2585_v17 = vor.u32 %v3069_v7, %v2582_v8 }
  0x42   : > { %537 = vmatpush.bf16.msra.mxu3 %v2409_v56  ;;  %v3064_v14 = vld [vmem:[%s4944_s2 + $0xa4] sm:$0xf]  ;;  %v2558_v15 = vld [vmem:[%s4944_s2 + $0xb0] sm:$0xf0]  ;;  %v2581_v16 = vor.u32 %v3071_v13, %v2580_v12  ;;  %v2557_v18 = vor.u32 %v3066_v11, %v2556_v9  ;;  %v3065_v19 = vld [vmem:[%s4944_s2 + $0xac] sm:$0xf] }
  0x43   : > { %2458 = vmatmul.msk.bf16.vlgmr.msra.gmra.mxu0 %vm430_vm0, %v3024_v57  ;;  %v2564_v20 = vld [vmem:[%s4944_s2 + $0xa8] sm:$0xf]  ;;  %v3067_v21 = vld [vmem:[%s4944_s2 + $0xb4] sm:$0xf0]  ;;  %v2561_v22 = vor.u32 %v3064_v14, %v2558_v15  ;;  %v2566_v23 = vld [vmem:[%s4944_s2 + $0xb8] sm:$0xf0] }
  0x44   : > { %796 = vmatpush.bf16.msrb.mxu0 %v2589_v58  ;;  %2462 = vmatmul.msk.bf16.vlgmr.msra.gmra.mxu1 %vm430_vm0, %v3024_v57  ;;  %v2540_v24 = vld [vmem:[%s4944_s2 + $0x80] sm:$0xf]  ;;  %v3062_v25 = vld [vmem:[%s4944_s2 + $0x8c] sm:$0xf0]  ;;  %v3060_v26 = vld [vmem:[%s4944_s2 + $0x84] sm:$0xf]  ;;  %v2565_v28 = vor.u32 %v3067_v21, %v2564_v20  ;;  %v2569_v29 = vor.u32 %v3065_v19, %v2566_v23 }
  0x45   : > { %810 = vmatpush.bf16.msrb.mxu1 %v2593_v61  ;;  %2466 = vmatmul.msk.bf16.vlgmr.msra.gmra.mxu2 %vm430_vm0, %v3024_v57  ;;  %v2542_v27 = vld [vmem:[%s4944_s2 + $0x90] sm:$0xf0]  ;;  %v2541_v30 = vor.u32 %v3062_v25, %v2540_v24  ;;  %v3061_v31 = vld [vmem:[%s4944_s2 + $0x8c] sm:$0xf]  ;;  %v2548_v32 = vld [vmem:[%s4944_s2 + $0x88] sm:$0xf] }
  0x46   : > { %2470 = vmatmul.msk.bf16.vlgmr.msra.gmra.mxu3 %vm430_vm0, %v3024_v57  ;;  %824 = vmatpush.bf16.msrb.mxu2 %v2597_v4  ;;  %v3063_v33 = vld [vmem:[%s4944_s2 + $0x94] sm:$0xf0]  ;;  %v2545_v34 = vor.u32 %v3060_v26, %v2542_v27  ;;  %v2550_v35 = vld [vmem:[%s4944_s2 + $0x98] sm:$0xf0]  ;;  %v2524_v36 = vld [vmem:[%s4944_s2 + $0x60] sm:$0xf] }
  0x47   : > { %838 = vmatpush.bf16.msrb.mxu3 %v2601_v5  ;;  %v3058_v37 = vld [vmem:[%s4944_s2 + $0x6c] sm:$0xf0]  ;;  %v3056_v38 = vld [vmem:[%s4944_s2 + $0x64] sm:$0xf]  ;;  %v2526_v39 = vld [vmem:[%s4944_s2 + $0x70] sm:$0xf0]  ;;  %v2549_v41 = vor.u32 %v3063_v33, %v2548_v32  ;;  %v2553_v42 = vor.u32 %v3061_v31, %v2550_v35 }
  0x48   : > { %797 = vmatpush.bf16.msrb.mxu0 %v2573_v6  ;;  %v3025_v40 = vld [vmem:[%s3531_s27 + $0x8] sm:$0xff]  ;;  %v2525_v43 = vor.u32 %v3058_v37, %v2524_v36  ;;  %v3059_v46 = vld [vmem:[%s4944_s2 + $0x74] sm:$0xf0]  ;;  %v2529_v47 = vor.u32 %v3056_v38, %v2526_v39  ;;  %v2534_v48 = vld [vmem:[%s4944_s2 + $0x78] sm:$0xf0]  ;;  %s3018_s9 = sshll.u32 (%p3511_p6), %s3423_s18, 1 }
  0x49   : > { %811 = vmatpush.bf16.msrb.mxu1 %v2577_v10  ;;  %v3057_v44 = vld [vmem:[%s4944_s2 + $0x6c] sm:$0xf]  ;;  %v2532_v45 = vld [vmem:[%s4944_s2 + $0x68] sm:$0xf]  ;;  %v2508_v49 = vld [vmem:[%s4944_s2 + $0x40] sm:$0xf] }
  0x4a   : > { %825 = vmatpush.bf16.msrb.mxu2 %v2581_v16  ;;  %v3054_v50 = vld [vmem:[%s4944_s2 + $0x4c] sm:$0xf0]  ;;  %v3052_v51 = vld [vmem:[%s4944_s2 + $0x44] sm:$0xf]  ;;  %v2510_v52 = vld [vmem:[%s4944_s2 + $0x50] sm:$0xf0]  ;;  %v2533_v53 = vor.u32 %v3059_v46, %v2532_v45  ;;  %v2537_v54 = vor.u32 %v3057_v44, %v2534_v48 }
  0x4b   : > { %839 = vmatpush.bf16.msrb.mxu3 %v2585_v17  ;;  %v2509_v55 = vor.u32 %v3054_v50, %v2508_v49  ;;  %v2513_v56 = vor.u32 %v3052_v51, %v2510_v52  ;;  %v3053_v57 = vld [vmem:[%s4944_s2 + $0x4c] sm:$0xf]  ;;  %v2518_v58 = vld [vmem:[%s4944_s2 + $0x58] sm:$0xf0]  ;;  %v2492_v59 = vld [vmem:[%s4944_s2 + $0x20] sm:$0xf] }
  0x4c   : > { %798 = vmatpush.bf16.msrb.mxu0 %v2557_v18  ;;  %v3050_v60 = vld [vmem:[%s4944_s2 + $0x2c] sm:$0xf0]  ;;  %v3048_v61 = vld [vmem:[%s4944_s2 + $0x24] sm:$0xf]  ;;  %v2521_v62 = vor.u32 %v3053_v57, %v2518_v58  ;;  %v2494_v0 = vld [vmem:[%s4944_s2 + $0x30] sm:$0xf0] }
  0x4d   : > { %812 = vmatpush.bf16.msrb.mxu1 %v2561_v22  ;;  %v2493_v63 = vor.u32 %v3050_v60, %v2492_v59  ;;  %v2516_v1 = vld [vmem:[%s4944_s2 + $0x48] sm:$0xf]  ;;  %v3055_v2 = vld [vmem:[%s4944_s2 + $0x54] sm:$0xf0]  ;;  %v2497_v3 = vor.u32 %v3048_v61, %v2494_v0  ;;  %v3049_v5 = vld [vmem:[%s4944_s2 + $0x2c] sm:$0xf] }
  0x4e   : > { %826 = vmatpush.bf16.msrb.mxu2 %v2565_v28  ;;  %v2517_v4 = vor.u32 %v3055_v2, %v2516_v1  ;;  %v2502_v6 = vld [vmem:[%s4944_s2 + $0x38] sm:$0xf0]  ;;  %v2476_v7 = vld [vmem:[%s4944_s2] sm:$0xf]  ;;  %v3046_v8 = vld [vmem:[%s4944_s2 + $0xc] sm:$0xf0] }
  0x4f   : > { %840 = vmatpush.bf16.msrb.mxu3 %v2569_v29  ;;  %v3044_v9 = vld [vmem:[%s4944_s2 + $0x4] sm:$0xf]  ;;  %v2478_v10 = vld [vmem:[%s4944_s2 + $0x10] sm:$0xf0]  ;;  %v2500_v11 = vld [vmem:[%s4944_s2 + $0x28] sm:$0xf]  ;;  %v2505_v13 = vor.u32 %v3049_v5, %v2502_v6  ;;  %v2477_v14 = vor.u32 %v3046_v8, %v2476_v7 }
  0x50   : > { %799 = vmatpush.bf16.msrb.mxu0 %v2541_v30  ;;  %v3051_v12 = vld [vmem:[%s4944_s2 + $0x34] sm:$0xf0]  ;;  %v2484_v16 = vld [vmem:[%s4944_s2 + $0x8] sm:$0xf]  ;;  %v2481_v18 = vor.u32 %v3044_v9, %v2478_v10  ;;  %v3045_v19 = vld [vmem:[%s4944_s2 + $0xc] sm:$0xf] }
  0x51   : > { %813 = vmatpush.bf16.msrb.mxu1 %v2545_v34  ;;  %v2501_v15 = vor.u32 %v3051_v12, %v2500_v11  ;;  %v3047_v17 = vld [vmem:[%s4944_s2 + $0x14] sm:$0xf0]  ;;  %v2486_v20 = vld [vmem:[%s4944_s2 + $0x18] sm:$0xf0]  ;;  %v3026_v23 = vld [vmem:[%s3531_s27 + $0x10] sm:$0xff]  ;;  %s3172_s10 = sshll.u32 (%p3511_p6), %s3419_s17, 4 }
  0x52   : > { %827 = vmatpush.bf16.msrb.mxu2 %v2549_v41  ;;  %v2485_v21 = vor.u32 %v3047_v17, %v2484_v16  ;;  %v2489_v22 = vor.u32 %v3045_v19, %v2486_v20  ;;  %v3027_v24 = vld [vmem:[%s3531_s27 + $0x18] sm:$0xff]  ;;  %v591_v25 = vld [vmem:[#allocation2] sm:$0xff]  ;;  %v592_v26 = vld [vmem:[#allocation2 + $0x8] sm:$0xff]  ;;  %s2219_s11 = sadd.s32 (%p3511_p6), %s3172_s10, %s3018_s9 }
  0x53   : > { %841 = vmatpush.bf16.msrb.mxu3 %v2553_v42  ;;  %2459 = vmatmul.msk.bf16.gmra.mxu0 %vm430_vm0, %v3025_v40  ;;  %v603_v27 = vpack.c.bf16 %v592_v26, %v591_v25  ;;  %v320_v34 = vld [vmem:[%s4945_s3] sm:$0xf]  ;;  %v2724_v25 = vld [vmem:[%s4944_s2 + $0xf0] sm:$0xf0]  ;;  %v2730_v26 = vld [vmem:[%s4944_s2 + $0xe8] sm:$0xf] }
  0x54   : > { %800 = vmatpush.bf16.msrb.mxu0 %v2525_v43  ;;  %2463 = vmatmul.msk.bf16.gmra.mxu1 %vm430_vm0, %v3025_v40  ;;  %v3859_v35 = vperm.slane %v320_v34, 0  ;;  %v3863_v37 = vperm.slane %v320_v34, 1  ;;  %v3873_v43 = vperm.slane %v320_v34, 2  ;;  %v3875_v44 = vperm.slane %v320_v34, 3  ;;  %v3107_v34 = vld [vmem:[%s4944_s2 + $0xf4] sm:$0xf0] }
  0x55   : > { %814 = vmatpush.bf16.msrb.mxu1 %v2529_v47  ;;  %2467 = vmatmul.msk.bf16.gmra.mxu2 %vm430_vm0, %v3025_v40  ;;  %s3020_s12 = sshll.u32 (%p3511_p6), %s2219_s11, 2 }
  0x56   : > { %2471 = vmatmul.msk.bf16.gmra.mxu3 %vm430_vm0, %v3025_v40  ;;  %828 = vmatpush.bf16.msrb.mxu2 %v2533_v53  ;;  %s2221_s14 = scalar_lea.vmem (%p3511_p6), %s4946_s4, %s3020_s12 }
  0x57   : > { %842 = vmatpush.bf16.msrb.mxu3 %v2537_v54 }
  0x58   : > { %801 = vmatpush.bf16.msrb.mxu0 %v2509_v55 }
  0x59   : > { %815 = vmatpush.bf16.msrb.mxu1 %v2513_v56 }
  0x5a   : > { %829 = vmatpush.bf16.msrb.mxu2 %v2517_v4 }
  0x5b   : > { %843 = vmatpush.bf16.msrb.mxu3 %v2521_v62 }
  0x5c   : > { %802 = vmatpush.bf16.msrb.mxu0 %v2493_v63 }
  0x5d   : > { %816 = vmatpush.bf16.msrb.mxu1 %v2497_v3 }
  0x5e   : > { %830 = vmatpush.bf16.msrb.mxu2 %v2501_v15 }
  0x5f   : > { %844 = vmatpush.bf16.msrb.mxu3 %v2505_v13 }
  0x60   : > { %803 = vmatpush.bf16.msrb.mxu0 %v2477_v14 }
  0x61   : > { %817 = vmatpush.bf16.msrb.mxu1 %v2481_v18 }
  0x62   : > { %831 = vmatpush.bf16.msrb.mxu2 %v2485_v21  ;;  %v2722_v21 = vld [vmem:[%s4944_s2 + $0xe0] sm:$0xf] }
  0x63   : > { %845 = vmatpush.bf16.msrb.mxu3 %v2489_v22  ;;  %2460 = vmatmul.msk.bf16.gmra.mxu0 %vm430_vm0, %v3026_v23  ;;  %v3106_v22 = vld [vmem:[%s4944_s2 + $0xec] sm:$0xf0] }
  0x64   : > { %2464 = vmatmul.msk.bf16.gmra.mxu1 %vm430_vm0, %v3026_v23 }
  0x65   : > { %2468 = vmatmul.msk.bf16.gmra.mxu2 %vm430_vm0, %v3026_v23 }
  0x66   : > { %2472 = vmatmul.msk.bf16.gmra.mxu3 %vm430_vm0, %v3026_v23  ;;  %v2723_v23 = vor.u32 %v3106_v22, %v2722_v21 }
  0x68   : > { %1200 = vmatpush.bf16.msra.mxu0 %v2723_v23  ;;  %v2690_v23 = vld [vmem:[%s4944_s2 + $0xa0] sm:$0xf] }
  0x73   : > { %2461 = vmatmul.msk.bf16.gmra.mxu0 %vm430_vm0, %v3027_v24 }
  0x74   : > { %2465 = vmatmul.msk.bf16.gmra.mxu1 %vm430_vm0, %v3027_v24 }
  0x75   : > { %2469 = vmatmul.msk.bf16.gmra.mxu2 %vm430_vm0, %v3027_v24 }
  0x76   : > { %2473 = vmatmul.msk.bf16.gmra.mxu3 %vm430_vm0, %v3027_v24  ;;  %v3104_v24 = vld [vmem:[%s4944_s2 + $0xe4] sm:$0xf] }
  0x83   : > { %804 = vmatmul.bf16.vlgmr.msrb.gmra.mxu0 %v603_v27 }
  0x84   : > { %818 = vmatmul.bf16.vlgmr.msrb.gmra.mxu1 %v603_v27 }
  0x85   : > { %832 = vmatmul.bf16.vlgmr.msrb.gmra.mxu2 %v603_v27 }
  0x86   : > { %846 = vmatmul.bf16.vlgmr.msrb.gmra.mxu3 %v603_v27  ;;  %v2727_v27 = vor.u32 %v3104_v24, %v2724_v25  ;;  %v3098_v24 = vld [vmem:[%s4944_s2 + $0xac] sm:$0xf0]  ;;  %v3096_v25 = vld [vmem:[%s4944_s2 + $0xa4] sm:$0xf] }
  0x88   : > { %1214 = vmatpush.bf16.msra.mxu1 %v2727_v27  ;;  %v2691_v27 = vor.u32 %v3098_v24, %v2690_v23 }
  0xc0   : > { %v3844_v28 = vpop.f32.mrf.mxu0 }
  0xc1   : > { %v3846_v29 = vpop.f32.mrf.mxu1 }
  0xc8   : > { %v3848_v30 = vpop.f32.mrf.mxu2  ;;  %v3852_v32 = vpop.f32.mrf.mxu0 }
  0xc9   : > { %v3850_v31 = vpop.f32.mrf.mxu3  ;;  %v3854_v33 = vpop.f32.mrf.mxu1 }
  0xd0   : > { %v3861_v36 = vpop.f32.mrf.mxu2  ;;  %v457_v39 = vpop.f32.mrf.mxu0 }
  0xd1   : > { %v3865_v38 = vpop.f32.mrf.mxu3  ;;  %v3868_v40 = vadd.f32 %v457_v39, %v3859_v35  ;;  %v486_v41 = vpop.f32.mrf.mxu1  ;;  %v3105_v39 = vld [vmem:[%s4944_s2 + $0xec] sm:$0xf] }
  0xd2   : > { %v3871_v42 = vadd.f32 %v486_v41, %v3863_v37  ;;  %v2732_v41 = vld [vmem:[%s4944_s2 + $0xf8] sm:$0xf0] }
  0xd8   : > { %v515_v45 = vpop.f32.mrf.mxu2  ;;  %v459_v48 = vpop.f32.mrf.mxu0 }
  0xd9   : > { %v3878_v46 = vadd.f32 %v515_v45, %v3873_v43  ;;  %v544_v47 = vpop.f32.mrf.mxu3  ;;  %v3884_v50 = vadd.f32 %v459_v48, %v3859_v35  ;;  %v488_v51 = vpop.f32.mrf.mxu1  ;;  %v2731_v45 = vor.u32 %v3107_v34, %v2730_v26  ;;  %v2706_v48 = vld [vmem:[%s4944_s2 + $0xc0] sm:$0xf]  ;;  %v2692_v34 = vld [vmem:[%s4944_s2 + $0xb0] sm:$0xf0] }
  0xda   : > { %v3881_v49 = vadd.f32 %v544_v47, %v3875_v44  ;;  %v3887_v52 = vadd.f32 %v488_v51, %v3863_v37  ;;  %v2735_v47 = vor.u32 %v3105_v39, %v2732_v41  ;;  %v3102_v51 = vld [vmem:[%s4944_s2 + $0xcc] sm:$0xf0]  ;;  %v2698_v39 = vld [vmem:[%s4944_s2 + $0xa8] sm:$0xf] }
  0xdb   : > { %1228 = vmatpush.bf16.msra.mxu2 %v2731_v45  ;;  %v2695_v45 = vor.u32 %v3096_v25, %v2692_v34  ;;  %v3088_v34 = vld [vmem:[%s4944_s2 + $0x64] sm:$0xf] }
  0xdc   : > { %1242 = vmatpush.bf16.msra.mxu3 %v2735_v47  ;;  %v3099_v47 = vld [vmem:[%s4944_s2 + $0xb4] sm:$0xf0] }
  0xe0   : > { %v517_v53 = vpop.f32.mrf.mxu2  ;;  %v462_v56 = vpop.f32.mrf.mxu0 }
  0xe1   : > { %v3890_v54 = vadd.f32 %v517_v53, %v3873_v43  ;;  %v546_v55 = vpop.f32.mrf.mxu3  ;;  %v3896_v58 = vadd.f32 %v462_v56, %v3859_v35  ;;  %v491_v59 = vpop.f32.mrf.mxu1  ;;  %v3100_v53 = vld [vmem:[%s4944_s2 + $0xc4] sm:$0xf] }
  0xe2   : > { %v3893_v57 = vadd.f32 %v546_v55, %v3875_v44  ;;  %v3899_v60 = vadd.f32 %v491_v59, %v3863_v37  ;;  %v453_v55 = vadd.f32 %v3844_v28, %v3859_v35  ;;  %v2707_v59 = vor.u32 %v3102_v51, %v2706_v48  ;;  %v3097_v48 = vld [vmem:[%s4944_s2 + $0xac] sm:$0xf] }
  0xe3   : > { %v2699_v51 = vor.u32 %v3099_v47, %v2698_v39  ;;  %v2660_v47 = vld [vmem:[%s4944_s2 + $0x70] sm:$0xf0] }
  0xe4   : > { %1201 = vmatpush.bf16.msra.mxu0 %v2707_v59  ;;  %v3094_v59 = vld [vmem:[%s4944_s2 + $0x8c] sm:$0xf0] }
  0xe8   : > { %v520_v61 = vpop.f32.mrf.mxu2  ;;  %v464_v0 = vpop.f32.mrf.mxu0  ;;  %1202 = vmatpush.bf16.msra.mxu0 %v2691_v27 }
  0xe9   : > { %v3902_v62 = vadd.f32 %v520_v61, %v3873_v43  ;;  %v549_v63 = vpop.f32.mrf.mxu3  ;;  %v3908_v2 = vadd.f32 %v464_v0, %v3859_v35  ;;  %v493_v3 = vpop.f32.mrf.mxu1  ;;  %v2708_v61 = vld [vmem:[%s4944_s2 + $0xd0] sm:$0xf0]  ;;  %v3103_v0 = vld [vmem:[%s4944_s2 + $0xd4] sm:$0xf0] }
  0xea   : > { %v3905_v1 = vadd.f32 %v549_v63, %v3875_v44  ;;  %v3911_v4 = vadd.f32 %v493_v3, %v3863_v37  ;;  %v2714_v63 = vld [vmem:[%s4944_s2 + $0xc8] sm:$0xf]  ;;  %v482_v3 = vadd.f32 %v3846_v29, %v3863_v37 }
  0xf0   : > { %v522_v5 = vpop.f32.mrf.mxu2  ;;  %v467_v8 = vpop.f32.mrf.mxu0 }
  0xf1   : > { %v3914_v6 = vadd.f32 %v522_v5, %v3873_v43  ;;  %v551_v7 = vpop.f32.mrf.mxu3  ;;  %v3920_v10 = vadd.f32 %v467_v8, %v3859_v35  ;;  %v496_v11 = vpop.f32.mrf.mxu1  ;;  %v2711_v8 = vor.u32 %v3100_v53, %v2708_v61  ;;  %v2700_v53 = vld [vmem:[%s4944_s2 + $0xb8] sm:$0xf0]  ;;  %v3092_v61 = vld [vmem:[%s4944_s2 + $0x84] sm:$0xf] }
  0xf2   : > { %v3917_v9 = vadd.f32 %v551_v7, %v3875_v44  ;;  %v3923_v12 = vadd.f32 %v496_v11, %v3863_v37  ;;  %v2715_v11 = vor.u32 %v3103_v0, %v2714_v63  ;;  %v540_v63 = vadd.f32 %v3850_v31, %v3875_v44 }
  0xf3   : > { %1215 = vmatpush.bf16.msra.mxu1 %v2711_v8  ;;  %v455_v0 = vadd.f32 %v3852_v32, %v3859_v35  ;;  %v3095_v8 = vld [vmem:[%s4944_s2 + $0x94] sm:$0xf0]  ;;  %v484_v31 = vadd.f32 %v3854_v33, %v3863_v37  ;;  %v2658_v33 = vld [vmem:[%s4944_s2 + $0x60] sm:$0xf] }
  0xf4   : > { %1229 = vmatpush.bf16.msra.mxu2 %v2715_v11 }
  0xf7   : > { %1216 = vmatpush.bf16.msra.mxu1 %v2695_v45 }
  0xf8   : > { %v525_v13 = vpop.f32.mrf.mxu2  ;;  %v469_v16 = vpop.f32.mrf.mxu0  ;;  %1230 = vmatpush.bf16.msra.mxu2 %v2699_v51 }
  0xf9   : > { %v3926_v14 = vadd.f32 %v525_v13, %v3873_v43  ;;  %v554_v15 = vpop.f32.mrf.mxu3  ;;  %v3932_v18 = vadd.f32 %v469_v16, %v3859_v35  ;;  %v498_v19 = vpop.f32.mrf.mxu1  ;;  %v3101_v13 = vld [vmem:[%s4944_s2 + $0xcc] sm:$0xf] }
  0xfa   : > { %v3929_v17 = vadd.f32 %v554_v15, %v3875_v44  ;;  %v3935_v20 = vadd.f32 %v498_v19, %v3863_v37  ;;  %v2716_v15 = vld [vmem:[%s4944_s2 + $0xd8] sm:$0xf0]  ;;  %v3090_v37 = vld [vmem:[%s4944_s2 + $0x6c] sm:$0xf0] }
  0xfb   : > { %v2719_v21 = vor.u32 %v3101_v13, %v2716_v15  ;;  %v3093_v15 = vld [vmem:[%s4944_s2 + $0x8c] sm:$0xf]  ;;  %v2659_v27 = vor.u32 %v3090_v37, %v2658_v33 }
  0xfd   : > { %1243 = vmatpush.bf16.msra.mxu3 %v2719_v21 }
 0x100   : > { %v527_v56 = vpop.f32.mrf.mxu2  ;;  %v805_v7 = vpop.f32.mrf.mxu0 }
 0x101   : > { %v3984_v28 = vadd.f32 %v527_v56, %v3873_v43  ;;  %v556_v5 = vpop.f32.mrf.mxu3  ;;  %v852_v19 = vadd.f32 %v805_v7, %v453_v55  ;;  %v819_v29 = vpop.f32.mrf.mxu1  ;;  %v2703_v55 = vor.u32 %v3097_v48, %v2700_v53  ;;  %v2674_v56 = vld [vmem:[%s4944_s2 + $0x80] sm:$0xf]  ;;  %v2682_v7 = vld [vmem:[%s4944_s2 + $0x88] sm:$0xf]  ;;  %v2663_v53 = vor.u32 %v3088_v34, %v2660_v47  ;;  %v3080_v34 = vld [vmem:[%s4944_s2 + $0x24] sm:$0xf] }
 0x102   : > { %v3993_v16 = vadd.f32 %v556_v5, %v3875_v44  ;;  %v853_v22 = vadd.f32 %v819_v29, %v482_v3  ;;  %v2675_v3 = vor.u32 %v3094_v59, %v2674_v56  ;;  %v2676_v5 = vld [vmem:[%s4944_s2 + $0x90] sm:$0xf0]  ;;  %v2683_v35 = vor.u32 %v3095_v8, %v2682_v7  ;;  %v3084_v8 = vld [vmem:[%s4944_s2 + $0x44] sm:$0xf] }
 0x103   : > { %v2602_v26 = vmul.f32 -1.442695, %v852_v19  ;;  %1244 = vmatpush.bf16.msra.mxu3 %v2703_v55  ;;  %v2679_v32 = vor.u32 %v3092_v61, %v2676_v5  ;;  %v2684_v19 = vld [vmem:[%s4944_s2 + $0x98] sm:$0xf0]  ;;  %v2666_v55 = vld [vmem:[%s4944_s2 + $0x68] sm:$0xf]  ;;  %v542_v56 = vadd.f32 %v3865_v38, %v3875_v44 }
 0x104   : > { %v2604_v41 = vmul.f32 -1.442695, %v853_v22  ;;  %1203 = vmatpush.bf16.msra.mxu0 %v2675_v3  ;;  %v2687_v23 = vor.u32 %v3093_v15, %v2684_v19  ;;  %1231 = vmatpush.bf16.msra.mxu2 %v2683_v35  ;;  %v3091_v61 = vld [vmem:[%s4944_s2 + $0x74] sm:$0xf0]  ;;  %v511_v3 = vadd.f32 %v3848_v30, %v3873_v43  ;;  %v2642_v44 = vld [vmem:[%s4944_s2 + $0x40] sm:$0xf] }
 0x105   : > { %3253 = vpow2.f32 %v2602_v26  ;;  %1217 = vmatpush.bf16.msra.mxu1 %v2679_v32  ;;  %v3086_v5 = vld [vmem:[%s4944_s2 + $0x4c] sm:$0xf0]  ;;  %v2644_v30 = vld [vmem:[%s4944_s2 + $0x50] sm:$0xf0]  ;;  %v2650_v35 = vld [vmem:[%s4944_s2 + $0x48] sm:$0xf] }
 0x106   : > { %3255 = vpow2.f32 %v2604_v41  ;;  %v2643_v32 = vor.u32 %v3086_v5, %v2642_v44  ;;  %v3087_v15 = vld [vmem:[%s4944_s2 + $0x54] sm:$0xf0]  ;;  %v3085_v19 = vld [vmem:[%s4944_s2 + $0x4c] sm:$0xf] }
 0x107   : > { %1245 = vmatpush.bf16.msra.mxu3 %v2687_v23  ;;  %v2652_v23 = vld [vmem:[%s4944_s2 + $0x58] sm:$0xf0] }
 0x108   : > { %v807_v13 = vpop.f32.mrf.mxu0  ;;  %1204 = vmatpush.bf16.msra.mxu0 %v2659_v27  ;;  %v833_v59 = vpop.f32.mrf.mxu2  ;;  %v3082_v27 = vld [vmem:[%s4944_s2 + $0x2c] sm:$0xf0] }
 0x109   : > { %v847_v11 = vpop.f32.mrf.mxu3  ;;  %v856_v21 = vadd.f32 %v807_v13, %v455_v0  ;;  %v821_v22 = vpop.f32.mrf.mxu1  ;;  %1218 = vmatpush.bf16.msra.mxu1 %v2663_v53  ;;  %v2668_v0 = vld [vmem:[%s4944_s2 + $0x78] sm:$0xf0]  ;;  %v2634_v53 = vld [vmem:[%s4944_s2 + $0x28] sm:$0xf] }
 0x10a   : > { %v855_v29 = vadd.f32 %v847_v11, %v540_v63  ;;  %v857_v24 = vadd.f32 %v821_v22, %v484_v31  ;;  %v3089_v63 = vld [vmem:[%s4944_s2 + $0x6c] sm:$0xf]  ;;  %v854_v31 = vadd.f32 %v833_v59, %v511_v3  ;;  %v2667_v11 = vor.u32 %v3091_v61, %v2666_v55  ;;  %v3083_v55 = vld [vmem:[%s4944_s2 + $0x34] sm:$0xf0] }
 0x10b   : > { %v3254_v25 = vpop.eup %3253  ;;  %v2603_v45 = vmul.f32 -1.442695, %v856_v21  ;;  %v2671_v13 = vor.u32 %v3089_v63, %v2668_v0  ;;  %v2647_v22 = vor.u32 %v3084_v8, %v2644_v30  ;;  %v2635_v8 = vor.u32 %v3083_v55, %v2634_v53 }
 0x10c   : > { %v2606_v26 = vmul.f32 -1.442695, %v855_v29  ;;  %v3256_v39 = vpop.eup %3255  ;;  %v4058_v41 = vadd.f32 1.0, %v3254_v25  ;;  %v2605_v51 = vmul.f32 -1.442695, %v857_v24  ;;  %1232 = vmatpush.bf16.msra.mxu2 %v2667_v11  ;;  %v2651_v25 = vor.u32 %v3087_v15, %v2650_v35  ;;  %1205 = vmatpush.bf16.msra.mxu0 %v2643_v32 }
 0x10d   : > { %v4063_v48 = vadd.f32 1.0, %v3256_v39  ;;  %v2626_v24 = vld [vmem:[%s4944_s2 + $0x20] sm:$0xf]  ;;  %1246 = vmatpush.bf16.msra.mxu3 %v2671_v13  ;;  %1219 = vmatpush.bf16.msra.mxu1 %v2647_v22  ;;  %v513_v15 = vadd.f32 %v3861_v36, %v3873_v43  ;;  %v593_v43 = vld [vmem:[#allocation3 + $0x8] sm:$0xff] }
 0x10e   : > { %3257 = vpow2.f32 %v2606_v26  ;;  %v2655_v26 = vor.u32 %v3085_v19, %v2652_v23  ;;  %v2627_v47 = vor.u32 %v3082_v27, %v2626_v24  ;;  %v877_v61 = vand.u32 2147483647, %v4058_v41 }
 0x10f   : > { %3259 = vrcp.f32 %v4058_v41  ;;  %v879_v3 = vand.u32 2147483648, %v4058_v41  ;;  %v917_v30 = vand.u32 2147483648, %v4063_v48  ;;  %v915_v13 = vand.u32 2147483647, %v4063_v48 }
 0x110   : > { %3261 = vrcp.f32 %v4063_v48  ;;  %1233 = vmatpush.bf16.msra.mxu2 %v2651_v25  ;;  %1206 = vmatpush.bf16.msra.mxu0 %v2627_v47  ;;  %v835_v32 = vpop.f32.mrf.mxu2  ;;  %vm873_vm3 = vweird.f32 %v4058_v41  ;;  %vm911_vm4 = vweird.f32 %v4063_v48  ;;  %vm878_vm7 = vcmp.eq.f32.partialorder %v877_v61, 8.507059e+37  ;;  %v3081_v47 = vld [vmem:[%s4944_s2 + $0x2c] sm:$0xf]  ;;  %v2612_v61 = vld [vmem:[%s4944_s2 + $0x10] sm:$0xf0] }
 0x111   : > { %3263 = vpow2.f32 %v2603_v45  ;;  %v849_v38 = vpop.f32.mrf.mxu3  ;;  %1247 = vmatpush.bf16.msra.mxu3 %v2655_v26  ;;  %v918_v36 = vor.u32 1.1754944e-38, %v917_v30  ;;  %vm916_vm8 = vcmp.eq.f32.partialorder %v915_v13, 8.507059e+37  ;;  %v2620_v13 = vld [vmem:[%s4944_s2 + $0x18] sm:$0xf0] }
 0x112   : > { %3265 = vpow2.f32 %v2605_v51  ;;  %v859_v7 = vadd.f32 %v849_v38, %v542_v56  ;;  %v2628_v51 = vld [vmem:[%s4944_s2 + $0x30] sm:$0xf0] }
 0x114   : > { %v3258_v29 = vpop.eup %3257  ;;  %v2607_v21 = vmul.f32 -1.442695, %v859_v7  ;;  %v2631_v7 = vor.u32 %v3080_v34, %v2628_v51  ;;  %1234 = vmatpush.bf16.msra.mxu2 %v2635_v8  ;;  %v2636_v51 = vld [vmem:[%s4944_s2 + $0x38] sm:$0xf0] }
 0x115   : > { %v4110_v33 = vpop.eup %3259  ;;  %v4112_v37 = vadd.f32 1.0, %v3258_v29 }
 0x116   : > { %v3262_v39 = vpop.eup %3261  ;;  %v869_v45 = vmul.f32 %v4110_v33, %v4058_v41  ;;  %3267 = vpow2.f32 %v2607_v21  ;;  %vm874_vm1 = vweird.f32 %v4110_v33  ;;  %1220 = vmatpush.bf16.msra.mxu1 %v2631_v7  ;;  %v880_v21 = vor.u32 1.1754944e-38, %v879_v3  ;;  %v2618_v3 = vld [vmem:[%s4944_s2 + $0x8] sm:$0xf] }
 0x117   : > { %v3264_v56 = vpop.eup %3263  ;;  %v907_v59 = vmul.f32 %v3262_v39, %v4063_v48  ;;  %3269 = vtanh.f32 %v854_v31  ;;  %vm912_vm2 = vweird.f32 %v3262_v39  ;;  %vm875_vm5 = vmor %vm873_vm3, %vm874_vm1  ;;  %v858_v41 = vadd.f32 %v835_v32, %v513_v15 }
 0x118   : > { %v3266_v63 = vpop.eup %3265  ;;  %v870_v0 = vsub.f32 1.0, %v869_v45  ;;  %3271 = vrcp.f32 %v4112_v37  ;;  %v4135_v38 = vadd.f32 1.0, %v3264_v56  ;;  %vm913_vm6 = vmor %vm911_vm4, %vm912_vm2  ;;  %v3078_v56 = vld [vmem:[%s4944_s2 + $0xc] sm:$0xf0]  ;;  %vm951_vm3 = vweird.f32 %v4112_v37 }
 0x119   : > { %v908_v44 = vsub.f32 1.0, %v907_v59  ;;  %v4137_v5 = vadd.f32 1.0, %v3266_v63  ;;  %v3076_v59 = vld [vmem:[%s4944_s2 + $0x4] sm:$0xf] }
 0x11a   : > { %v871_v11 = vmul.f32 %v4110_v33, %v870_v0  ;;  %3273 = vrcp.f32 %v4135_v38  ;;  %v894_v15 = vand.u32 2147483648, %v4135_v38  ;;  %vm888_vm11 = vweird.f32 %v4135_v38 }
 0x11b   : > { %v909_v31 = vmul.f32 %v3262_v39, %v908_v44  ;;  %3275 = vrcp.f32 %v4137_v5  ;;  %v932_v0 = vand.u32 2147483648, %v4137_v5  ;;  %v3079_v44 = vld [vmem:[%s4944_s2 + $0x14] sm:$0xf0]  ;;  %vm926_vm12 = vweird.f32 %v4137_v5 }
 0x11c   : > { %v3268_v35 = vpop.eup %3267  ;;  %v872_v19 = vadd.f32 %v4110_v33, %v871_v11  ;;  %v2639_v11 = vor.u32 %v3081_v47, %v2636_v51  ;;  %v895_v47 = vor.u32 1.1754944e-38, %v894_v15 }
 0x11d   : > { %v3270_v29 = vpop.eup %3269  ;;  %v910_v22 = vadd.f32 %v3262_v39, %v909_v31  ;;  %v4152_v23 = vadd.f32 1.0, %v3268_v35  ;;  %v3077_v31 = vld [vmem:[%s4944_s2 + $0xc] sm:$0xf]  ;;  %v892_v35 = vand.u32 2147483647, %v4135_v38 }
 0x11e   : > { %v4154_v24 = vpop.eup %3271  ;;  %v876_v25 = vsel %vm875_vm5, %v4110_v33, %v872_v19  ;;  %v2610_v33 = vld [vmem:[%s4944_s2] sm:$0xf]  ;;  %1248 = vmatpush.bf16.msra.mxu3 %v2639_v11  ;;  %v955_v11 = vand.u32 2147483647, %v4112_v37 }
 0x11f   : > { %v881_v26 = vsel %vm878_vm7, %v880_v21, %v876_v25  ;;  %v914_v48 = vsel %vm913_vm6, %v3262_v39, %v910_v22  ;;  %3277 = vrcp.f32 %v4152_v23  ;;  %v947_v8 = vmul.f32 %v4154_v24, %v4112_v37 }
 0x120   : > { %v3274_v27 = vpop.eup %3273  ;;  %v919_v34 = vsel %vm916_vm8, %v918_v36, %v914_v48  ;;  %v978_v45 = vmul.f32 %v3270_v29, %v881_v26  ;;  %3279 = vtanh.f32 %v858_v41  ;;  %v2611_v19 = vor.u32 %v3078_v56, %v2610_v33 }
 0x121   : > { %v3276_v53 = vpop.eup %3275  ;;  %v976_v39 = vmul.f32 %v919_v34, %v593_v43  ;;  %v884_v55 = vmul.f32 %v3274_v27, %v4135_v38  ;;  %vm889_vm9 = vweird.f32 %v3274_v27  ;;  %v930_v21 = vand.u32 2147483647, %v4137_v5 }
 0x122   : > { %v922_v63 = vmul.f32 %v3276_v53, %v4137_v5  ;;  %v2615_v22 = vor.u32 %v3076_v59, %v2612_v61  ;;  %vm927_vm10 = vweird.f32 %v3276_v53  ;;  %1207 = vmatpush.bf16.msra.mxu0 %v2611_v19  ;;  %v2619_v25 = vor.u32 %v3079_v44, %v2618_v3  ;;  %vm890_vm13 = vmor %vm888_vm11, %vm889_vm9 }
 0x123   : > { %v4186_v7 = vadd.f32 %v978_v45, %v976_v39  ;;  %v885_v30 = vsub.f32 1.0, %v884_v55  ;;  %v2623_v41 = vor.u32 %v3077_v31, %v2620_v13  ;;  %v948_v26 = vsub.f32 1.0, %v947_v8  ;;  %vm928_vm14 = vmor %vm926_vm12, %vm927_vm10  ;;  %v594_v39 = vld [vmem:[#allocation3] sm:$0xff] }
 0x124   : > { %v923_v32 = vsub.f32 1.0, %v922_v63  ;;  %1221 = vmatpush.bf16.msra.mxu1 %v2615_v22  ;;  %1235 = vmatpush.bf16.msra.mxu2 %v2619_v25  ;;  %v933_v33 = vor.u32 1.1754944e-38, %v932_v0  ;;  %vm893_vm15 = vcmp.eq.f32.partialorder %v892_v35, 8.507059e+37  ;;  %vm931_vm0 = vcmp.eq.f32.partialorder %v930_v21, 8.507059e+37 }
 0x125   : > { %v886_v29 = vmul.f32 %v3274_v27, %v885_v30  ;;  %v3278_v36 = vpop.eup %3277  ;;  %1249 = vmatpush.bf16.msra.mxu3 %v2623_v41  ;;  %v949_v61 = vmul.f32 %v4154_v24, %v948_v26  ;;  %3281 = vtanh.f32 %v4186_v7  ;;  %vm952_vm1 = vweird.f32 %v4154_v24  ;;  %v2860_v26 = vld [vmem:[%s4944_s2 + $0xf0] sm:$0xf0] }
 0x126   : > { %v924_v43 = vmul.f32 %v3276_v53, %v923_v32  ;;  %v962_v34 = vmul.f32 %v3278_v36, %v4152_v23  ;;  %v3280_v45 = vpop.eup %3279  ;;  %vm967_vm2 = vweird.f32 %v3278_v36  ;;  %v972_v30 = vand.u32 2147483648, %v4152_v23  ;;  %vm953_vm4 = vmor %vm951_vm3, %vm952_vm1 }
 0x127   : > { %v887_v48 = vadd.f32 %v3274_v27, %v886_v29  ;;  %vm966_vm5 = vweird.f32 %v4152_v23  ;;  %v970_v31 = vand.u32 2147483647, %v4152_v23  ;;  %vm956_vm7 = vcmp.eq.f32.partialorder %v955_v11, 8.507059e+37  ;;  %v2858_v23 = vld [vmem:[%s4944_s2 + $0xe0] sm:$0xf] }
 0x128   : > { %v925_v51 = vadd.f32 %v3276_v53, %v924_v43  ;;  %v963_v56 = vsub.f32 1.0, %v962_v34  ;;  %vm968_vm6 = vmor %vm966_vm5, %vm967_vm2  ;;  %v973_v19 = vor.u32 1.1754944e-38, %v972_v30  ;;  %v3139_v34 = vld [vmem:[%s4944_s2 + $0xf4] sm:$0xf0]  ;;  %v3133_v30 = vld [vmem:[%s4944_s2 + $0xcc] sm:$0xf] }
 0x129   : > { %v891_v55 = vsel %vm890_vm13, %v3274_v27, %v887_v48  ;;  %v950_v27 = vadd.f32 %v4154_v24, %v949_v61  ;;  %vm971_vm8 = vcmp.eq.f32.partialorder %v970_v31, 8.507059e+37  ;;  %v2866_v48 = vld [vmem:[%s4944_s2 + $0xe8] sm:$0xf]  ;;  %v2842_v61 = vld [vmem:[%s4944_s2 + $0xc0] sm:$0xf] }
 0x12a   : > { %v896_v38 = vsel %vm893_vm15, %v895_v47, %v891_v55  ;;  %v929_v59 = vsel %vm928_vm14, %v3276_v53, %v925_v51  ;;  %v964_v3 = vmul.f32 %v3278_v36, %v963_v56  ;;  %v957_v53 = vand.u32 2147483648, %v4112_v37  ;;  %v2868_v55 = vld [vmem:[%s4944_s2 + $0xf8] sm:$0xf0] }
 0x12b   : > { %v934_v63 = vsel %vm931_vm0, %v933_v33, %v929_v59  ;;  %v979_v5 = vmul.f32 %v3280_v45, %v896_v38  ;;  %v954_v13 = vsel %vm953_vm4, %v4154_v24, %v950_v27  ;;  %v3282_v35 = vpop.eup %3281  ;;  %v3138_v24 = vld [vmem:[%s4944_s2 + $0xec] sm:$0xf0]  ;;  %v2867_v33 = vor.u32 %v3139_v34, %v2866_v48  ;;  %v2852_v31 = vld [vmem:[%s4944_s2 + $0xd8] sm:$0xf0] }
 0x12c   : > { %v977_v44 = vmul.f32 %v934_v63, %v594_v39  ;;  %v965_v0 = vadd.f32 %v3278_v36, %v964_v3  ;;  %v958_v15 = vor.u32 1.1754944e-38, %v957_v53  ;;  %v2859_v41 = vor.u32 %v3138_v24, %v2858_v23  ;;  %v3137_v39 = vld [vmem:[%s4944_s2 + $0xec] sm:$0xf]  ;;  %v3134_v63 = vld [vmem:[%s4944_s2 + $0xcc] sm:$0xf0] }
 0x12d   : > { %v2871_v59 = vor.u32 %v3137_v39, %v2868_v55  ;;  %1633 = vmatpush.bf16.msrb.mxu2 %v2867_v33  ;;  %v3135_v53 = vld [vmem:[%s4944_s2 + $0xd4] sm:$0xf0] }
 0x12e   : > { %v4207_v8 = vadd.f32 %v979_v5, %v977_v44  ;;  %v969_v32 = vsel %vm968_vm6, %v3278_v36, %v965_v0  ;;  %v959_v21 = vsel %vm956_vm7, %v958_v15, %v954_v13  ;;  %v3136_v36 = vld [vmem:[%s4944_s2 + $0xe4] sm:$0xf]  ;;  %1605 = vmatpush.bf16.msrb.mxu0 %v2859_v41  ;;  %v2844_v44 = vld [vmem:[%s4944_s2 + $0xd0] sm:$0xf0]  ;;  %v2850_v0 = vld [vmem:[%s4944_s2 + $0xc8] sm:$0xf]  ;;  %v2855_v13 = vor.u32 %v3133_v30, %v2852_v31 }
 0x12f   : > { %v974_v22 = vsel %vm971_vm8, %v973_v19, %v969_v32  ;;  %v984_v43 = vmul.f32 %v3282_v35, %v959_v21  ;;  %v2863_v51 = vor.u32 %v3136_v36, %v2860_v26  ;;  %v3132_v5 = vld [vmem:[%s4944_s2 + $0xc4] sm:$0xf]  ;;  %1647 = vmatpush.bf16.msrb.mxu3 %v2871_v59  ;;  %v2851_v11 = vor.u32 %v3135_v53, %v2850_v0  ;;  %v2826_v32 = vld [vmem:[%s4944_s2 + $0xa0] sm:$0xf]  ;;  %v3130_v35 = vld [vmem:[%s4944_s2 + $0xac] sm:$0xf0] }
 0x130   : > { %3283 = vtanh.f32 %v4207_v8  ;;  %v2847_v27 = vor.u32 %v3132_v5, %v2844_v44  ;;  %v3128_v15 = vld [vmem:[%s4944_s2 + $0xa4] sm:$0xf]  ;;  %v2828_v21 = vld [vmem:[%s4944_s2 + $0xb0] sm:$0xf0]  ;;  %v3129_v41 = vld [vmem:[%s4944_s2 + $0xac] sm:$0xf] }
 0x131   : > { %1619 = vmatpush.bf16.msrb.mxu1 %v2863_v51  ;;  %1634 = vmatpush.bf16.msrb.mxu2 %v2851_v11  ;;  %v2831_v24 = vor.u32 %v3128_v15, %v2828_v21  ;;  %v2836_v26 = vld [vmem:[%s4944_s2 + $0xb8] sm:$0xf0]  ;;  %v3126_v51 = vld [vmem:[%s4944_s2 + $0x8c] sm:$0xf0]  ;;  %v2812_v59 = vld [vmem:[%s4944_s2 + $0x90] sm:$0xf0] }
 0x132   : > { %v2820_v44 = vld [vmem:[%s4944_s2 + $0x98] sm:$0xf0]  ;;  %v3122_v53 = vld [vmem:[%s4944_s2 + $0x6c] sm:$0xf0]  ;;  %v3120_v30 = vld [vmem:[%s4944_s2 + $0x64] sm:$0xf] }
 0x133   : > { %1648 = vmatpush.bf16.msrb.mxu3 %v2855_v13  ;;  %v2796_v31 = vld [vmem:[%s4944_s2 + $0x70] sm:$0xf0]  ;;  %v2802_v13 = vld [vmem:[%s4944_s2 + $0x68] sm:$0xf]  ;;  %v3123_v21 = vld [vmem:[%s4944_s2 + $0x74] sm:$0xf0] }
 0x135   : > { %1620 = vmatpush.bf16.msrb.mxu1 %v2847_v27  ;;  %v2794_v27 = vld [vmem:[%s4944_s2 + $0x60] sm:$0xf] }
 0x136   : > { %v3284_v29 = vpop.eup %3283 }
 0x137   : > { %v985_v25 = vmul.f32 %v3284_v29, %v974_v22  ;;  %v2827_v29 = vor.u32 %v3130_v35, %v2826_v32  ;;  %v2834_v22 = vld [vmem:[%s4944_s2 + $0xa8] sm:$0xf] }
 0x139   : > { %v3176_v37 = vpack.c.bf16 %v985_v25, %v984_v43  ;;  %v3131_v43 = vld [vmem:[%s4944_s2 + $0xb4] sm:$0xf0]  ;;  %1621 = vmatpush.bf16.msrb.mxu1 %v2831_v24 }
 0x13a   : > { %v2835_v36 = vor.u32 %v3131_v43, %v2834_v22  ;;  %v3121_v22 = vld [vmem:[%s4944_s2 + $0x6c] sm:$0xf]  ;;  %v2804_v43 = vld [vmem:[%s4944_s2 + $0x78] sm:$0xf0] }
 0x13b   : > { %3177 = vst [vmem:[%s3533_s28] sm:$0xff] %v3176_v37   ;;  %1208 = vmatmul.bf16.vlgmr.msra.gmra.mxu0 %v3176_v37  ;;  %1222 = vmatmul.bf16.vlgmr.msra.gmra.mxu1 %v3176_v37 }
 0x13c   : > { %1236 = vmatmul.bf16.vlgmr.msra.gmra.mxu2 %v3176_v37  ;;  %1250 = vmatmul.bf16.vlgmr.msra.gmra.mxu3 %v3176_v37 }
 0x13d   : > { %1635 = vmatpush.bf16.msrb.mxu2 %v2835_v36 }
 0x1b8   : > { %v1209_v45 = vpop.f32.mrf.mxu0  ;;  %v1223_v47 = vpop.f32.mrf.mxu1 }
 0x1b9   : > { %v1256_v56 = vadd.f32 %v1209_v45, %v3868_v40  ;;  %v1257_v38 = vadd.f32 %v1223_v47, %v3871_v42  ;;  %v2843_v42 = vor.u32 %v3134_v63, %v2842_v61  ;;  %v2839_v45 = vor.u32 %v3129_v41, %v2836_v26  ;;  %v2810_v47 = vld [vmem:[%s4944_s2 + $0x80] sm:$0xf] }
 0x1ba   : > { %v2811_v55 = vor.u32 %v3126_v51, %v2810_v47  ;;  %v2807_v26 = vor.u32 %v3121_v22, %v2804_v43 }
 0x1bb   : > { %v2736_v3 = vmul.f32 -1.442695, %v1256_v56  ;;  %v2738_v40 = vmul.f32 -1.442695, %v1257_v38  ;;  %1606 = vmatpush.bf16.msrb.mxu0 %v2843_v42  ;;  %1649 = vmatpush.bf16.msrb.mxu3 %v2839_v45  ;;  %v3125_v42 = vld [vmem:[%s4944_s2 + $0x8c] sm:$0xf] }
 0x1bc   : > { %v2823_v15 = vor.u32 %v3125_v42, %v2820_v44 }
 0x1bd   : > { %3285 = vpow2.f32 %v2736_v3  ;;  %v2818_v3 = vld [vmem:[%s4944_s2 + $0x88] sm:$0xf] }
 0x1be   : > { %3287 = vpow2.f32 %v2738_v40  ;;  %v3127_v40 = vld [vmem:[%s4944_s2 + $0x94] sm:$0xf0] }
 0x1bf   : > { %v1251_v19 = vpop.f32.mrf.mxu3  ;;  %1607 = vmatpush.bf16.msrb.mxu0 %v2827_v29  ;;  %v1237_v63 = vpop.f32.mrf.mxu2  ;;  %v2819_v11 = vor.u32 %v3127_v40, %v2818_v3  ;;  %v2799_v29 = vor.u32 %v3120_v30, %v2796_v31  ;;  %1650 = vmatpush.bf16.msrb.mxu3 %v2823_v15  ;;  %v3116_v40 = vld [vmem:[%s4944_s2 + $0x44] sm:$0xf]  ;;  %v2788_v31 = vld [vmem:[%s4944_s2 + $0x58] sm:$0xf0]  ;;  %v3111_v15 = vld [vmem:[%s4944_s2 + $0x14] sm:$0xf0] }
 0x1c0   : > { %v1259_v25 = vadd.f32 %v1251_v19, %v3881_v49  ;;  %v1211_v37 = vpop.f32.mrf.mxu0  ;;  %v1225_v23 = vpop.f32.mrf.mxu1  ;;  %v1258_v35 = vadd.f32 %v1237_v63, %v3878_v46  ;;  %v2795_v19 = vor.u32 %v3122_v53, %v2794_v27  ;;  %v2803_v46 = vor.u32 %v3123_v21, %v2802_v13  ;;  %v3118_v63 = vld [vmem:[%s4944_s2 + $0x4c] sm:$0xf0]  ;;  %v2780_v27 = vld [vmem:[%s4944_s2 + $0x50] sm:$0xf0]  ;;  %v3119_v53 = vld [vmem:[%s4944_s2 + $0x54] sm:$0xf0] }
 0x1c1   : > { %v1260_v48 = vadd.f32 %v1211_v37, %v3884_v50  ;;  %v1261_v34 = vadd.f32 %v1225_v23, %v3887_v52  ;;  %v3124_v50 = vld [vmem:[%s4944_s2 + $0x84] sm:$0xf]  ;;  %1636 = vmatpush.bf16.msrb.mxu2 %v2819_v11  ;;  %v2762_v21 = vld [vmem:[%s4944_s2 + $0x20] sm:$0xf] }
 0x1c2   : > { %v2740_v49 = vmul.f32 -1.442695, %v1259_v25  ;;  %v2815_v5 = vor.u32 %v3124_v50, %v2812_v59  ;;  %v2778_v59 = vld [vmem:[%s4944_s2 + $0x40] sm:$0xf] }
 0x1c3   : > { %v3286_v33 = vpop.eup %3285  ;;  %v2737_v39 = vmul.f32 -1.442695, %v1260_v48  ;;  %v2739_v38 = vmul.f32 -1.442695, %v1261_v34  ;;  %1608 = vmatpush.bf16.msrb.mxu0 %v2811_v55  ;;  %1651 = vmatpush.bf16.msrb.mxu3 %v2807_v26  ;;  %v2764_v26 = vld [vmem:[%s4944_s2 + $0x30] sm:$0xf0] }
 0x1c4   : > { %v3288_v52 = vpop.eup %3287  ;;  %v4305_v56 = vadd.f32 1.0, %v3286_v33  ;;  %3289 = vpow2.f32 %v2740_v49  ;;  %1622 = vmatpush.bf16.msrb.mxu1 %v2815_v5 }
 0x1c5   : > { %v4310_v61 = vadd.f32 1.0, %v3288_v52  ;;  %3291 = vpow2.f32 %v2737_v39  ;;  %1637 = vmatpush.bf16.msrb.mxu2 %v2803_v46  ;;  %v3114_v46 = vld [vmem:[%s4944_s2 + $0x2c] sm:$0xf0] }
 0x1c6   : > { %3293 = vrcp.f32 %v4305_v56  ;;  %v1281_v24 = vand.u32 2147483647, %v4305_v56  ;;  %vm1277_vm13 = vweird.f32 %v4305_v56 }
 0x1c7   : > { %3295 = vrcp.f32 %v4310_v61  ;;  %v1253_v0 = vpop.f32.mrf.mxu3  ;;  %1609 = vmatpush.bf16.msrb.mxu0 %v2795_v19  ;;  %v1321_v47 = vand.u32 2147483648, %v4310_v61  ;;  %v1319_v51 = vand.u32 2147483647, %v4310_v61  ;;  %v1239_v55 = vpop.f32.mrf.mxu2  ;;  %vm1315_vm12 = vweird.f32 %v4310_v61 }
 0x1c8   : > { %3297 = vpow2.f32 %v2739_v38  ;;  %v1263_v37 = vadd.f32 %v1253_v0, %v3893_v57  ;;  %v1283_v57 = vand.u32 2147483648, %v4305_v56  ;;  %1623 = vmatpush.bf16.msrb.mxu1 %v2799_v29  ;;  %vm4372_vm10 = vcmp.eq.f32.partialorder %v1281_v24, 8.507059e+37  ;;  %v2786_v0 = vld [vmem:[%s4944_s2 + $0x48] sm:$0xf]  ;;  %v3112_v24 = vld [vmem:[%s4944_s2 + $0x24] sm:$0xf] }
 0x1c9   : > { %3299 = vtanh.f32 %v1258_v35  ;;  %v1262_v44 = vadd.f32 %v1239_v55, %v3890_v54  ;;  %v1322_v30 = vor.u32 1.1754944e-38, %v1321_v47  ;;  %v2779_v54 = vor.u32 %v3118_v63, %v2778_v59  ;;  %v3115_v47 = vld [vmem:[%s4944_s2 + $0x34] sm:$0xf0]  ;;  %v2746_v38 = vld [vmem:[%s4944_s2] sm:$0xf] }
 0x1ca   : > { %v3290_v32 = vpop.eup %3289  ;;  %v2741_v50 = vmul.f32 -1.442695, %v1263_v37  ;;  %v1284_v3 = vor.u32 1.1754944e-38, %v1283_v57  ;;  %vm4422_vm0 = vcmp.eq.f32.partialorder %v1319_v51, 8.507059e+37  ;;  %v2787_v37 = vor.u32 %v3119_v53, %v2786_v0  ;;  %v3113_v51 = vld [vmem:[%s4944_s2 + $0x2c] sm:$0xf] }
 0x1cb   : > { %v3292_v25 = vpop.eup %3291  ;;  %v4355_v36 = vadd.f32 1.0, %v3290_v32  ;;  %1610 = vmatpush.bf16.msrb.mxu0 %v2779_v54  ;;  %v3110_v59 = vld [vmem:[%s4944_s2 + $0xc] sm:$0xf0]  ;;  %v2767_v53 = vor.u32 %v3112_v24, %v2764_v26  ;;  %v2756_v24 = vld [vmem:[%s4944_s2 + $0x18] sm:$0xf0] }
 0x1cc   : > { %v4352_v23 = vpop.eup %3293  ;;  %v4357_v41 = vadd.f32 1.0, %v3292_v25  ;;  %v2783_v25 = vor.u32 %v3116_v40, %v2780_v27  ;;  %1638 = vmatpush.bf16.msrb.mxu2 %v2787_v37 }
 0x1cd   : > { %v4359_v48 = vpop.eup %3295  ;;  %v1273_v34 = vmul.f32 %v4352_v23, %v4305_v56  ;;  %vm1278_vm9 = vweird.f32 %v4352_v23 }
 0x1ce   : > { %v3298_v45 = vpop.eup %3297  ;;  %v1311_v49 = vmul.f32 %v4359_v48, %v4310_v61  ;;  %3301 = vrcp.f32 %v4357_v41  ;;  %vm1316_vm11 = vweird.f32 %v4359_v48  ;;  %vm4405_vm14 = vmor %vm1277_vm13, %vm1278_vm9  ;;  %v3117_v61 = vld [vmem:[%s4944_s2 + $0x4c] sm:$0xf]  ;;  %v1296_v29 = vand.u32 2147483647, %v4357_v41  ;;  %1624 = vmatpush.bf16.msrb.mxu1 %v2783_v25 }
 0x1cf   : > { %v1274_v33 = vsub.f32 1.0, %v1273_v34  ;;  %v4369_v39 = vadd.f32 1.0, %v3298_v45  ;;  %3303 = vrcp.f32 %v4355_v36  ;;  %v3300_v13 = vpop.eup %3299  ;;  %vm4417_vm15 = vmor %vm1315_vm12, %vm1316_vm11  ;;  %vm1292_vm1 = vweird.f32 %v4357_v41 }
 0x1d0   : > { %v1312_v52 = vsub.f32 1.0, %v1311_v49  ;;  %v2770_v49 = vld [vmem:[%s4944_s2 + $0x28] sm:$0xf]  ;;  %v1298_v40 = vand.u32 2147483648, %v4357_v41  ;;  %vm1297_vm6 = vcmp.eq.f32.partialorder %v1296_v29, 8.507059e+37 }
 0x1d1   : > { %v1275_v5 = vmul.f32 %v4352_v23, %v1274_v33  ;;  %3305 = vrcp.f32 %v4369_v39  ;;  %v1336_v19 = vand.u32 2147483648, %v4369_v39  ;;  %v1334_v37 = vand.u32 2147483647, %v4369_v39 }
 0x1d2   : > { %v1313_v42 = vmul.f32 %v4359_v48, %v1312_v52  ;;  %3307 = vpow2.f32 %v2741_v50  ;;  %v2791_v50 = vor.u32 %v3117_v61, %v2788_v31  ;;  %v2772_v52 = vld [vmem:[%s4944_s2 + $0x38] sm:$0xf0]  ;;  %1625 = vmatpush.bf16.msrb.mxu1 %v2767_v53  ;;  %vm1330_vm4 = vweird.f32 %v4369_v39 }
 0x1d3   : > { %v1276_v11 = vadd.f32 %v4352_v23, %v1275_v5  ;;  %3309 = vtanh.f32 %v1262_v44  ;;  %v2748_v44 = vld [vmem:[%s4944_s2 + $0x10] sm:$0xf0]  ;;  %v2775_v31 = vor.u32 %v3113_v51, %v2772_v52  ;;  %v1299_v26 = vor.u32 1.1754944e-38, %v1298_v40 }
 0x1d4   : > { %v1314_v35 = vadd.f32 %v4359_v48, %v1313_v42  ;;  %v4431_v22 = vpop.eup %3301  ;;  %v3108_v42 = vld [vmem:[%s4944_s2 + $0x4] sm:$0xf]  ;;  %1652 = vmatpush.bf16.msrb.mxu3 %v2791_v50  ;;  %vm1335_vm8 = vcmp.eq.f32.partialorder %v1334_v37, 8.507059e+37 }
 0x1d5   : > { %v1280_v43 = vsel %vm4405_vm14, %v4352_v23, %v1276_v11  ;;  %v4445_v34 = vpop.eup %3303  ;;  %v1288_v45 = vmul.f32 %v4431_v22, %v4357_v41  ;;  %vm1293_vm2 = vweird.f32 %v4431_v22  ;;  %v2751_v32 = vor.u32 %v3108_v42, %v2748_v44 }
 0x1d6   : > { %v1285_v23 = vsel %vm4372_vm10, %v1284_v3, %v1280_v43  ;;  %v1318_v57 = vsel %vm4417_vm15, %v4359_v48, %v1314_v35  ;;  %v1351_v0 = vmul.f32 %v4445_v34, %v4355_v36  ;;  %v2754_v35 = vld [vmem:[%s4944_s2 + $0x8] sm:$0xf]  ;;  %vm1294_vm5 = vmor %vm1292_vm1, %vm1293_vm2  ;;  %vm1356_vm9 = vweird.f32 %v4445_v34 }
 0x1d7   : > { %v4463_v33 = vpop.eup %3305  ;;  %v1323_v48 = vsel %vm4422_vm0, %v1322_v30, %v1318_v57  ;;  %v1382_v55 = vmul.f32 %v3300_v13, %v1285_v23  ;;  %v1289_v5 = vsub.f32 1.0, %v1288_v45  ;;  %v2771_v30 = vor.u32 %v3115_v47, %v2770_v49  ;;  %1626 = vmatpush.bf16.msrb.mxu1 %v2751_v32 }
 0x1d8   : > { %v1380_v63 = vmul.f32 %v1323_v48, %v4186_v7  ;;  %v1326_v3 = vmul.f32 %v4463_v33, %v4369_v39  ;;  %v3308_v27 = vpop.eup %3307  ;;  %v2763_v7 = vor.u32 %v3114_v46, %v2762_v21  ;;  %v2747_v13 = vor.u32 %v3110_v59, %v2746_v38  ;;  %v3109_v46 = vld [vmem:[%s4944_s2 + $0xc] sm:$0xf]  ;;  %1653 = vmatpush.bf16.msrb.mxu3 %v2775_v31 }
 0x1d9   : > { %v1290_v54 = vmul.f32 %v4431_v22, %v1289_v5  ;;  %v4493_v61 = vadd.f32 1.0, %v3308_v27  ;;  %v3310_v21 = vpop.eup %3309  ;;  %vm1331_vm3 = vweird.f32 %v4463_v33  ;;  %1639 = vmatpush.bf16.msrb.mxu2 %v2771_v30  ;;  %v1352_v23 = vsub.f32 1.0, %v1351_v0 }
 0x1da   : > { %v4489_v11 = vadd.f32 %v1382_v55, %v1380_v63  ;;  %v1327_v56 = vsub.f32 1.0, %v1326_v3  ;;  %1611 = vmatpush.bf16.msrb.mxu0 %v2763_v7  ;;  %v2755_v49 = vor.u32 %v3111_v15, %v2754_v35  ;;  %vm1332_vm7 = vmor %vm1330_vm4, %vm1331_vm3  ;;  %v1337_v47 = vor.u32 1.1754944e-38, %v1336_v19  ;;  %v2996_v35 = vld [vmem:[%s4944_s2 + $0xf0] sm:$0xf0]  ;;  %v3002_v15 = vld [vmem:[%s4944_s2 + $0xe8] sm:$0xf] }
 0x1db   : > { %v1291_v25 = vadd.f32 %v4431_v22, %v1290_v54  ;;  %3311 = vrcp.f32 %v4493_v61  ;;  %v2759_v41 = vor.u32 %v3109_v46, %v2756_v24  ;;  %vm1355_vm10 = vweird.f32 %v4355_v36  ;;  %v3169_v24 = vld [vmem:[%s4944_s2 + $0xec] sm:$0xf] }
 0x1dc   : > { %v1328_v43 = vmul.f32 %v4463_v33, %v1327_v56  ;;  %3313 = vtanh.f32 %v4489_v11  ;;  %v1361_v59 = vand.u32 2147483648, %v4355_v36  ;;  %v1359_v63 = vand.u32 2147483647, %v4355_v36  ;;  %vm1357_vm12 = vmor %vm1355_vm10, %vm1356_vm9 }
 0x1dd   : > { %v1295_v57 = vsel %vm1294_vm5, %v4431_v22, %v1291_v25  ;;  %1640 = vmatpush.bf16.msrb.mxu2 %v2755_v49  ;;  %1654 = vmatpush.bf16.msrb.mxu3 %v2759_v41  ;;  %v1353_v22 = vmul.f32 %v4445_v34, %v1352_v23  ;;  %v1374_v3 = vand.u32 2147483647, %v4493_v61  ;;  %vm1370_vm13 = vweird.f32 %v4493_v61  ;;  %v2978_v49 = vld [vmem:[%s4944_s2 + $0xc0] sm:$0xf] }
 0x1de   : > { %v1329_v45 = vadd.f32 %v4463_v33, %v1328_v43  ;;  %v1300_v51 = vsel %vm1297_vm6, %v1299_v26, %v1295_v57  ;;  %1612 = vmatpush.bf16.msrb.mxu0 %v2747_v13  ;;  %v1362_v27 = vor.u32 1.1754944e-38, %v1361_v59  ;;  %vm1360_vm15 = vcmp.eq.f32.partialorder %v1359_v63, 8.507059e+37  ;;  %v3168_v13 = vld [vmem:[%s4944_s2 + $0xe4] sm:$0xf]  ;;  %v3004_v26 = vld [vmem:[%s4944_s2 + $0xf8] sm:$0xf0] }
 0x1df   : > { %v1383_v48 = vmul.f32 %v3310_v21, %v1300_v51  ;;  %v1354_v19 = vadd.f32 %v4445_v34, %v1353_v22  ;;  %vm1375_vm0 = vcmp.eq.f32.partialorder %v1374_v3, 8.507059e+37  ;;  %v3171_v21 = vld [vmem:[%s4944_s2 + $0xf4] sm:$0xf0]  ;;  %v2999_v37 = vor.u32 %v3168_v13, %v2996_v35  ;;  %v3164_v51 = vld [vmem:[%s4944_s2 + $0xc4] sm:$0xf] }
 0x1e0   : > { %v1333_v29 = vsel %vm1332_vm7, %v4463_v33, %v1329_v45  ;;  %v3003_v46 = vor.u32 %v3171_v21, %v3002_v15  ;;  %v3007_v45 = vor.u32 %v3169_v24, %v3004_v26  ;;  %v3167_v22 = vld [vmem:[%s4944_s2 + $0xd4] sm:$0xf0]  ;;  %v3162_v59 = vld [vmem:[%s4944_s2 + $0xac] sm:$0xf0]  ;;  %v2964_v3 = vld [vmem:[%s4944_s2 + $0xb0] sm:$0xf0] }
 0x1e1   : > { %v1338_v55 = vsel %vm1335_vm8, %v1337_v47, %v1333_v29  ;;  %v3312_v52 = vpop.eup %3311  ;;  %v1358_v40 = vsel %vm1357_vm12, %v4445_v34, %v1354_v19  ;;  %v2994_v34 = vld [vmem:[%s4944_s2 + $0xe0] sm:$0xf]  ;;  %2024 = vmatpush.bf16.msra.mxu1 %v2999_v37  ;;  %v3166_v47 = vld [vmem:[%s4944_s2 + $0xcc] sm:$0xf0]  ;;  %v2980_v29 = vld [vmem:[%s4944_s2 + $0xd0] sm:$0xf0] }
 0x1e2   : > { %v1381_v50 = vmul.f32 %v1338_v55, %v4207_v8  ;;  %v1366_v39 = vmul.f32 %v3312_v52, %v4493_v61  ;;  %v1376_v8 = vand.u32 2147483648, %v4493_v61  ;;  %vm1371_vm11 = vweird.f32 %v3312_v52  ;;  %v3314_v44 = vpop.eup %3313  ;;  %v3170_v61 = vld [vmem:[%s4944_s2 + $0xec] sm:$0xf0]  ;;  %2038 = vmatpush.bf16.msra.mxu2 %v3003_v46  ;;  %2052 = vmatpush.bf16.msra.mxu3 %v3007_v45  ;;  %v2986_v55 = vld [vmem:[%s4944_s2 + $0xc8] sm:$0xf] }
 0x1e3   : > { %vm1372_vm14 = vmor %vm1370_vm13, %vm1371_vm11  ;;  %v1363_v36 = vsel %vm1360_vm15, %v1362_v27, %v1358_v40  ;;  %v2995_v32 = vor.u32 %v3170_v61, %v2994_v34  ;;  %v2970_v40 = vld [vmem:[%s4944_s2 + $0xa8] sm:$0xf]  ;;  %v2946_v34 = vld [vmem:[%s4944_s2 + $0x80] sm:$0xf] }
 0x1e4   : > { %v4526_v38 = vadd.f32 %v1383_v48, %v1381_v50  ;;  %v1367_v33 = vsub.f32 1.0, %v1366_v39  ;;  %v1377_v0 = vor.u32 1.1754944e-38, %v1376_v8  ;;  %v1388_v56 = vmul.f32 %v3314_v44, %v1363_v36  ;;  %v3165_v50 = vld [vmem:[%s4944_s2 + $0xcc] sm:$0xf]  ;;  %v2988_v39 = vld [vmem:[%s4944_s2 + $0xd8] sm:$0xf0] }
 0x1e5   : > { %2010 = vmatpush.bf16.msra.mxu0 %v2995_v32  ;;  %v2983_v48 = vor.u32 %v3164_v51, %v2980_v29  ;;  %v2991_v19 = vor.u32 %v3165_v50, %v2988_v39  ;;  %v3160_v8 = vld [vmem:[%s4944_s2 + $0xa4] sm:$0xf]  ;;  %v3161_v36 = vld [vmem:[%s4944_s2 + $0xac] sm:$0xf]  ;;  %v3158_v61 = vld [vmem:[%s4944_s2 + $0x8c] sm:$0xf0] }
 0x1e6   : > { %3315 = vtanh.f32 %v4526_v38  ;;  %v1368_v5 = vmul.f32 %v3312_v52, %v1367_v33  ;;  %v2962_v33 = vld [vmem:[%s4944_s2 + $0xa0] sm:$0xf]  ;;  %v2947_v35 = vor.u32 %v3158_v61, %v2946_v34  ;;  %v2954_v24 = vld [vmem:[%s4944_s2 + $0x88] sm:$0xf]  ;;  %v3159_v26 = vld [vmem:[%s4944_s2 + $0x94] sm:$0xf0] }
 0x1e7   : > { %2025 = vmatpush.bf16.msra.mxu1 %v2983_v48  ;;  %2053 = vmatpush.bf16.msra.mxu3 %v2991_v19  ;;  %v2930_v45 = vld [vmem:[%s4944_s2 + $0x60] sm:$0xf]  ;;  %v3152_v51 = vld [vmem:[%s4944_s2 + $0x64] sm:$0xf]  ;;  %v3153_v39 = vld [vmem:[%s4944_s2 + $0x6c] sm:$0xf] }
 0x1e8   : > { %v1369_v42 = vadd.f32 %v3312_v52, %v1368_v5  ;;  %v2963_v5 = vor.u32 %v3162_v59, %v2962_v33  ;;  %v2940_v19 = vld [vmem:[%s4944_s2 + $0x78] sm:$0xf0]  ;;  %v2914_v34 = vld [vmem:[%s4944_s2 + $0x40] sm:$0xf]  ;;  %v3150_v61 = vld [vmem:[%s4944_s2 + $0x4c] sm:$0xf0] }
 0x1ea   : > { %v1373_v53 = vsel %vm1372_vm14, %v3312_v52, %v1369_v42  ;;  %v2987_v52 = vor.u32 %v3167_v22, %v2986_v55  ;;  %v3163_v42 = vld [vmem:[%s4944_s2 + $0xb4] sm:$0xf0] }
 0x1eb   : > { %v1378_v30 = vsel %vm1375_vm0, %v1377_v0, %v1373_v53  ;;  %v2971_v53 = vor.u32 %v3163_v42, %v2970_v40  ;;  %v2943_v40 = vor.u32 %v3153_v39, %v2940_v19 }
 0x1ec   : > { %v3316_v7 = vpop.eup %3315  ;;  %2039 = vmatpush.bf16.msra.mxu2 %v2987_v52  ;;  %v3155_v52 = vld [vmem:[%s4944_s2 + $0x74] sm:$0xf0] }
 0x1ed   : > { %v1389_v54 = vmul.f32 %v3316_v7, %v1378_v30  ;;  %v2967_v7 = vor.u32 %v3160_v8, %v2964_v3  ;;  %v2972_v30 = vld [vmem:[%s4944_s2 + $0xb8] sm:$0xf0] }
 0x1ef   : > { %v3181_v31 = vpack.c.bf16 %v1389_v54, %v1388_v56  ;;  %2026 = vmatpush.bf16.msra.mxu1 %v2967_v7 }
 0x1f0   : > { %2040 = vmatpush.bf16.msra.mxu2 %v2971_v53 }
 0x1f1   : > { %3193 = vst [vmem:[%s3533_s28 + $0x8] sm:$0xff] %v3181_v31   ;;  %1613 = vmatmul.bf16.vlgmr.msrb.gmra.mxu0 %v3181_v31  ;;  %1627 = vmatmul.bf16.vlgmr.msrb.gmra.mxu1 %v3181_v31 }
 0x1f2   : > { %1641 = vmatmul.bf16.vlgmr.msrb.gmra.mxu2 %v3181_v31  ;;  %1655 = vmatmul.bf16.vlgmr.msrb.gmra.mxu3 %v3181_v31  ;;  %v2975_v31 = vor.u32 %v3161_v36, %v2972_v30 }
 0x1f4   : > { %2054 = vmatpush.bf16.msra.mxu3 %v2975_v31 }
 0x26e   : > { %v1614_v43 = vpop.f32.mrf.mxu0  ;;  %v1628_v25 = vpop.f32.mrf.mxu1 }
 0x26f   : > { %v1661_v23 = vadd.f32 %v1614_v43, %v3896_v58  ;;  %v1662_v57 = vadd.f32 %v1628_v25, %v3899_v60  ;;  %v2979_v60 = vor.u32 %v3166_v47, %v2978_v49  ;;  %v2948_v43 = vld [vmem:[%s4944_s2 + $0x90] sm:$0xf0]  ;;  %v3154_v47 = vld [vmem:[%s4944_s2 + $0x6c] sm:$0xf0] }
 0x270   : > { %v2931_v22 = vor.u32 %v3154_v47, %v2930_v45 }
 0x271   : > { %v2872_v41 = vmul.f32 -1.442695, %v1661_v23  ;;  %v2874_v58 = vmul.f32 -1.442695, %v1662_v57  ;;  %2011 = vmatpush.bf16.msra.mxu0 %v2979_v60  ;;  %v3157_v23 = vld [vmem:[%s4944_s2 + $0x8c] sm:$0xf] }
 0x272   : > { %v2956_v57 = vld [vmem:[%s4944_s2 + $0x98] sm:$0xf0]  ;;  %v2938_v60 = vld [vmem:[%s4944_s2 + $0x68] sm:$0xf] }
 0x273   : > { %3317 = vpow2.f32 %v2872_v41  ;;  %v2955_v41 = vor.u32 %v3159_v26, %v2954_v24  ;;  %v2959_v55 = vor.u32 %v3157_v23, %v2956_v57  ;;  %v2924_v26 = vld [vmem:[%s4944_s2 + $0x58] sm:$0xf0] }
 0x274   : > { %3319 = vpow2.f32 %v2874_v58  ;;  %v2932_v58 = vld [vmem:[%s4944_s2 + $0x70] sm:$0xf0]  ;;  %v2892_v57 = vld [vmem:[%s4944_s2 + $0x18] sm:$0xf0] }
 0x275   : > { %v1656_v63 = vpop.f32.mrf.mxu3  ;;  %2012 = vmatpush.bf16.msra.mxu0 %v2963_v5  ;;  %v1642_v37 = vpop.f32.mrf.mxu2  ;;  %v2935_v50 = vor.u32 %v3152_v51, %v2932_v58  ;;  %2041 = vmatpush.bf16.msra.mxu2 %v2955_v41  ;;  %v2898_v41 = vld [vmem:[%s4944_s2 + $0x20] sm:$0xf] }
 0x276   : > { %v1664_v44 = vadd.f32 %v1656_v63, %v3905_v1  ;;  %v1616_v27 = vpop.f32.mrf.mxu0  ;;  %v1630_v0 = vpop.f32.mrf.mxu1  ;;  %v1663_v48 = vadd.f32 %v1642_v37, %v3902_v62  ;;  %v2939_v62 = vor.u32 %v3155_v52, %v2938_v60  ;;  %2055 = vmatpush.bf16.msra.mxu3 %v2959_v55  ;;  %v3151_v37 = vld [vmem:[%s4944_s2 + $0x54] sm:$0xf0]  ;;  %v3146_v55 = vld [vmem:[%s4944_s2 + $0x2c] sm:$0xf0] }
 0x277   : > { %v1665_v56 = vadd.f32 %v1616_v27, %v3908_v2  ;;  %v1666_v54 = vadd.f32 %v1630_v0, %v3911_v4  ;;  %v3156_v2 = vld [vmem:[%s4944_s2 + $0x84] sm:$0xf] }
 0x278   : > { %v2876_v1 = vmul.f32 -1.442695, %v1664_v44  ;;  %v2951_v46 = vor.u32 %v3156_v2, %v2948_v43  ;;  %v2922_v43 = vld [vmem:[%s4944_s2 + $0x48] sm:$0xf] }
 0x279   : > { %v3318_v13 = vpop.eup %3317  ;;  %v2873_v32 = vmul.f32 -1.442695, %v1665_v56  ;;  %v2875_v21 = vmul.f32 -1.442695, %v1666_v54  ;;  %2013 = vmatpush.bf16.msra.mxu0 %v2947_v35  ;;  %2042 = vmatpush.bf16.msra.mxu2 %v2939_v62  ;;  %v3148_v35 = vld [vmem:[%s4944_s2 + $0x44] sm:$0xf] }
 0x27a   : > { %v3320_v4 = vpop.eup %3319  ;;  %v4627_v15 = vadd.f32 1.0, %v3318_v13  ;;  %3321 = vpow2.f32 %v2876_v1  ;;  %2027 = vmatpush.bf16.msra.mxu1 %v2951_v46  ;;  %2056 = vmatpush.bf16.msra.mxu3 %v2943_v40  ;;  %v3147_v62 = vld [vmem:[%s4944_s2 + $0x34] sm:$0xf0] }
 0x27b   : > { %v4632_v25 = vadd.f32 1.0, %v3320_v4  ;;  %3323 = vpow2.f32 %v2873_v32 }
 0x27c   : > { %3325 = vrcp.f32 %v4627_v15  ;;  %v1686_v63 = vand.u32 2147483647, %v4627_v15  ;;  %vm1682_vm5 = vweird.f32 %v4627_v15 }
 0x27d   : > { %3327 = vrcp.f32 %v4632_v25  ;;  %v1658_v49 = vpop.f32.mrf.mxu3  ;;  %2014 = vmatpush.bf16.msra.mxu0 %v2931_v22  ;;  %v1726_v7 = vand.u32 2147483648, %v4632_v25  ;;  %v1724_v53 = vand.u32 2147483647, %v4632_v25  ;;  %v1644_v56 = vpop.f32.mrf.mxu2  ;;  %vm1720_vm4 = vweird.f32 %v4632_v25  ;;  %v3144_v22 = vld [vmem:[%s4944_s2 + $0x24] sm:$0xf] }
 0x27e   : > { %3329 = vpow2.f32 %v2875_v21  ;;  %v1668_v59 = vadd.f32 %v1658_v49, %v3917_v9  ;;  %v1688_v9 = vand.u32 2147483648, %v4627_v15  ;;  %2028 = vmatpush.bf16.msra.mxu1 %v2935_v50  ;;  %vm4694_vm2 = vcmp.eq.f32.partialorder %v1686_v63, 8.507059e+37  ;;  %v2916_v21 = vld [vmem:[%s4944_s2 + $0x50] sm:$0xf0] }
 0x27f   : > { %3331 = vtanh.f32 %v1663_v48  ;;  %v1667_v4 = vadd.f32 %v1644_v56, %v3914_v6  ;;  %v1727_v46 = vor.u32 1.1754944e-38, %v1726_v7  ;;  %v2915_v6 = vor.u32 %v3150_v61, %v2914_v34  ;;  %v2900_v50 = vld [vmem:[%s4944_s2 + $0x30] sm:$0xf0] }
 0x280   : > { %v3322_v29 = vpop.eup %3321  ;;  %v2877_v54 = vmul.f32 -1.442695, %v1668_v59  ;;  %v1689_v32 = vor.u32 1.1754944e-38, %v1688_v9  ;;  %vm4744_vm8 = vcmp.eq.f32.partialorder %v1724_v53, 8.507059e+37  ;;  %v2923_v48 = vor.u32 %v3151_v37, %v2922_v43  ;;  %v2906_v59 = vld [vmem:[%s4944_s2 + $0x28] sm:$0xf] }
 0x281   : > { %v3324_v33 = vpop.eup %3323  ;;  %v4677_v5 = vadd.f32 1.0, %v3322_v29  ;;  %2015 = vmatpush.bf16.msra.mxu0 %v2915_v6  ;;  %v2919_v29 = vor.u32 %v3148_v35, %v2916_v21  ;;  %v2908_v9 = vld [vmem:[%s4944_s2 + $0x38] sm:$0xf0]  ;;  %v2903_v61 = vor.u32 %v3144_v22, %v2900_v50 }
 0x282   : > { %v4674_v8 = vpop.eup %3325  ;;  %v4679_v3 = vadd.f32 1.0, %v3324_v33  ;;  %2043 = vmatpush.bf16.msra.mxu2 %v2923_v48 }
 0x283   : > { %v4681_v42 = vpop.eup %3327  ;;  %v1678_v44 = vmul.f32 %v4674_v8, %v4627_v15  ;;  %vm1683_vm1 = vweird.f32 %v4674_v8  ;;  %2029 = vmatpush.bf16.msra.mxu1 %v2919_v29 }
 0x284   : > { %v3330_v27 = vpop.eup %3329  ;;  %v1716_v0 = vmul.f32 %v4681_v42, %v4632_v25  ;;  %3333 = vrcp.f32 %v4679_v3  ;;  %vm1721_vm3 = vweird.f32 %v4681_v42  ;;  %vm4727_vm6 = vmor %vm1682_vm5, %vm1683_vm1  ;;  %v3149_v25 = vld [vmem:[%s4944_s2 + $0x4c] sm:$0xf]  ;;  %v1701_v51 = vand.u32 2147483647, %v4679_v3 }
 0x285   : > { %v1679_v36 = vsub.f32 1.0, %v1678_v44  ;;  %v4691_v30 = vadd.f32 1.0, %v3330_v27  ;;  %3335 = vrcp.f32 %v4677_v5  ;;  %v3332_v23 = vpop.eup %3331  ;;  %vm4739_vm7 = vmor %vm1720_vm4, %vm1721_vm3  ;;  %vm1697_vm9 = vweird.f32 %v4679_v3  ;;  %v2882_v27 = vld [vmem:[%s4944_s2] sm:$0xf] }
 0x286   : > { %v1717_v31 = vsub.f32 1.0, %v1716_v0  ;;  %v2927_v44 = vor.u32 %v3149_v25, %v2924_v26  ;;  %v3142_v0 = vld [vmem:[%s4944_s2 + $0xc] sm:$0xf0]  ;;  %v1703_v56 = vand.u32 2147483648, %v4679_v3  ;;  %vm1702_vm14 = vcmp.eq.f32.partialorder %v1701_v51, 8.507059e+37 }
 0x287   : > { %v1680_v13 = vmul.f32 %v4674_v8, %v1679_v36  ;;  %3337 = vrcp.f32 %v4691_v30  ;;  %v1741_v47 = vand.u32 2147483648, %v4691_v30  ;;  %2030 = vmatpush.bf16.msra.mxu1 %v2903_v61  ;;  %v2883_v43 = vor.u32 %v3142_v0, %v2882_v27 }
 0x288   : > { %v1718_v2 = vmul.f32 %v4681_v42, %v1717_v31  ;;  %3339 = vpow2.f32 %v2877_v54  ;;  %v3140_v54 = vld [vmem:[%s4944_s2 + $0x4] sm:$0xf]  ;;  %v2884_v31 = vld [vmem:[%s4944_s2 + $0x10] sm:$0xf0]  ;;  %2057 = vmatpush.bf16.msra.mxu3 %v2927_v44  ;;  %v1739_v26 = vand.u32 2147483647, %v4691_v30  ;;  %vm1735_vm12 = vweird.f32 %v4691_v30 }
 0x289   : > { %v1681_v24 = vadd.f32 %v4674_v8, %v1680_v13  ;;  %3341 = vtanh.f32 %v1667_v4  ;;  %v2907_v13 = vor.u32 %v3147_v62, %v2906_v59  ;;  %v2887_v37 = vor.u32 %v3140_v54, %v2884_v31 }
 0x28a   : > { %v1719_v45 = vadd.f32 %v4681_v42, %v1718_v2  ;;  %v4753_v58 = vpop.eup %3333  ;;  %v1742_v48 = vor.u32 1.1754944e-38, %v1741_v47  ;;  %vm1740_vm0 = vcmp.eq.f32.partialorder %v1739_v26, 8.507059e+37  ;;  %v1766_v62 = vand.u32 2147483648, %v4677_v5 }
 0x28b   : > { %v1685_v60 = vsel %vm4727_vm6, %v4674_v8, %v1681_v24  ;;  %v4767_v52 = vpop.eup %3335  ;;  %v1693_v33 = vmul.f32 %v4753_v58, %v4679_v3  ;;  %v3145_v8 = vld [vmem:[%s4944_s2 + $0x2c] sm:$0xf]  ;;  %vm1698_vm10 = vweird.f32 %v4753_v58  ;;  %v3143_v24 = vld [vmem:[%s4944_s2 + $0x14] sm:$0xf0]  ;;  %2044 = vmatpush.bf16.msra.mxu2 %v2907_v13  ;;  %2031 = vmatpush.bf16.msra.mxu1 %v2887_v37 }
 0x28c   : > { %v1690_v39 = vsel %vm4694_vm2, %v1689_v32, %v1685_v60  ;;  %v1723_v19 = vsel %vm4739_vm7, %v4681_v42, %v1719_v45  ;;  %v1756_v34 = vmul.f32 %v4767_v52, %v4677_v5  ;;  %v2911_v21 = vor.u32 %v3145_v8, %v2908_v9  ;;  %vm1699_vm13 = vmor %vm1697_vm9, %vm1698_vm10 }
 0x28d   : > { %v4785_v63 = vpop.eup %3337  ;;  %v1728_v40 = vsel %vm4744_vm8, %v1727_v46, %v1723_v19  ;;  %v1787_v42 = vmul.f32 %v3332_v23, %v1690_v39  ;;  %v1694_v53 = vsub.f32 1.0, %v1693_v33  ;;  %v2890_v46 = vld [vmem:[%s4944_s2 + $0x8] sm:$0xf]  ;;  %v3141_v23 = vld [vmem:[%s4944_s2 + $0xc] sm:$0xf]  ;;  %v1704_v45 = vor.u32 1.1754944e-38, %v1703_v56 }
 0x28e   : > { %v1785_v7 = vmul.f32 %v1728_v40, %v4489_v11  ;;  %v1731_v36 = vmul.f32 %v4785_v63, %v4691_v30  ;;  %v3340_v1 = vpop.eup %3339  ;;  %v2899_v11 = vor.u32 %v3146_v55, %v2898_v41  ;;  %vm1736_vm11 = vweird.f32 %v4785_v63  ;;  %2058 = vmatpush.bf16.msra.mxu3 %v2911_v21 }
 0x28f   : > { %v1695_v2 = vmul.f32 %v4753_v58, %v1694_v53  ;;  %v4815_v4 = vadd.f32 1.0, %v3340_v1  ;;  %v3342_v15 = vpop.eup %3341  ;;  %v1757_v49 = vsub.f32 1.0, %v1756_v34  ;;  %v2891_v29 = vor.u32 %v3143_v24, %v2890_v46  ;;  %vm1737_vm15 = vmor %vm1735_vm12, %vm1736_vm11 }
 0x290   : > { %v4811_v32 = vadd.f32 %v1787_v42, %v1785_v7  ;;  %v1732_v35 = vsub.f32 1.0, %v1731_v36  ;;  %2016 = vmatpush.bf16.msra.mxu0 %v2899_v11  ;;  %v2895_v3 = vor.u32 %v3141_v23, %v2892_v57  ;;  %vm1761_vm1 = vweird.f32 %v4767_v52 }
 0x291   : > { %v1696_v25 = vadd.f32 %v4753_v58, %v1695_v2  ;;  %3343 = vrcp.f32 %v4815_v4  ;;  %2045 = vmatpush.bf16.msra.mxu2 %v2891_v29  ;;  %vm1760_vm2 = vweird.f32 %v4677_v5  ;;  %v1764_v8 = vand.u32 2147483647, %v4677_v5 }
 0x292   : > { %v1733_v6 = vmul.f32 %v4785_v63, %v1732_v35  ;;  %2059 = vmatpush.bf16.msra.mxu3 %v2895_v3  ;;  %3345 = vtanh.f32 %v4811_v32  ;;  %v1779_v40 = vand.u32 2147483647, %v4815_v4  ;;  %vm1762_vm4 = vmor %vm1760_vm2, %vm1761_vm1  ;;  %vm1775_vm5 = vweird.f32 %v4815_v4 }
 0x293   : > { %v1700_v41 = vsel %vm1699_vm13, %v4753_v58, %v1696_v25  ;;  %v1758_v58 = vmul.f32 %v4767_v52, %v1757_v49  ;;  %v1767_v27 = vor.u32 1.1754944e-38, %v1766_v62  ;;  %vm1765_vm7 = vcmp.eq.f32.partialorder %v1764_v8, 8.507059e+37 }
 0x294   : > { %v1734_v60 = vadd.f32 %v4785_v63, %v1733_v6  ;;  %v1705_v55 = vsel %vm1702_vm14, %v1704_v45, %v1700_v41  ;;  %2017 = vmatpush.bf16.msra.mxu0 %v2883_v43  ;;  %vm1780_vm8 = vcmp.eq.f32.partialorder %v1779_v40, 8.507059e+37 }
 0x295   : > { %v1788_v22 = vmul.f32 %v3342_v15, %v1705_v55  ;;  %v1759_v47 = vadd.f32 %v4767_v52, %v1758_v58 }
 0x296   : > { %v1738_v51 = vsel %vm1737_vm15, %v4785_v63, %v1734_v60 }
 0x297   : > { %v1743_v50 = vsel %vm1740_vm0, %v1742_v48, %v1738_v51  ;;  %v3344_v19 = vpop.eup %3343  ;;  %v1763_v42 = vsel %vm1762_vm4, %v4767_v52, %v1759_v47 }
 0x298   : > { %v1786_v39 = vmul.f32 %v1743_v50, %v4526_v38  ;;  %v1771_v30 = vmul.f32 %v3344_v19, %v4815_v4  ;;  %v1781_v38 = vand.u32 2147483648, %v4815_v4  ;;  %vm1776_vm3 = vweird.f32 %v3344_v19  ;;  %v3346_v9 = vpop.eup %3345 }
 0x299   : > { %vm1777_vm6 = vmor %vm1775_vm5, %vm1776_vm3  ;;  %v1768_v5 = vsel %vm1765_vm7, %v1767_v27, %v1763_v42 }
 0x29a   : > { %v4848_v33 = vadd.f32 %v1788_v22, %v1786_v39  ;;  %v1772_v59 = vsub.f32 1.0, %v1771_v30  ;;  %v1782_v0 = vor.u32 1.1754944e-38, %v1781_v38  ;;  %v1793_v56 = vmul.f32 %v3346_v9, %v1768_v5 }
 0x29c   : > { %3347 = vtanh.f32 %v4848_v33  ;;  %v1773_v63 = vmul.f32 %v3344_v19, %v1772_v59 }
 0x29e   : > { %v1774_v44 = vadd.f32 %v3344_v19, %v1773_v63 }
 0x2a0   : > { %v1778_v53 = vsel %vm1777_vm6, %v3344_v19, %v1774_v44 }
 0x2a1   : > { %v1783_v36 = vsel %vm1780_vm8, %v1782_v0, %v1778_v53 }
 0x2a2   : > { %v3348_v7 = vpop.eup %3347 }
 0x2a3   : > { %v1794_v54 = vmul.f32 %v3348_v7, %v1783_v36 }
 0x2a5   : > { %v3186_v31 = vpack.c.bf16 %v1794_v54, %v1793_v56 }
 0x2a7   : > { %3194 = vst [vmem:[%s3533_s28 + $0x10] sm:$0xff] %v3186_v31   ;;  %2018 = vmatmul.bf16.vlgmr.msra.gmra.mxu0 %v3186_v31  ;;  %2032 = vmatmul.bf16.vlgmr.msra.gmra.mxu1 %v3186_v31 }
 0x2a8   : > { %2046 = vmatmul.bf16.vlgmr.msra.gmra.mxu2 %v3186_v31  ;;  %2060 = vmatmul.bf16.vlgmr.msra.gmra.mxu3 %v3186_v31 }
 0x324   : > { %v2019_v52 = vpop.f32.mrf.mxu0  ;;  %v2033_v1 = vpop.f32.mrf.mxu1 }
 0x325   : > { %v2066_v34 = vadd.f32 %v2019_v52, %v3920_v10  ;;  %v2067_v11 = vadd.f32 %v2033_v1, %v3923_v12 }
 0x327   : > { %v3008_v61 = vmul.f32 -1.442695, %v2066_v34  ;;  %v3010_v13 = vmul.f32 -1.442695, %v2067_v11 }
 0x329   : > { %3349 = vpow2.f32 %v3008_v61 }
 0x32a   : > { %3351 = vpow2.f32 %v3010_v13 }
 0x32b   : > { %v2061_v35 = vpop.f32.mrf.mxu3  ;;  %v2047_v26 = vpop.f32.mrf.mxu2 }
 0x32c   : > { %v2069_v2 = vadd.f32 %v2061_v35, %v3929_v17  ;;  %v2021_v4 = vpop.f32.mrf.mxu0  ;;  %v2035_v21 = vpop.f32.mrf.mxu1  ;;  %v2068_v57 = vadd.f32 %v2047_v26, %v3926_v14 }
 0x32d   : > { %v2070_v43 = vadd.f32 %v2021_v4, %v3932_v18  ;;  %v2071_v37 = vadd.f32 %v2035_v21, %v3935_v20 }
 0x32e   : > { %v3012_v46 = vmul.f32 -1.442695, %v2069_v2 }
 0x32f   : > { %v3350_v24 = vpop.eup %3349  ;;  %v3009_v15 = vmul.f32 -1.442695, %v2070_v43  ;;  %v3011_v12 = vmul.f32 -1.442695, %v2071_v37 }
 0x330   : > { %v3352_v6 = vpop.eup %3351  ;;  %v2080_v10 = vadd.f32 1.0, %v3350_v24  ;;  %3353 = vpow2.f32 %v3012_v46 }
 0x331   : > { %v2118_v25 = vadd.f32 1.0, %v3352_v6  ;;  %3355 = vpow2.f32 %v3009_v15 }
 0x332   : > { %3357 = vrcp.f32 %v2080_v10  ;;  %v2091_v58 = vand.u32 2147483647, %v2080_v10  ;;  %vm2087_vm11 = vweird.f32 %v2080_v10 }
 0x333   : > { %3359 = vrcp.f32 %v2118_v25  ;;  %v2063_v17 = vpop.f32.mrf.mxu3  ;;  %v2131_v50 = vand.u32 2147483648, %v2118_v25  ;;  %v2049_v39 = vpop.f32.mrf.mxu2  ;;  %v2129_v30 = vand.u32 2147483647, %v2118_v25  ;;  %vm2125_vm12 = vweird.f32 %v2118_v25 }
 0x334   : > { %3361 = vpow2.f32 %v3011_v12  ;;  %v2073_v20 = vadd.f32 %v2063_v17, %v3993_v16  ;;  %v2093_v16 = vand.u32 2147483648, %v2080_v10  ;;  %v2072_v38 = vadd.f32 %v2049_v39, %v3984_v28 }
 0x335   : > { %v2132_v9 = vor.u32 1.1754944e-38, %v2131_v50  ;;  %vm2092_vm15 = vcmp.eq.f32.partialorder %v2091_v58, 8.507059e+37  ;;  %vm2130_vm0 = vcmp.eq.f32.partialorder %v2129_v30, 8.507059e+37 }
 0x336   : > { %v3354_v23 = vpop.eup %3353  ;;  %v3013_v14 = vmul.f32 -1.442695, %v2073_v20  ;;  %v2094_v63 = vor.u32 1.1754944e-38, %v2093_v16 }
 0x337   : > { %v3356_v18 = vpop.eup %3355  ;;  %v4869_v45 = vadd.f32 1.0, %v3354_v23 }
 0x338   : > { %v3358_v49 = vpop.eup %3357  ;;  %v4872_v41 = vadd.f32 1.0, %v3356_v18 }
 0x339   : > { %v3360_v60 = vpop.eup %3359  ;;  %v2083_v29 = vmul.f32 %v3358_v49, %v2080_v10  ;;  %3363 = vrcp.f32 %v4869_v45  ;;  %vm2088_vm9 = vweird.f32 %v3358_v49  ;;  %v2171_v54 = vand.u32 2147483648, %v4869_v45 }
 0x33a   : > { %v3362_v48 = vpop.eup %3361  ;;  %v2121_v55 = vmul.f32 %v3360_v60, %v2118_v25  ;;  %3365 = vtanh.f32 %v2068_v57  ;;  %vm2126_vm10 = vweird.f32 %v3360_v60  ;;  %vm2089_vm13 = vmor %vm2087_vm11, %vm2088_vm9  ;;  %vm2102_vm1 = vweird.f32 %v4872_v41 }
 0x33b   : > { %v2084_v3 = vsub.f32 1.0, %v2083_v29  ;;  %3367 = vrcp.f32 %v4872_v41  ;;  %v4876_v51 = vadd.f32 1.0, %v3362_v48  ;;  %vm2127_vm14 = vmor %vm2125_vm12, %vm2126_vm10  ;;  %v2106_v13 = vand.u32 2147483647, %v4872_v41 }
 0x33c   : > { %v2122_v22 = vsub.f32 1.0, %v2121_v55  ;;  %v2108_v35 = vand.u32 2147483648, %v4872_v41  ;;  %vm2165_vm5 = vweird.f32 %v4869_v45  ;;  %v2169_v6 = vand.u32 2147483647, %v4869_v45 }
 0x33d   : > { %v2085_v19 = vmul.f32 %v3358_v49, %v2084_v3  ;;  %3369 = vrcp.f32 %v4876_v51  ;;  %v2146_v61 = vand.u32 2147483648, %v4876_v51  ;;  %v2144_v43 = vand.u32 2147483647, %v4876_v51 }
 0x33e   : > { %v2123_v47 = vmul.f32 %v3360_v60, %v2122_v22  ;;  %3371 = vpow2.f32 %v3013_v14  ;;  %v2109_v10 = vor.u32 1.1754944e-38, %v2108_v35  ;;  %vm2140_vm8 = vweird.f32 %v4876_v51 }
 0x33f   : > { %v4879_v59 = vpop.eup %3363  ;;  %v2086_v62 = vadd.f32 %v3358_v49, %v2085_v19  ;;  %3373 = vtanh.f32 %v2072_v38  ;;  %vm2107_vm9 = vcmp.eq.f32.partialorder %v2106_v13, 8.507059e+37  ;;  %v2147_v23 = vor.u32 1.1754944e-38, %v2146_v61  ;;  %v2242_v38 = vld [vmem:[%s3533_s28 + $0x8] sm:$0xff] (%p3511_p6)  }
 0x340   : > { %v3366_v8 = vpop.eup %3365  ;;  %v2124_v40 = vadd.f32 %v3360_v60, %v2123_v47  ;;  %v2161_v42 = vmul.f32 %v4879_v59, %v4869_v45  ;;  %vm2166_vm3 = vweird.f32 %v4879_v59  ;;  %v2172_v18 = vor.u32 1.1754944e-38, %v2171_v54  ;;  %2243 = vst [vmem:[%s2221_s14 + $0x10] sm:$0xff] (%p3511_p6), %v2242_v38  }
 0x341   : > { %v3368_v44 = vpop.eup %3367  ;;  %v2090_v27 = vsel %vm2089_vm13, %v3358_v49, %v2086_v62  ;;  %vm4900_vm7 = vmor %vm2165_vm5, %vm2166_vm3  ;;  %vm2145_vm11 = vcmp.eq.f32.partialorder %v2144_v43, 8.507059e+37  ;;  %vm2170_vm12 = vcmp.eq.f32.partialorder %v2169_v6, 8.507059e+37  ;;  %v2238_v62 = vld [vmem:[%s3533_s28] sm:$0xff] (%p3511_p6)  }
 0x342   : > { %v2095_v0 = vsel %vm2092_vm15, %v2094_v63, %v2090_v27  ;;  %v2128_v7 = vsel %vm2127_vm14, %v3360_v60, %v2124_v40  ;;  %v2162_v53 = vsub.f32 1.0, %v2161_v42  ;;  %v2098_v28 = vmul.f32 %v3368_v44, %v4872_v41  ;;  %2239 = vst [vmem:[%s2221_s14] sm:$0xff] (%p3511_p6), %v2238_v62  }
 0x343   : > { %v3370_v5 = vpop.eup %3369  ;;  %v2133_v36 = vsel %vm2130_vm0, %v2132_v9, %v2128_v7  ;;  %v2192_v56 = vmul.f32 %v3366_v8, %v2095_v0  ;;  %vm2103_vm2 = vweird.f32 %v3368_v44  ;;  %v2246_v8 = vld [vmem:[%s3533_s28 + $0x10] sm:$0xff] (%p3511_p6)  }
 0x344   : > { %v2190_v31 = vmul.f32 %v2133_v36, %v4811_v32  ;;  %v2163_v52 = vmul.f32 %v4879_v59, %v2162_v53  ;;  %v2099_v1 = vsub.f32 1.0, %v2098_v28  ;;  %v2136_v34 = vmul.f32 %v3370_v5, %v4876_v51  ;;  %v3372_v11 = vpop.eup %3371  ;;  %vm2104_vm6 = vmor %vm2102_vm1, %vm2103_vm2  ;;  %2247 = vst [vmem:[%s2221_s14 + $0x20] sm:$0xff] (%p3511_p6), %v2246_v8  }
 0x345   : > { %v2159_v37 = vadd.f32 1.0, %v3372_v11  ;;  %vm2141_vm4 = vweird.f32 %v3370_v5  ;;  %v3374_v15 = vpop.eup %3373 }
 0x346   : > { %v2194_v2 = vadd.f32 %v2192_v56, %v2190_v31  ;;  %v2137_v4 = vsub.f32 1.0, %v2136_v34  ;;  %v2100_v21 = vmul.f32 %v3368_v44, %v2099_v1  ;;  %v2164_v32 = vadd.f32 %v4879_v59, %v2163_v52  ;;  %vm2142_vm10 = vmor %vm2140_vm8, %vm2141_vm4 }
 0x347   : > { %v2186_v22 = vand.u32 2147483648, %v2159_v37  ;;  %v2184_v58 = vand.u32 2147483647, %v2159_v37  ;;  %vm2180_vm14 = vweird.f32 %v2159_v37 }
 0x348   : > { %3375 = vtanh.f32 %v2194_v2  ;;  %2202 = vst [vmem:[#allocation3 + $0x8] sm:$0xff] %v2194_v2  ;;  %v2138_v46 = vmul.f32 %v3370_v5, %v2137_v4  ;;  %v2101_v24 = vadd.f32 %v3368_v44, %v2100_v21  ;;  %v2168_v17 = vsel %vm4900_vm7, %v4879_v59, %v2164_v32 }
 0x349   : > { %3377 = vrcp.f32 %v2159_v37  ;;  %v2173_v60 = vsel %vm2170_vm12, %v2172_v18, %v2168_v17  ;;  %v2187_v39 = vor.u32 1.1754944e-38, %v2186_v22  ;;  %vm2185_vm0 = vcmp.eq.f32.partialorder %v2184_v58, 8.507059e+37 }
 0x34a   : > { %v2105_v25 = vsel %vm2104_vm6, %v3368_v44, %v2101_v24  ;;  %v2139_v26 = vadd.f32 %v3370_v5, %v2138_v46 }
 0x34b   : > { %v2110_v57 = vsel %vm2107_vm9, %v2109_v10, %v2105_v25 }
 0x34c   : > { %v2143_v45 = vsel %vm2142_vm10, %v3370_v5, %v2139_v26  ;;  %v2193_v20 = vmul.f32 %v3374_v15, %v2110_v57 }
 0x34d   : > { %v2148_v49 = vsel %vm2145_vm11, %v2147_v23, %v2143_v45 }
 0x34e   : > { %v3376_v41 = vpop.eup %3375  ;;  %v2191_v29 = vmul.f32 %v2148_v49, %v4848_v33 }
 0x34f   : > { %v3378_v48 = vpop.eup %3377  ;;  %v2198_v55 = vmul.f32 %v3376_v41, %v2173_v60 }
 0x350   : > { %v2195_v3 = vadd.f32 %v2193_v20, %v2191_v29  ;;  %v2176_v51 = vmul.f32 %v3378_v48, %v2159_v37  ;;  %vm2181_vm13 = vweird.f32 %v3378_v48 }
 0x351   : > { %2200 = vst [vmem:[#allocation2] sm:$0xff] %v2198_v55  ;;  %vm2182_vm15 = vmor %vm2180_vm14, %vm2181_vm13 }
 0x352   : > { %3379 = vtanh.f32 %v2195_v3  ;;  %2203 = vst [vmem:[#allocation3] sm:$0xff] %v2195_v3  ;;  %v2177_v14 = vsub.f32 1.0, %v2176_v51 }
 0x354   : > { %v2178_v50 = vmul.f32 %v3378_v48, %v2177_v14 }
 0x356   : > { %v2179_v16 = vadd.f32 %v3378_v48, %v2178_v50 }
 0x358   : > { %v3380_v19 = vpop.eup %3379  ;;  %v2183_v30 = vsel %vm2182_vm15, %v3378_v48, %v2179_v16 }
 0x359   : > { %v2188_v33 = vsel %vm2185_vm0, %v2187_v39, %v2183_v30 }
 0x35a   : > { %v2199_v47 = vmul.f32 %v3380_v19, %v2188_v33  ;;  %2215 = sbr.rel (!%p3511_p6) target bundleno = 871 (0x367), region = 85 }
 0x35c   : > { %2201 = vst [vmem:[#allocation2 + $0x8] sm:$0xff] %v2199_v47  ;;  %v3191_v59 = vpack.c.bf16 %v2199_v47, %v2198_v55 }
 0x35e   : > { %3195 = vst [vmem:[%s3533_s28 + $0x18] sm:$0xff] %v3191_v59  }
 0x365   : > { %v2250_v63 = vld [vmem:[%s3533_s28 + $0x18] sm:$0xff]  }
 0x366   : > { %2251 = vst [vmem:[%s2221_s14 + $0x30] sm:$0xff] %v2250_v63  }
 0x367 PF: > { %s14_s21 = sadd.s32 1, %s3435_s21   ;;  %s4966_s15 = smov %s3415_s16 }
 0x368   : > { %p11_p13 = scmp.ge.s32.totalorder %s14_s21, 6   ;;  %s4967_s16 = smov %s3519_s30 }
 0x369   : > { %s4968_s17 = smov %s3427_s19  ;;  %s4969_s18 = smov %s3431_s20 }
 0x36a   : > { %s4970_s19 = smov %s4973_s22  ;;  %s4971_s20 = smov %s4977_s23 }
 0x36b   :  { %13 = sbr.rel (!%p11_p13) target bundleno = 4 (0x4), region = 163 }

// kernel: speech_embedder_forward.3
= control target key start
LH: loop header
LB: loop body
LE: loop exit
PB: predicated region body
PF: predicated region fallthrough
CT: control target
= control target key end

     0   :  { %s5476_s0 = inlined_call_operand.vmem [shape: bf16[8,32,128], index: 0, kind: input, shape index: {}]   ;;  %s5477_s1 = inlined_call_operand.vmem [shape: bf16[128,512], index: 1, kind: input, shape index: {}]   ;;  %s5478_s2 = inlined_call_operand.vmem [shape: bf16[128,512], index: 2, kind: input, shape index: {}]   ;;  %s5479_s3 = inlined_call_operand.vmem [shape: f32[1,512], index: 3, kind: input, shape index: {}]   ;;  %s5480_s4 = inlined_call_operand.vmem [shape: bf16[128,64], index: 4, kind: input, shape index: {}]   ;;  %s5481_s5 = inlined_call_operand.vmem [shape: f32[1,64], index: 5, kind: input, shape index: {}]   ;;  %s5482_s6 = inlined_call_operand.hbm [shape: f32[32,64], index: 6, kind: output, shape index: {}]  }
   0x1   :  { %5487 = sst [smem:[#allocation13_spill]] %s5476_s0 }
   0x2   :  { %11 = vsyncpa [#allocation7], 0 }
   0x3   :  { %13 = vsyncpa [#allocation7 + $0x1], 0  ;;  %s3831_s21 = smov 0   ;;  %s3833_s22 = smov 0  }
   0x4   :  { %s3835_s23 = smov 0   ;;  %s3837_s24 = smov 0  }
   0x5   :  { %s3839_s25 = smov 0   ;;  %s3841_s26 = smov 0  }
   0x6   :  { %s3843_s27 = smov 0   ;;  %s3845_s28 = smov 0  }
   0x7   :  { %s3847_s29 = smov 0   ;;  %s3849_s30 = smov 0  }
   0x8 LB: > { %5488 = sst [smem:[#allocation9_spill]] %s3787_s29  ;;  %s2553_s7 = sadd.s32 4294967295, %s3791_s30   ;;  %s3791_s30 = sphi %s3849_s30, %s19_s30   ;;  %s3787_s29 = sphi %s3847_s29, %s5518_s29   ;;  %s3783_s28 = sphi %s3845_s28, %s5525_s28   ;;  %s3779_s27 = sphi %s3843_s27, %s5516_s27   ;;  %s3775_s26 = sphi %s3841_s26, %s5524_s26   ;;  %s3771_s25 = sphi %s3839_s25, %s5523_s25   ;;  %s3767_s24 = sphi %s3837_s24, %s5522_s24   ;;  %s3763_s23 = sphi %s3835_s23, %s5521_s23   ;;  %s3759_s22 = sphi %s3833_s22, %s5520_s22   ;;  %s3755_s21 = sphi %s3831_s21, %s5519_s21  }
   0x9   : > { %s2554_s8 = sadd.s32 4294967294, %s3791_s30   ;;  %s28_s9 = sadd.s32 1, %s3783_s28 }
   0xa   : > { %s31_s10 = sadd.s32 1, %s3787_s29  ;;  %p29_p0 = scmp.ge.s32.totalorder %s28_s9, 2 }
   0xb   : > { %s40_s11 = sadd.s32 1, %s3771_s25  ;;  %p47_p1 = scmp.ne.s32.totalorder %s3771_s25, %s3767_s24 }
   0xc   : > { %p48_p2 = scmp.eq.s32.totalorder %s3791_s30, 0  ;;  %s5527_s9 = smov (%p29_p0, %s28_s9), 0 }
   0xd   : > { %5489 = sst [smem:[#allocation10_spill]] %s5527_s9  ;;  %s5529_s10 = smov (!%p29_p0, %s31_s10), %s3787_s29 }
   0xe   : > { %s35_s12 = ssub.s32 %s3783_s28, %s5527_s9  ;;  %p3894_p3 = por %p48_p2, %p47_p1 }
   0xf   : > { %p33_p4 = scmp.ge.s32.totalorder %s5529_s10, 2  ;;  %s171_s14 = sadd.s32 1, %s3763_s23 }
  0x10   : > { %p181_p5 = scmp.ne.s32.totalorder %s3763_s23, %s3759_s22  ;;  %p182_p6 = scmp.eq.s32.totalorder %s2553_s7, 3 }
  0x11   : > { %s5531_s10 = smov (%p33_p4, %s5529_s10), 0  ;;  %p187_p8 = scmp.ne.s32.totalorder %s3759_s22, %s3755_s21 }
  0x12   : > { %5491 = sst [smem:[#allocation11_spill]] %s5531_s10  ;;  %p3903_p7 = por %p182_p6, %p181_p5 }
  0x13   : > { %s36_s16 = ssub.s32 %s3787_s29, %s5531_s10  ;;  %p188_p9 = scmp.eq.s32.totalorder %s2554_s8, 3 }
  0x14   : > { %s37_s17 = sor.u32 %s36_s16, %s35_s12  ;;  %p169_p10 = scmp.eq.s32.totalorder %s36_s16, 0 }
  0x15   : > { %p38_p11 = scmp.eq.s32.totalorder %s37_s17, 0  ;;  %p3911_p12 = por %p188_p9, %p187_p8 }
  0x16   : > { %s3916_s19 = scalar_select %p169_p10, %s3763_s23, %s171_s14  }
  0x17   : > { %s3919_s20 = scalar_select %p38_p11, %s3771_s25, %s40_s11  }
  0x18   : > { %p2556_p13 = scmp.ge.s32.totalorder %s3791_s30, 4 }
  0x19   : > { %5494 = sst [smem:[#allocation12_spill]] %s3919_s20 }
  0x1a   : > { %219 = sbr.rel (%p2556_p13) target bundleno = 45 (0x2d), region = 36 }
  0x1f   : > { %222 = sbr.rel (!%p3894_p3) target bundleno = 45 (0x2d), region = 40  ;;  %s224_s7 = sand.u32 (%p3894_p3), 1, %s3771_s25  }
  0x20   : > { %s2559_s8 = sshll.u32 (%p3894_p3), %s3787_s29, 1  ;;  %s2557_s12 = sshll.u32 (%p3894_p3), %s224_s7, 5 }
  0x21   : > { %s3284_s16 = sshll.u32 (%p3894_p3), %s3783_s28, 4  ;;  %s5495_s0 = sld [smem:[#allocation13_spill]] (%p3894_p3) }
  0x22   : > { %s230_s17 = sadd.s32 (%p3894_p3), %s3284_s16, %s2559_s8  ;;  %s226_s20 = scalar_lea.vmem (%p3894_p3), [#allocation5], %s2557_s12 }
  0x23   : > { %s2561_s10 = sshll.u32 (%p3894_p3), %s230_s17, 2 }
  0x27   : > { %s232_s11 = scalar_lea.vmem %s5495_s0, %s2561_s10 }
  0x28   : > { %v249_v0 = vld [vmem:[%s232_s11] sm:$0xff]   ;;  %v253_v1 = vld [vmem:[%s232_s11 + $0x10] sm:$0xff]  }
  0x29   : > { %v257_v2 = vld [vmem:[%s232_s11 + $0x20] sm:$0xff]   ;;  %250 = vst [vmem:[%s226_s20] sm:$0xff] %v249_v0   ;;  %v261_v3 = vld [vmem:[%s232_s11 + $0x30] sm:$0xff]  }
  0x2a   : > { %254 = vst [vmem:[%s226_s20 + $0x8] sm:$0xff] %v253_v1  }
  0x2b   : > { %258 = vst [vmem:[%s226_s20 + $0x10] sm:$0xff] %v257_v2  }
  0x2c   : > { %262 = vst [vmem:[%s226_s20 + $0x18] sm:$0xff] %v261_v3  }
  0x2d PF: > { %p2562_p0 = scmp.ge.s32.totalorder %s3791_s30, 1  ;;  %p303_p1 = scmp.lt.s32.totalorder %s3791_s30, 5 }
  0x2f   : > { %p304_p2 = pnand %p2562_p0, %p303_p1 }
  0x30   : > { %s310_s9 = sand.u32 (!%p304_p2), 1, %s3767_s24   ;;  %s5485_s10 = sand.u32 (!%p304_p2), 1, %s3759_s22  }
  0x31   : > { %307 = sbr.rel (%p304_p2) target bundleno = 1218 (0x4c2), region = 81  ;;  %s2563_s13 = sshll.u32 (!%p304_p2), %s310_s9, 5 }
  0x32   : > { %s2564_s7 = sshll.u32 (!%p304_p2), %s5485_s10, 4  ;;  %s3936_s8 = scalar_lea.vmem (!%p304_p2), [#allocation5], %s2563_s13 }
  0x33   : > { %s3938_s12 = scalar_lea.vmem (!%p304_p2), [#allocation6], %s2564_s7  ;;  %p2565_p3 = scmp.ne.s32.totalorder (!%p304_p2), %s3775_s26, 0 }
  0x36   : > { %345 = sbr.rel (%p2565_p3) target bundleno = 64 (0x40), region = 89 }
  0x3b   : > { %v3793_v4 = vmov 0.0  }
  0x3c   : > { %346 = vst [vmem:[#allocation2] sm:$0xff] %v3793_v4 }
  0x3d   : > { %347 = vst [vmem:[#allocation2 + $0x8] sm:$0xff] %v3793_v4 }
  0x3e   : > { %348 = vst [vmem:[#allocation3 + $0x8] sm:$0xff] %v3793_v4 }
  0x3f   : > { %349 = vst [vmem:[#allocation3] sm:$0xff] %v3793_v4 }
  0x40 PF: > { %v2696_v5 = vld [vmem:[%s5477_s1 + $0xe0] sm:$0xf]  ;;  %v3319_v6 = vld [vmem:[%s5477_s1 + $0xec] sm:$0xf0]  ;;  %v3317_v7 = vld [vmem:[%s5477_s1 + $0xe4] sm:$0xf] }
  0x41   : > { %v2697_v8 = vor.u32 %v3319_v6, %v2696_v5  ;;  %v2698_v9 = vld [vmem:[%s5477_s1 + $0xf0] sm:$0xf0]  ;;  %v2704_v10 = vld [vmem:[%s5477_s1 + $0xe8] sm:$0xf]  ;;  %v3320_v11 = vld [vmem:[%s5477_s1 + $0xf4] sm:$0xf0] }
  0x42   : > { %v2701_v12 = vor.u32 %v3317_v7, %v2698_v9  ;;  %v2705_v13 = vor.u32 %v3320_v11, %v2704_v10  ;;  %v3318_v14 = vld [vmem:[%s5477_s1 + $0xec] sm:$0xf]  ;;  %v2706_v15 = vld [vmem:[%s5477_s1 + $0xf8] sm:$0xf0]  ;;  %v2680_v16 = vld [vmem:[%s5477_s1 + $0xc0] sm:$0xf] }
  0x43   : > { %584 = vmatpush.bf16.msra.mxu0 %v2697_v8  ;;  %v2709_v17 = vor.u32 %v3318_v14, %v2706_v15  ;;  %v3315_v18 = vld [vmem:[%s5477_s1 + $0xcc] sm:$0xf0]  ;;  %v3313_v19 = vld [vmem:[%s5477_s1 + $0xc4] sm:$0xf]  ;;  %v2682_v20 = vld [vmem:[%s5477_s1 + $0xd0] sm:$0xf0] }
  0x44   : > { %613 = vmatpush.bf16.msra.mxu1 %v2701_v12  ;;  %642 = vmatpush.bf16.msra.mxu2 %v2705_v13  ;;  %v2681_v21 = vor.u32 %v3315_v18, %v2680_v16  ;;  %v2685_v22 = vor.u32 %v3313_v19, %v2682_v20  ;;  %v2688_v23 = vld [vmem:[%s5477_s1 + $0xc8] sm:$0xf]  ;;  %v3316_v24 = vld [vmem:[%s5477_s1 + $0xd4] sm:$0xf0]  ;;  %v3314_v25 = vld [vmem:[%s5477_s1 + $0xcc] sm:$0xf] }
  0x45   : > { %671 = vmatpush.bf16.msra.mxu3 %v2709_v17  ;;  %v2689_v26 = vor.u32 %v3316_v24, %v2688_v23  ;;  %v2690_v27 = vld [vmem:[%s5477_s1 + $0xd8] sm:$0xf0]  ;;  %v2664_v28 = vld [vmem:[%s5477_s1 + $0xa0] sm:$0xf]  ;;  %v3311_v29 = vld [vmem:[%s5477_s1 + $0xac] sm:$0xf0] }
  0x46   : > { %v2693_v30 = vor.u32 %v3314_v25, %v2690_v27  ;;  %v3309_v31 = vld [vmem:[%s5477_s1 + $0xa4] sm:$0xf]  ;;  %v2666_v32 = vld [vmem:[%s5477_s1 + $0xb0] sm:$0xf0]  ;;  %v2672_v33 = vld [vmem:[%s5477_s1 + $0xa8] sm:$0xf]  ;;  %v2665_v34 = vor.u32 %v3311_v29, %v2664_v28 }
  0x47   : > { %585 = vmatpush.bf16.msra.mxu0 %v2681_v21  ;;  %v3312_v35 = vld [vmem:[%s5477_s1 + $0xb4] sm:$0xf0]  ;;  %v3310_v36 = vld [vmem:[%s5477_s1 + $0xac] sm:$0xf]  ;;  %v2674_v37 = vld [vmem:[%s5477_s1 + $0xb8] sm:$0xf0]  ;;  %v2669_v38 = vor.u32 %v3309_v31, %v2666_v32 }
  0x48   : > { %614 = vmatpush.bf16.msra.mxu1 %v2685_v22  ;;  %643 = vmatpush.bf16.msra.mxu2 %v2689_v26  ;;  %v2673_v39 = vor.u32 %v3312_v35, %v2672_v33  ;;  %v2648_v40 = vld [vmem:[%s5477_s1 + $0x80] sm:$0xf]  ;;  %v3307_v41 = vld [vmem:[%s5477_s1 + $0x8c] sm:$0xf0]  ;;  %v3305_v42 = vld [vmem:[%s5477_s1 + $0x84] sm:$0xf]  ;;  %v2677_v43 = vor.u32 %v3310_v36, %v2674_v37 }
  0x49   : > { %672 = vmatpush.bf16.msra.mxu3 %v2693_v30  ;;  %v2650_v44 = vld [vmem:[%s5477_s1 + $0x90] sm:$0xf0]  ;;  %v2656_v45 = vld [vmem:[%s5477_s1 + $0x88] sm:$0xf]  ;;  %v3308_v46 = vld [vmem:[%s5477_s1 + $0x94] sm:$0xf0]  ;;  %v2649_v49 = vor.u32 %v3307_v41, %v2648_v40 }
  0x4a   : > { %v3306_v47 = vld [vmem:[%s5477_s1 + $0x8c] sm:$0xf]  ;;  %v2658_v48 = vld [vmem:[%s5477_s1 + $0x98] sm:$0xf0]  ;;  %v2653_v50 = vor.u32 %v3305_v42, %v2650_v44  ;;  %v2657_v51 = vor.u32 %v3308_v46, %v2656_v45  ;;  %v2632_v52 = vld [vmem:[%s5477_s1 + $0x60] sm:$0xf] }
  0x4b   : > { %586 = vmatpush.bf16.msra.mxu0 %v2665_v34  ;;  %v3303_v53 = vld [vmem:[%s5477_s1 + $0x6c] sm:$0xf0]  ;;  %v3301_v54 = vld [vmem:[%s5477_s1 + $0x64] sm:$0xf]  ;;  %v2661_v55 = vor.u32 %v3306_v47, %v2658_v48  ;;  %v2634_v56 = vld [vmem:[%s5477_s1 + $0x70] sm:$0xf0] }
  0x4c   : > { %615 = vmatpush.bf16.msra.mxu1 %v2669_v38  ;;  %644 = vmatpush.bf16.msra.mxu2 %v2673_v39  ;;  %v2640_v57 = vld [vmem:[%s5477_s1 + $0x68] sm:$0xf]  ;;  %v3304_v58 = vld [vmem:[%s5477_s1 + $0x74] sm:$0xf0]  ;;  %v3302_v59 = vld [vmem:[%s5477_s1 + $0x6c] sm:$0xf]  ;;  %v2633_v61 = vor.u32 %v3303_v53, %v2632_v52  ;;  %v2637_v62 = vor.u32 %v3301_v54, %v2634_v56 }
  0x4d   : > { %673 = vmatpush.bf16.msra.mxu3 %v2677_v43  ;;  %v2642_v60 = vld [vmem:[%s5477_s1 + $0x78] sm:$0xf0]  ;;  %v2641_v63 = vor.u32 %v3304_v58, %v2640_v57  ;;  %v2616_v0 = vld [vmem:[%s5477_s1 + $0x40] sm:$0xf]  ;;  %v3299_v1 = vld [vmem:[%s5477_s1 + $0x4c] sm:$0xf0] }
  0x4e   : > { %v3297_v2 = vld [vmem:[%s5477_s1 + $0x44] sm:$0xf]  ;;  %v2645_v3 = vor.u32 %v3302_v59, %v2642_v60  ;;  %v2618_v4 = vld [vmem:[%s5477_s1 + $0x50] sm:$0xf0]  ;;  %v2624_v5 = vld [vmem:[%s5477_s1 + $0x48] sm:$0xf]  ;;  %v2617_v9 = vor.u32 %v3299_v1, %v2616_v0 }
  0x4f   : > { %587 = vmatpush.bf16.msra.mxu0 %v2649_v49  ;;  %v3300_v6 = vld [vmem:[%s5477_s1 + $0x54] sm:$0xf0]  ;;  %v3298_v7 = vld [vmem:[%s5477_s1 + $0x4c] sm:$0xf]  ;;  %v2626_v8 = vld [vmem:[%s5477_s1 + $0x58] sm:$0xf0]  ;;  %v2621_v10 = vor.u32 %v3297_v2, %v2618_v4 }
  0x50   : > { %616 = vmatpush.bf16.msra.mxu1 %v2653_v50  ;;  %645 = vmatpush.bf16.msra.mxu2 %v2657_v51  ;;  %v2625_v11 = vor.u32 %v3300_v6, %v2624_v5  ;;  %v2600_v12 = vld [vmem:[%s5477_s1 + $0x20] sm:$0xf]  ;;  %v3295_v13 = vld [vmem:[%s5477_s1 + $0x2c] sm:$0xf0]  ;;  %v3293_v14 = vld [vmem:[%s5477_s1 + $0x24] sm:$0xf]  ;;  %v2629_v15 = vor.u32 %v3298_v7, %v2626_v8 }
  0x51   : > { %674 = vmatpush.bf16.msra.mxu3 %v2661_v55  ;;  %v2602_v16 = vld [vmem:[%s5477_s1 + $0x30] sm:$0xf0]  ;;  %v2608_v17 = vld [vmem:[%s5477_s1 + $0x28] sm:$0xf]  ;;  %v3296_v18 = vld [vmem:[%s5477_s1 + $0x34] sm:$0xf0]  ;;  %v2601_v21 = vor.u32 %v3295_v13, %v2600_v12 }
  0x52   : > { %v3294_v19 = vld [vmem:[%s5477_s1 + $0x2c] sm:$0xf]  ;;  %v2610_v20 = vld [vmem:[%s5477_s1 + $0x38] sm:$0xf0]  ;;  %v2584_v22 = vld [vmem:[%s5477_s1] sm:$0xf]  ;;  %v2605_v23 = vor.u32 %v3293_v14, %v2602_v16  ;;  %v2609_v24 = vor.u32 %v3296_v18, %v2608_v17 }
  0x53   : > { %588 = vmatpush.bf16.msra.mxu0 %v2633_v61  ;;  %v3291_v25 = vld [vmem:[%s5477_s1 + $0xc] sm:$0xf0]  ;;  %v3289_v26 = vld [vmem:[%s5477_s1 + $0x4] sm:$0xf]  ;;  %v2586_v27 = vld [vmem:[%s5477_s1 + $0x10] sm:$0xf0]  ;;  %v2613_v28 = vor.u32 %v3294_v19, %v2610_v20 }
  0x54   : > { %617 = vmatpush.bf16.msra.mxu1 %v2637_v62  ;;  %646 = vmatpush.bf16.msra.mxu2 %v2641_v63  ;;  %v2592_v29 = vld [vmem:[%s5477_s1 + $0x8] sm:$0xf]  ;;  %v3292_v30 = vld [vmem:[%s5477_s1 + $0x14] sm:$0xf0]  ;;  %v3290_v31 = vld [vmem:[%s5477_s1 + $0xc] sm:$0xf]  ;;  %v2585_v35 = vor.u32 %v3291_v25, %v2584_v22  ;;  %v2589_v38 = vor.u32 %v3289_v26, %v2586_v27 }
  0x55   : > { %675 = vmatpush.bf16.msra.mxu3 %v2645_v3  ;;  %v2594_v32 = vld [vmem:[%s5477_s1 + $0x18] sm:$0xf0]  ;;  %v2824_v33 = vld [vmem:[%s5478_s2 + $0xe0] sm:$0xf]  ;;  %v3351_v34 = vld [vmem:[%s5478_s2 + $0xec] sm:$0xf0]  ;;  %v2593_v39 = vor.u32 %v3292_v30, %v2592_v29 }
  0x56   : > { %v3349_v36 = vld [vmem:[%s5478_s2 + $0xe4] sm:$0xf]  ;;  %v2826_v37 = vld [vmem:[%s5478_s2 + $0xf0] sm:$0xf0]  ;;  %v2597_v41 = vor.u32 %v3290_v31, %v2594_v32  ;;  %v2825_v42 = vor.u32 %v3351_v34, %v2824_v33  ;;  %v3350_v43 = vld [vmem:[%s5478_s2 + $0xec] sm:$0xf] }
  0x57   : > { %589 = vmatpush.bf16.msra.mxu0 %v2617_v9  ;;  %v3285_v40 = vld [vmem:[%s3936_s8] sm:$0xff]  ;;  %v2832_v44 = vld [vmem:[%s5478_s2 + $0xe8] sm:$0xf]  ;;  %v3352_v45 = vld [vmem:[%s5478_s2 + $0xf4] sm:$0xf0]  ;;  %v2829_v46 = vor.u32 %v3349_v36, %v2826_v37  ;;  %p3246_p4 = scmp.ne.s32.totalorder %s3775_s26, 1 }
  0x58   : > { %618 = vmatpush.bf16.msra.mxu1 %v2621_v10  ;;  %647 = vmatpush.bf16.msra.mxu2 %v2625_v11  ;;  %v2834_v47 = vld [vmem:[%s5478_s2 + $0xf8] sm:$0xf0]  ;;  %v2808_v48 = vld [vmem:[%s5478_s2 + $0xc0] sm:$0xf]  ;;  %v3347_v49 = vld [vmem:[%s5478_s2 + $0xcc] sm:$0xf0]  ;;  %v2833_v52 = vor.u32 %v3352_v45, %v2832_v44 }
  0x59   : > { %676 = vmatpush.bf16.msra.mxu3 %v2629_v15  ;;  %v3345_v50 = vld [vmem:[%s5478_s2 + $0xc4] sm:$0xf]  ;;  %v2810_v51 = vld [vmem:[%s5478_s2 + $0xd0] sm:$0xf0]  ;;  %v2837_v53 = vor.u32 %v3350_v43, %v2834_v47  ;;  %v2809_v54 = vor.u32 %v3347_v49, %v2808_v48  ;;  %v3346_v55 = vld [vmem:[%s5478_s2 + $0xcc] sm:$0xf] }
  0x5a   : > { %v2816_v56 = vld [vmem:[%s5478_s2 + $0xc8] sm:$0xf]  ;;  %v3348_v57 = vld [vmem:[%s5478_s2 + $0xd4] sm:$0xf0]  ;;  %v2813_v58 = vor.u32 %v3345_v50, %v2810_v51  ;;  %v2818_v59 = vld [vmem:[%s5478_s2 + $0xd8] sm:$0xf0] }
  0x5b   : > { %590 = vmatpush.bf16.msra.mxu0 %v2601_v21  ;;  %v2792_v60 = vld [vmem:[%s5478_s2 + $0xa0] sm:$0xf]  ;;  %v3343_v61 = vld [vmem:[%s5478_s2 + $0xac] sm:$0xf0]  ;;  %v3341_v62 = vld [vmem:[%s5478_s2 + $0xa4] sm:$0xf]  ;;  %v2817_v0 = vor.u32 %v3348_v57, %v2816_v56  ;;  %v2821_v1 = vor.u32 %v3346_v55, %v2818_v59 }
  0x5c   : > { %619 = vmatpush.bf16.msra.mxu1 %v2605_v23  ;;  %648 = vmatpush.bf16.msra.mxu2 %v2609_v24  ;;  %v2794_v63 = vld [vmem:[%s5478_s2 + $0xb0] sm:$0xf0]  ;;  %v2793_v2 = vor.u32 %v3343_v61, %v2792_v60  ;;  %v3342_v3 = vld [vmem:[%s5478_s2 + $0xac] sm:$0xf]  ;;  %v2800_v4 = vld [vmem:[%s5478_s2 + $0xa8] sm:$0xf] }
  0x5d   : > { %677 = vmatpush.bf16.msra.mxu3 %v2613_v28  ;;  %v3344_v5 = vld [vmem:[%s5478_s2 + $0xb4] sm:$0xf0]  ;;  %v2797_v6 = vor.u32 %v3341_v62, %v2794_v63  ;;  %v2802_v7 = vld [vmem:[%s5478_s2 + $0xb8] sm:$0xf0]  ;;  %v2776_v8 = vld [vmem:[%s5478_s2 + $0x80] sm:$0xf] }
  0x5e   : > { %v3339_v9 = vld [vmem:[%s5478_s2 + $0x8c] sm:$0xf0]  ;;  %v3337_v10 = vld [vmem:[%s5478_s2 + $0x84] sm:$0xf]  ;;  %v2778_v11 = vld [vmem:[%s5478_s2 + $0x90] sm:$0xf0]  ;;  %v2801_v12 = vor.u32 %v3344_v5, %v2800_v4  ;;  %v2805_v13 = vor.u32 %v3342_v3, %v2802_v7 }
  0x5f   : > { %591 = vmatpush.bf16.msra.mxu0 %v2585_v35  ;;  %v2777_v14 = vor.u32 %v3339_v9, %v2776_v8  ;;  %v3338_v15 = vld [vmem:[%s5478_s2 + $0x8c] sm:$0xf]  ;;  %v2784_v16 = vld [vmem:[%s5478_s2 + $0x88] sm:$0xf]  ;;  %v3340_v17 = vld [vmem:[%s5478_s2 + $0x94] sm:$0xf0]  ;;  %v2781_v18 = vor.u32 %v3337_v10, %v2778_v11 }
  0x60   : > { %620 = vmatpush.bf16.msra.mxu1 %v2589_v38  ;;  %649 = vmatpush.bf16.msra.mxu2 %v2593_v39  ;;  %v2786_v19 = vld [vmem:[%s5478_s2 + $0x98] sm:$0xf0]  ;;  %v2760_v20 = vld [vmem:[%s5478_s2 + $0x60] sm:$0xf]  ;;  %v3335_v21 = vld [vmem:[%s5478_s2 + $0x6c] sm:$0xf0]  ;;  %v2785_v25 = vor.u32 %v3340_v17, %v2784_v16 }
  0x61   : > { %678 = vmatpush.bf16.msra.mxu3 %v2597_v41  ;;  %v3333_v22 = vld [vmem:[%s5478_s2 + $0x64] sm:$0xf]  ;;  %v2762_v23 = vld [vmem:[%s5478_s2 + $0x70] sm:$0xf0]  ;;  %v3286_v24 = vld [vmem:[%s3936_s8 + $0x8] sm:$0xff]  ;;  %v2789_v26 = vor.u32 %v3338_v15, %v2786_v19  ;;  %v2761_v27 = vor.u32 %v3335_v21, %v2760_v20 }
  0x62   : > { %592 = vmatmul.bf16.vlgmr.msra.gmra.mxu0 %v3285_v40  ;;  %v3334_v28 = vld [vmem:[%s5478_s2 + $0x6c] sm:$0xf]  ;;  %v2768_v29 = vld [vmem:[%s5478_s2 + $0x68] sm:$0xf]  ;;  %v3336_v30 = vld [vmem:[%s5478_s2 + $0x74] sm:$0xf0]  ;;  %v2765_v31 = vor.u32 %v3333_v22, %v2762_v23 }
  0x63   : > { %937 = vmatpush.bf16.msrb.mxu0 %v2825_v42  ;;  %621 = vmatmul.bf16.vlgmr.msra.gmra.mxu1 %v3285_v40  ;;  %v2770_v32 = vld [vmem:[%s5478_s2 + $0x78] sm:$0xf0]  ;;  %v2744_v33 = vld [vmem:[%s5478_s2 + $0x40] sm:$0xf]  ;;  %v3331_v34 = vld [vmem:[%s5478_s2 + $0x4c] sm:$0xf0]  ;;  %v2769_v37 = vor.u32 %v3336_v30, %v2768_v29 }
  0x64   : > { %951 = vmatpush.bf16.msrb.mxu1 %v2829_v46  ;;  %650 = vmatmul.bf16.vlgmr.msra.gmra.mxu2 %v3285_v40  ;;  %v3329_v35 = vld [vmem:[%s5478_s2 + $0x44] sm:$0xf]  ;;  %v2746_v36 = vld [vmem:[%s5478_s2 + $0x50] sm:$0xf0]  ;;  %v2773_v38 = vor.u32 %v3334_v28, %v2770_v32  ;;  %v2745_v39 = vor.u32 %v3331_v34, %v2744_v33  ;;  %v3330_v41 = vld [vmem:[%s5478_s2 + $0x4c] sm:$0xf] }
  0x65   : > { %679 = vmatmul.bf16.vlgmr.msra.gmra.mxu3 %v3285_v40  ;;  %965 = vmatpush.bf16.msrb.mxu2 %v2833_v52  ;;  %v2749_v40 = vor.u32 %v3329_v35, %v2746_v36  ;;  %v2754_v42 = vld [vmem:[%s5478_s2 + $0x58] sm:$0xf0]  ;;  %v2728_v43 = vld [vmem:[%s5478_s2 + $0x20] sm:$0xf]  ;;  %v3327_v44 = vld [vmem:[%s5478_s2 + $0x2c] sm:$0xf0] }
  0x66   : > { %979 = vmatpush.bf16.msrb.mxu3 %v2837_v53  ;;  %v3325_v45 = vld [vmem:[%s5478_s2 + $0x24] sm:$0xf]  ;;  %v2757_v46 = vor.u32 %v3330_v41, %v2754_v42  ;;  %v2729_v47 = vor.u32 %v3327_v44, %v2728_v43  ;;  %v2730_v48 = vld [vmem:[%s5478_s2 + $0x30] sm:$0xf0]  ;;  %v2752_v49 = vld [vmem:[%s5478_s2 + $0x48] sm:$0xf] }
  0x67   : > { %938 = vmatpush.bf16.msrb.mxu0 %v2809_v54  ;;  %v3332_v50 = vld [vmem:[%s5478_s2 + $0x54] sm:$0xf0]  ;;  %v2733_v51 = vor.u32 %v3325_v45, %v2730_v48  ;;  %v3326_v53 = vld [vmem:[%s5478_s2 + $0x2c] sm:$0xf]  ;;  %v2738_v54 = vld [vmem:[%s5478_s2 + $0x38] sm:$0xf0] }
  0x68   : > { %952 = vmatpush.bf16.msrb.mxu1 %v2813_v58  ;;  %v2753_v52 = vor.u32 %v3332_v50, %v2752_v49  ;;  %v2712_v55 = vld [vmem:[%s5478_s2] sm:$0xf]  ;;  %v3323_v56 = vld [vmem:[%s5478_s2 + $0xc] sm:$0xf0]  ;;  %v3321_v57 = vld [vmem:[%s5478_s2 + $0x4] sm:$0xf]  ;;  %v2741_v61 = vor.u32 %v3326_v53, %v2738_v54 }
  0x69   : > { %966 = vmatpush.bf16.msrb.mxu2 %v2817_v0  ;;  %v2714_v58 = vld [vmem:[%s5478_s2 + $0x10] sm:$0xf0]  ;;  %v2736_v59 = vld [vmem:[%s5478_s2 + $0x28] sm:$0xf]  ;;  %v3328_v60 = vld [vmem:[%s5478_s2 + $0x34] sm:$0xf0]  ;;  %v2713_v62 = vor.u32 %v3323_v56, %v2712_v55 }
  0x6a   : > { %980 = vmatpush.bf16.msrb.mxu3 %v2821_v1  ;;  %v2737_v63 = vor.u32 %v3328_v60, %v2736_v59  ;;  %v2720_v0 = vld [vmem:[%s5478_s2 + $0x8] sm:$0xf]  ;;  %v3324_v1 = vld [vmem:[%s5478_s2 + $0x14] sm:$0xf0]  ;;  %v3322_v3 = vld [vmem:[%s5478_s2 + $0xc] sm:$0xf] }
  0x6b   : > { %939 = vmatpush.bf16.msrb.mxu0 %v2793_v2  ;;  %v2717_v2 = vor.u32 %v3321_v57, %v2714_v58  ;;  %v2722_v4 = vld [vmem:[%s5478_s2 + $0x18] sm:$0xf0]  ;;  %v2721_v5 = vor.u32 %v3324_v1, %v2720_v0  ;;  %v3287_v7 = vld [vmem:[%s3936_s8 + $0x10] sm:$0xff]  ;;  %v732_v9 = vld [vmem:[#allocation2] sm:$0xff] }
  0x6c   : > { %953 = vmatpush.bf16.msrb.mxu1 %v2797_v6  ;;  %v2725_v6 = vor.u32 %v3322_v3, %v2722_v4  ;;  %v3288_v8 = vld [vmem:[%s3936_s8 + $0x18] sm:$0xff]  ;;  %v733_v10 = vld [vmem:[#allocation2 + $0x8] sm:$0xff] }
  0x6d   : > { %967 = vmatpush.bf16.msrb.mxu2 %v2801_v12  ;;  %v744_v11 = vpack.c.bf16 %v733_v10, %v732_v9  ;;  %v2960_v9 = vld [vmem:[%s5478_s2 + $0xf0] sm:$0xf0]  ;;  %v2966_v10 = vld [vmem:[%s5478_s2 + $0xe8] sm:$0xf] }
  0x6e   : > { %981 = vmatpush.bf16.msrb.mxu3 %v2805_v13 }
  0x6f   : > { %940 = vmatpush.bf16.msrb.mxu0 %v2777_v14 }
  0x70   : > { %954 = vmatpush.bf16.msrb.mxu1 %v2781_v18  ;;  %v390_v18 = vld [vmem:[%s5479_s3] sm:$0xf] }
  0x71   : > { %968 = vmatpush.bf16.msrb.mxu2 %v2785_v25  ;;  %v4344_v19 = vperm.slane %v390_v18, 0  ;;  %v4348_v21 = vperm.slane %v390_v18, 1  ;;  %v4360_v28 = vperm.slane %v390_v18, 3 }
  0x72   : > { %982 = vmatpush.bf16.msrb.mxu3 %v2789_v26  ;;  %597 = vmatmul.bf16.gmra.mxu0 %v3286_v24 }
  0x73   : > { %941 = vmatpush.bf16.msrb.mxu0 %v2761_v27  ;;  %626 = vmatmul.bf16.gmra.mxu1 %v3286_v24  ;;  %v4358_v27 = vperm.slane %v390_v18, 2  ;;  %v3384_v18 = vld [vmem:[%s5478_s2 + $0xf4] sm:$0xf0] }
  0x74   : > { %955 = vmatpush.bf16.msrb.mxu1 %v2765_v31  ;;  %655 = vmatmul.bf16.gmra.mxu2 %v3286_v24 }
  0x75   : > { %684 = vmatmul.bf16.gmra.mxu3 %v3286_v24  ;;  %969 = vmatpush.bf16.msrb.mxu2 %v2769_v37 }
  0x76   : > { %983 = vmatpush.bf16.msrb.mxu3 %v2773_v38 }
  0x77   : > { %942 = vmatpush.bf16.msrb.mxu0 %v2745_v39 }
  0x78   : > { %956 = vmatpush.bf16.msrb.mxu1 %v2749_v40 }
  0x79   : > { %970 = vmatpush.bf16.msrb.mxu2 %v2753_v52 }
  0x7a   : > { %984 = vmatpush.bf16.msrb.mxu3 %v2757_v46 }
  0x7b   : > { %943 = vmatpush.bf16.msrb.mxu0 %v2729_v47 }
  0x7c   : > { %957 = vmatpush.bf16.msrb.mxu1 %v2733_v51 }
  0x7d   : > { %971 = vmatpush.bf16.msrb.mxu2 %v2737_v63 }
  0x7e   : > { %985 = vmatpush.bf16.msrb.mxu3 %v2741_v61 }
  0x7f   : > { %944 = vmatpush.bf16.msrb.mxu0 %v2713_v62 }
  0x80   : > { %958 = vmatpush.bf16.msrb.mxu1 %v2717_v2 }
  0x81   : > { %972 = vmatpush.bf16.msrb.mxu2 %v2721_v5  ;;  %v2958_v5 = vld [vmem:[%s5478_s2 + $0xe0] sm:$0xf] }
  0x82   : > { %986 = vmatpush.bf16.msrb.mxu3 %v2725_v6  ;;  %602 = vmatmul.bf16.gmra.mxu0 %v3287_v7  ;;  %v3383_v6 = vld [vmem:[%s5478_s2 + $0xec] sm:$0xf0] }
  0x83   : > { %631 = vmatmul.bf16.gmra.mxu1 %v3287_v7 }
  0x84   : > { %660 = vmatmul.bf16.gmra.mxu2 %v3287_v7 }
  0x85   : > { %689 = vmatmul.bf16.gmra.mxu3 %v3287_v7  ;;  %v2959_v7 = vor.u32 %v3383_v6, %v2958_v5 }
  0x87   : > { %1337 = vmatpush.bf16.msra.mxu0 %v2959_v7  ;;  %v2926_v7 = vld [vmem:[%s5478_s2 + $0xa0] sm:$0xf] }
  0x92   : > { %607 = vmatmul.bf16.gmra.mxu0 %v3288_v8 }
  0x93   : > { %636 = vmatmul.bf16.gmra.mxu1 %v3288_v8 }
  0x94   : > { %665 = vmatmul.bf16.gmra.mxu2 %v3288_v8 }
  0x95   : > { %694 = vmatmul.bf16.gmra.mxu3 %v3288_v8  ;;  %v3381_v8 = vld [vmem:[%s5478_s2 + $0xe4] sm:$0xf] }
  0xa2   : > { %945 = vmatmul.bf16.vlgmr.msrb.gmra.mxu0 %v744_v11 }
  0xa3   : > { %959 = vmatmul.bf16.vlgmr.msrb.gmra.mxu1 %v744_v11 }
  0xa4   : > { %973 = vmatmul.bf16.vlgmr.msrb.gmra.mxu2 %v744_v11 }
  0xa5   : > { %987 = vmatmul.bf16.vlgmr.msrb.gmra.mxu3 %v744_v11  ;;  %v2963_v11 = vor.u32 %v3381_v8, %v2960_v9  ;;  %v3375_v8 = vld [vmem:[%s5478_s2 + $0xac] sm:$0xf0]  ;;  %v3373_v9 = vld [vmem:[%s5478_s2 + $0xa4] sm:$0xf] }
  0xa7   : > { %1351 = vmatpush.bf16.msra.mxu1 %v2963_v11  ;;  %v2927_v11 = vor.u32 %v3375_v8, %v2926_v7 }
  0xdf   : > { %v4329_v12 = vpop.f32.mrf.mxu0 }
  0xe0   : > { %v4331_v13 = vpop.f32.mrf.mxu1 }
  0xe7   : > { %v4333_v14 = vpop.f32.mrf.mxu2  ;;  %v4337_v16 = vpop.f32.mrf.mxu0 }
  0xe8   : > { %v4335_v15 = vpop.f32.mrf.mxu3  ;;  %v4339_v17 = vpop.f32.mrf.mxu1 }
  0xef   : > { %v4346_v20 = vpop.f32.mrf.mxu2  ;;  %v598_v23 = vpop.f32.mrf.mxu0 }
  0xf0   : > { %v4350_v22 = vpop.f32.mrf.mxu3  ;;  %v4353_v24 = vadd.f32 %v598_v23, %v4344_v19  ;;  %v627_v25 = vpop.f32.mrf.mxu1  ;;  %v3382_v23 = vld [vmem:[%s5478_s2 + $0xec] sm:$0xf] }
  0xf1   : > { %v4356_v26 = vadd.f32 %v627_v25, %v4348_v21  ;;  %v2968_v25 = vld [vmem:[%s5478_s2 + $0xf8] sm:$0xf0] }
  0xf7   : > { %v656_v29 = vpop.f32.mrf.mxu2  ;;  %v600_v32 = vpop.f32.mrf.mxu0 }
  0xf8   : > { %v4363_v30 = vadd.f32 %v656_v29, %v4358_v27  ;;  %v685_v31 = vpop.f32.mrf.mxu3  ;;  %v4369_v34 = vadd.f32 %v600_v32, %v4344_v19  ;;  %v629_v35 = vpop.f32.mrf.mxu1  ;;  %v2967_v29 = vor.u32 %v3384_v18, %v2966_v10  ;;  %v2942_v32 = vld [vmem:[%s5478_s2 + $0xc0] sm:$0xf]  ;;  %v2928_v18 = vld [vmem:[%s5478_s2 + $0xb0] sm:$0xf0] }
  0xf9   : > { %v4366_v33 = vadd.f32 %v685_v31, %v4360_v28  ;;  %v4372_v36 = vadd.f32 %v629_v35, %v4348_v21  ;;  %v2971_v31 = vor.u32 %v3382_v23, %v2968_v25  ;;  %v3379_v35 = vld [vmem:[%s5478_s2 + $0xcc] sm:$0xf0]  ;;  %v2934_v23 = vld [vmem:[%s5478_s2 + $0xa8] sm:$0xf] }
  0xfa   : > { %1365 = vmatpush.bf16.msra.mxu2 %v2967_v29  ;;  %v2931_v29 = vor.u32 %v3373_v9, %v2928_v18  ;;  %v3365_v18 = vld [vmem:[%s5478_s2 + $0x64] sm:$0xf] }
  0xfb   : > { %1379 = vmatpush.bf16.msra.mxu3 %v2971_v31  ;;  %v3376_v31 = vld [vmem:[%s5478_s2 + $0xb4] sm:$0xf0] }
  0xff   : > { %v658_v37 = vpop.f32.mrf.mxu2  ;;  %v603_v40 = vpop.f32.mrf.mxu0 }
 0x100   : > { %v4375_v38 = vadd.f32 %v658_v37, %v4358_v27  ;;  %v687_v39 = vpop.f32.mrf.mxu3  ;;  %v4381_v42 = vadd.f32 %v603_v40, %v4344_v19  ;;  %v632_v43 = vpop.f32.mrf.mxu1  ;;  %v3377_v37 = vld [vmem:[%s5478_s2 + $0xc4] sm:$0xf] }
 0x101   : > { %v4378_v41 = vadd.f32 %v687_v39, %v4360_v28  ;;  %v4384_v44 = vadd.f32 %v632_v43, %v4348_v21  ;;  %v594_v39 = vadd.f32 %v4329_v12, %v4344_v19  ;;  %v2943_v43 = vor.u32 %v3379_v35, %v2942_v32  ;;  %v3374_v32 = vld [vmem:[%s5478_s2 + $0xac] sm:$0xf] }
 0x102   : > { %v2935_v35 = vor.u32 %v3376_v31, %v2934_v23  ;;  %v2896_v31 = vld [vmem:[%s5478_s2 + $0x70] sm:$0xf0] }
 0x103   : > { %1338 = vmatpush.bf16.msra.mxu0 %v2943_v43  ;;  %v3371_v43 = vld [vmem:[%s5478_s2 + $0x8c] sm:$0xf0] }
 0x107   : > { %v661_v45 = vpop.f32.mrf.mxu2  ;;  %v605_v48 = vpop.f32.mrf.mxu0  ;;  %1339 = vmatpush.bf16.msra.mxu0 %v2927_v11 }
 0x108   : > { %v4387_v46 = vadd.f32 %v661_v45, %v4358_v27  ;;  %v690_v47 = vpop.f32.mrf.mxu3  ;;  %v4393_v50 = vadd.f32 %v605_v48, %v4344_v19  ;;  %v634_v51 = vpop.f32.mrf.mxu1  ;;  %v2944_v45 = vld [vmem:[%s5478_s2 + $0xd0] sm:$0xf0]  ;;  %v3380_v48 = vld [vmem:[%s5478_s2 + $0xd4] sm:$0xf0] }
 0x109   : > { %v4390_v49 = vadd.f32 %v690_v47, %v4360_v28  ;;  %v4396_v52 = vadd.f32 %v634_v51, %v4348_v21  ;;  %v2950_v47 = vld [vmem:[%s5478_s2 + $0xc8] sm:$0xf]  ;;  %v623_v51 = vadd.f32 %v4331_v13, %v4348_v21 }
 0x10f   : > { %v663_v53 = vpop.f32.mrf.mxu2  ;;  %v608_v56 = vpop.f32.mrf.mxu0 }
 0x110   : > { %v4399_v54 = vadd.f32 %v663_v53, %v4358_v27  ;;  %v692_v55 = vpop.f32.mrf.mxu3  ;;  %v4405_v58 = vadd.f32 %v608_v56, %v4344_v19  ;;  %v637_v59 = vpop.f32.mrf.mxu1  ;;  %v2947_v56 = vor.u32 %v3377_v37, %v2944_v45  ;;  %v2936_v37 = vld [vmem:[%s5478_s2 + $0xb8] sm:$0xf0]  ;;  %v3369_v45 = vld [vmem:[%s5478_s2 + $0x84] sm:$0xf] }
 0x111   : > { %v4402_v57 = vadd.f32 %v692_v55, %v4360_v28  ;;  %v4408_v60 = vadd.f32 %v637_v59, %v4348_v21  ;;  %v2951_v59 = vor.u32 %v3380_v48, %v2950_v47  ;;  %v681_v47 = vadd.f32 %v4335_v15, %v4360_v28 }
 0x112   : > { %1352 = vmatpush.bf16.msra.mxu1 %v2947_v56  ;;  %v596_v48 = vadd.f32 %v4337_v16, %v4344_v19  ;;  %v3372_v56 = vld [vmem:[%s5478_s2 + $0x94] sm:$0xf0]  ;;  %v625_v15 = vadd.f32 %v4339_v17, %v4348_v21  ;;  %v2894_v17 = vld [vmem:[%s5478_s2 + $0x60] sm:$0xf] }
 0x113   : > { %1366 = vmatpush.bf16.msra.mxu2 %v2951_v59 }
 0x116   : > { %1353 = vmatpush.bf16.msra.mxu1 %v2931_v29 }
 0x117   : > { %v666_v61 = vpop.f32.mrf.mxu2  ;;  %v610_v0 = vpop.f32.mrf.mxu0  ;;  %1367 = vmatpush.bf16.msra.mxu2 %v2935_v35 }
 0x118   : > { %v4411_v62 = vadd.f32 %v666_v61, %v4358_v27  ;;  %v695_v63 = vpop.f32.mrf.mxu3  ;;  %v4417_v2 = vadd.f32 %v610_v0, %v4344_v19  ;;  %v639_v3 = vpop.f32.mrf.mxu1  ;;  %v3378_v61 = vld [vmem:[%s5478_s2 + $0xcc] sm:$0xf] }
 0x119   : > { %v4414_v1 = vadd.f32 %v695_v63, %v4360_v28  ;;  %v4420_v4 = vadd.f32 %v639_v3, %v4348_v21  ;;  %v2952_v63 = vld [vmem:[%s5478_s2 + $0xd8] sm:$0xf0]  ;;  %v3367_v21 = vld [vmem:[%s5478_s2 + $0x6c] sm:$0xf0] }
 0x11a   : > { %v2955_v5 = vor.u32 %v3378_v61, %v2952_v63  ;;  %v3370_v63 = vld [vmem:[%s5478_s2 + $0x8c] sm:$0xf]  ;;  %v2895_v11 = vor.u32 %v3367_v21, %v2894_v17 }
 0x11c   : > { %1380 = vmatpush.bf16.msra.mxu3 %v2955_v5 }
 0x11f   : > { %v668_v40 = vpop.f32.mrf.mxu2  ;;  %v946_v55 = vpop.f32.mrf.mxu0 }
 0x120   : > { %v4469_v12 = vadd.f32 %v668_v40, %v4358_v27  ;;  %v697_v53 = vpop.f32.mrf.mxu3  ;;  %v993_v3 = vadd.f32 %v946_v55, %v594_v39  ;;  %v960_v13 = vpop.f32.mrf.mxu1  ;;  %v2939_v39 = vor.u32 %v3374_v32, %v2936_v37  ;;  %v2910_v40 = vld [vmem:[%s5478_s2 + $0x80] sm:$0xf]  ;;  %v2918_v55 = vld [vmem:[%s5478_s2 + $0x88] sm:$0xf]  ;;  %v2899_v37 = vor.u32 %v3365_v18, %v2896_v31  ;;  %v3357_v18 = vld [vmem:[%s5478_s2 + $0x24] sm:$0xf] }
 0x121   : > { %v4478_v0 = vadd.f32 %v697_v53, %v4360_v28  ;;  %v994_v6 = vadd.f32 %v960_v13, %v623_v51  ;;  %v2911_v51 = vor.u32 %v3371_v43, %v2910_v40  ;;  %v2912_v53 = vld [vmem:[%s5478_s2 + $0x90] sm:$0xf0]  ;;  %v2919_v19 = vor.u32 %v3372_v56, %v2918_v55  ;;  %v3361_v56 = vld [vmem:[%s5478_s2 + $0x44] sm:$0xf] }
 0x122   : > { %v2838_v10 = vmul.f32 -1.442695, %v993_v3  ;;  %1381 = vmatpush.bf16.msra.mxu3 %v2939_v39  ;;  %v2915_v16 = vor.u32 %v3369_v45, %v2912_v53  ;;  %v2920_v3 = vld [vmem:[%s5478_s2 + $0x98] sm:$0xf0]  ;;  %v2902_v39 = vld [vmem:[%s5478_s2 + $0x68] sm:$0xf]  ;;  %v683_v40 = vadd.f32 %v4350_v22, %v4360_v28 }
 0x123   : > { %v2840_v25 = vmul.f32 -1.442695, %v994_v6  ;;  %1340 = vmatpush.bf16.msra.mxu0 %v2911_v51  ;;  %v2923_v7 = vor.u32 %v3370_v63, %v2920_v3  ;;  %1368 = vmatpush.bf16.msra.mxu2 %v2919_v19  ;;  %v3368_v45 = vld [vmem:[%s5478_s2 + $0x74] sm:$0xf0]  ;;  %v652_v51 = vadd.f32 %v4333_v14, %v4358_v27  ;;  %v2878_v28 = vld [vmem:[%s5478_s2 + $0x40] sm:$0xf] }
 0x124   : > { %3548 = vpow2.f32 %v2838_v10  ;;  %1354 = vmatpush.bf16.msra.mxu1 %v2915_v16  ;;  %v3363_v53 = vld [vmem:[%s5478_s2 + $0x4c] sm:$0xf0]  ;;  %v2880_v14 = vld [vmem:[%s5478_s2 + $0x50] sm:$0xf0]  ;;  %v2886_v19 = vld [vmem:[%s5478_s2 + $0x48] sm:$0xf] }
 0x125   : > { %3550 = vpow2.f32 %v2840_v25  ;;  %v2879_v16 = vor.u32 %v3363_v53, %v2878_v28  ;;  %v3364_v63 = vld [vmem:[%s5478_s2 + $0x54] sm:$0xf0]  ;;  %v3362_v3 = vld [vmem:[%s5478_s2 + $0x4c] sm:$0xf] }
 0x126   : > { %1382 = vmatpush.bf16.msra.mxu3 %v2923_v7  ;;  %v2888_v7 = vld [vmem:[%s5478_s2 + $0x58] sm:$0xf0] }
 0x127   : > { %v948_v61 = vpop.f32.mrf.mxu0  ;;  %1341 = vmatpush.bf16.msra.mxu0 %v2895_v11  ;;  %v974_v43 = vpop.f32.mrf.mxu2  ;;  %v3359_v11 = vld [vmem:[%s5478_s2 + $0x2c] sm:$0xf0] }
 0x128   : > { %v988_v59 = vpop.f32.mrf.mxu3  ;;  %v997_v5 = vadd.f32 %v948_v61, %v596_v48  ;;  %v962_v6 = vpop.f32.mrf.mxu1  ;;  %1355 = vmatpush.bf16.msra.mxu1 %v2899_v37  ;;  %v2904_v48 = vld [vmem:[%s5478_s2 + $0x78] sm:$0xf0]  ;;  %v2870_v37 = vld [vmem:[%s5478_s2 + $0x28] sm:$0xf] }
 0x129   : > { %v996_v13 = vadd.f32 %v988_v59, %v681_v47  ;;  %v998_v8 = vadd.f32 %v962_v6, %v625_v15  ;;  %v3366_v47 = vld [vmem:[%s5478_s2 + $0x6c] sm:$0xf]  ;;  %v995_v15 = vadd.f32 %v974_v43, %v652_v51  ;;  %v2903_v59 = vor.u32 %v3368_v45, %v2902_v39  ;;  %v3360_v39 = vld [vmem:[%s5478_s2 + $0x34] sm:$0xf0] }
 0x12a   : > { %v3549_v9 = vpop.eup %3548  ;;  %v2839_v29 = vmul.f32 -1.442695, %v997_v5  ;;  %v2907_v61 = vor.u32 %v3366_v47, %v2904_v48  ;;  %v2883_v6 = vor.u32 %v3361_v56, %v2880_v14  ;;  %v2871_v56 = vor.u32 %v3360_v39, %v2870_v37 }
 0x12b   : > { %v2842_v10 = vmul.f32 -1.442695, %v996_v13  ;;  %v3551_v23 = vpop.eup %3550  ;;  %v4543_v25 = vadd.f32 1.0, %v3549_v9  ;;  %v2841_v35 = vmul.f32 -1.442695, %v998_v8  ;;  %1369 = vmatpush.bf16.msra.mxu2 %v2903_v59  ;;  %v2887_v9 = vor.u32 %v3364_v63, %v2886_v19  ;;  %1342 = vmatpush.bf16.msra.mxu0 %v2879_v16 }
 0x12c   : > { %v4548_v32 = vadd.f32 1.0, %v3551_v23  ;;  %v2862_v8 = vld [vmem:[%s5478_s2 + $0x20] sm:$0xf]  ;;  %1383 = vmatpush.bf16.msra.mxu3 %v2907_v61  ;;  %1356 = vmatpush.bf16.msra.mxu1 %v2883_v6  ;;  %v654_v63 = vadd.f32 %v4346_v20, %v4358_v27  ;;  %v734_v27 = vld [vmem:[#allocation3 + $0x8] sm:$0xff] }
 0x12d   : > { %3552 = vpow2.f32 %v2842_v10  ;;  %v2891_v10 = vor.u32 %v3362_v3, %v2888_v7  ;;  %v2863_v31 = vor.u32 %v3359_v11, %v2862_v8  ;;  %v1018_v45 = vand.u32 2147483647, %v4543_v25 }
 0x12e   : > { %3554 = vrcp.f32 %v4543_v25  ;;  %v1020_v51 = vand.u32 2147483648, %v4543_v25  ;;  %v1058_v14 = vand.u32 2147483648, %v4548_v32  ;;  %v1056_v61 = vand.u32 2147483647, %v4548_v32 }
 0x12f   : > { %3556 = vrcp.f32 %v4548_v32  ;;  %1370 = vmatpush.bf16.msra.mxu2 %v2887_v9  ;;  %1343 = vmatpush.bf16.msra.mxu0 %v2863_v31  ;;  %v976_v16 = vpop.f32.mrf.mxu2  ;;  %vm1014_vm2 = vweird.f32 %v4543_v25  ;;  %vm1052_vm3 = vweird.f32 %v4548_v32  ;;  %vm1019_vm6 = vcmp.eq.f32.partialorder %v1018_v45, 8.507059e+37  ;;  %v3358_v31 = vld [vmem:[%s5478_s2 + $0x2c] sm:$0xf]  ;;  %v2848_v45 = vld [vmem:[%s5478_s2 + $0x10] sm:$0xf0] }
 0x130   : > { %3558 = vpow2.f32 %v2839_v29  ;;  %v990_v22 = vpop.f32.mrf.mxu3  ;;  %1384 = vmatpush.bf16.msra.mxu3 %v2891_v10  ;;  %v1059_v20 = vor.u32 1.1754944e-38, %v1058_v14  ;;  %vm1057_vm7 = vcmp.eq.f32.partialorder %v1056_v61, 8.507059e+37  ;;  %v2856_v61 = vld [vmem:[%s5478_s2 + $0x18] sm:$0xf0] }
 0x131   : > { %3560 = vpow2.f32 %v2841_v35  ;;  %v1000_v55 = vadd.f32 %v990_v22, %v683_v40  ;;  %v2864_v35 = vld [vmem:[%s5478_s2 + $0x30] sm:$0xf0] }
 0x133   : > { %v3553_v13 = vpop.eup %3552  ;;  %v2843_v5 = vmul.f32 -1.442695, %v1000_v55  ;;  %v2867_v55 = vor.u32 %v3357_v18, %v2864_v35  ;;  %1371 = vmatpush.bf16.msra.mxu2 %v2871_v56  ;;  %v2872_v35 = vld [vmem:[%s5478_s2 + $0x38] sm:$0xf0] }
 0x134   : > { %v4595_v17 = vpop.eup %3554  ;;  %v4597_v21 = vadd.f32 1.0, %v3553_v13 }
 0x135   : > { %v3557_v23 = vpop.eup %3556  ;;  %v1010_v29 = vmul.f32 %v4595_v17, %v4543_v25  ;;  %3562 = vpow2.f32 %v2843_v5  ;;  %vm1015_vm0 = vweird.f32 %v4595_v17  ;;  %1357 = vmatpush.bf16.msra.mxu1 %v2867_v55  ;;  %v1021_v5 = vor.u32 1.1754944e-38, %v1020_v51  ;;  %v2854_v51 = vld [vmem:[%s5478_s2 + $0x8] sm:$0xf] }
 0x136   : > { %v3559_v40 = vpop.eup %3558  ;;  %v1048_v43 = vmul.f32 %v3557_v23, %v4548_v32  ;;  %3564 = vtanh.f32 %v995_v15  ;;  %vm1053_vm1 = vweird.f32 %v3557_v23  ;;  %vm1016_vm4 = vmor %vm1014_vm2, %vm1015_vm0  ;;  %v999_v25 = vadd.f32 %v976_v16, %v654_v63 }
 0x137   : > { %v3561_v47 = vpop.eup %3560  ;;  %v1011_v48 = vsub.f32 1.0, %v1010_v29  ;;  %3566 = vrcp.f32 %v4597_v21  ;;  %v4620_v22 = vadd.f32 1.0, %v3559_v40  ;;  %vm1054_vm5 = vmor %vm1052_vm3, %vm1053_vm1  ;;  %v3355_v40 = vld [vmem:[%s5478_s2 + $0xc] sm:$0xf0]  ;;  %vm1092_vm2 = vweird.f32 %v4597_v21 }
 0x138   : > { %v1049_v28 = vsub.f32 1.0, %v1048_v43  ;;  %v4622_v53 = vadd.f32 1.0, %v3561_v47  ;;  %v3353_v43 = vld [vmem:[%s5478_s2 + $0x4] sm:$0xf] }
 0x139   : > { %v1012_v59 = vmul.f32 %v4595_v17, %v1011_v48  ;;  %3568 = vrcp.f32 %v4620_v22  ;;  %v1035_v63 = vand.u32 2147483648, %v4620_v22  ;;  %vm1029_vm10 = vweird.f32 %v4620_v22 }
 0x13a   : > { %v1050_v15 = vmul.f32 %v3557_v23, %v1049_v28  ;;  %3570 = vrcp.f32 %v4622_v53  ;;  %v1073_v48 = vand.u32 2147483648, %v4622_v53  ;;  %v3356_v28 = vld [vmem:[%s5478_s2 + $0x14] sm:$0xf0]  ;;  %vm1067_vm11 = vweird.f32 %v4622_v53 }
 0x13b   : > { %v3563_v19 = vpop.eup %3562  ;;  %v1013_v3 = vadd.f32 %v4595_v17, %v1012_v59  ;;  %v2875_v59 = vor.u32 %v3358_v31, %v2872_v35  ;;  %v1036_v31 = vor.u32 1.1754944e-38, %v1035_v63 }
 0x13c   : > { %v3565_v13 = vpop.eup %3564  ;;  %v1051_v6 = vadd.f32 %v3557_v23, %v1050_v15  ;;  %v4637_v7 = vadd.f32 1.0, %v3563_v19  ;;  %v3354_v15 = vld [vmem:[%s5478_s2 + $0xc] sm:$0xf]  ;;  %v1033_v19 = vand.u32 2147483647, %v4620_v22 }
 0x13d   : > { %v4639_v8 = vpop.eup %3566  ;;  %v1017_v9 = vsel %vm1016_vm4, %v4595_v17, %v1013_v3  ;;  %v2846_v17 = vld [vmem:[%s5478_s2] sm:$0xf]  ;;  %1385 = vmatpush.bf16.msra.mxu3 %v2875_v59  ;;  %v1096_v59 = vand.u32 2147483647, %v4597_v21 }
 0x13e   : > { %v1022_v10 = vsel %vm1019_vm6, %v1021_v5, %v1017_v9  ;;  %v1055_v32 = vsel %vm1054_vm5, %v3557_v23, %v1051_v6  ;;  %3572 = vrcp.f32 %v4637_v7  ;;  %v1088_v56 = vmul.f32 %v4639_v8, %v4597_v21 }
 0x13f   : > { %v3569_v11 = vpop.eup %3568  ;;  %v1060_v18 = vsel %vm1057_vm7, %v1059_v20, %v1055_v32  ;;  %v1119_v29 = vmul.f32 %v3565_v13, %v1022_v10  ;;  %3574 = vtanh.f32 %v999_v25  ;;  %v2847_v3 = vor.u32 %v3355_v40, %v2846_v17 }
 0x140   : > { %v3571_v37 = vpop.eup %3570  ;;  %v1117_v23 = vmul.f32 %v1060_v18, %v734_v27  ;;  %v1025_v39 = vmul.f32 %v3569_v11, %v4620_v22  ;;  %vm1030_vm8 = vweird.f32 %v3569_v11  ;;  %v1071_v5 = vand.u32 2147483647, %v4622_v53 }
 0x141   : > { %v1063_v47 = vmul.f32 %v3571_v37, %v4622_v53  ;;  %v2851_v6 = vor.u32 %v3353_v43, %v2848_v45  ;;  %vm1068_vm9 = vweird.f32 %v3571_v37  ;;  %1344 = vmatpush.bf16.msra.mxu0 %v2847_v3  ;;  %v2855_v9 = vor.u32 %v3356_v28, %v2854_v51  ;;  %vm1031_vm12 = vmor %vm1029_vm10, %vm1030_vm8 }
 0x142   : > { %v4671_v55 = vadd.f32 %v1119_v29, %v1117_v23  ;;  %v1026_v14 = vsub.f32 1.0, %v1025_v39  ;;  %v2859_v25 = vor.u32 %v3354_v15, %v2856_v61  ;;  %v1089_v10 = vsub.f32 1.0, %v1088_v56  ;;  %vm1069_vm13 = vmor %vm1067_vm11, %vm1068_vm9  ;;  %v735_v23 = vld [vmem:[#allocation3] sm:$0xff] }
 0x143   : > { %v1064_v16 = vsub.f32 1.0, %v1063_v47  ;;  %1358 = vmatpush.bf16.msra.mxu1 %v2851_v6  ;;  %1372 = vmatpush.bf16.msra.mxu2 %v2855_v9  ;;  %v1074_v17 = vor.u32 1.1754944e-38, %v1073_v48  ;;  %vm1034_vm14 = vcmp.eq.f32.partialorder %v1033_v19, 8.507059e+37  ;;  %vm1072_vm15 = vcmp.eq.f32.partialorder %v1071_v5, 8.507059e+37 }
 0x144   : > { %v1027_v13 = vmul.f32 %v3569_v11, %v1026_v14  ;;  %v3573_v20 = vpop.eup %3572  ;;  %1386 = vmatpush.bf16.msra.mxu3 %v2859_v25  ;;  %v1090_v45 = vmul.f32 %v4639_v8, %v1089_v10  ;;  %3576 = vtanh.f32 %v4671_v55  ;;  %vm1093_vm0 = vweird.f32 %v4639_v8  ;;  %v3094_v10 = vld [vmem:[%s5478_s2 + $0xf0] sm:$0xf0] }
 0x145   : > { %v1065_v27 = vmul.f32 %v3571_v37, %v1064_v16  ;;  %v1103_v18 = vmul.f32 %v3573_v20, %v4637_v7  ;;  %v3575_v29 = vpop.eup %3574  ;;  %vm1108_vm1 = vweird.f32 %v3573_v20  ;;  %v1113_v14 = vand.u32 2147483648, %v4637_v7  ;;  %vm1094_vm3 = vmor %vm1092_vm2, %vm1093_vm0 }
 0x146   : > { %v1028_v32 = vadd.f32 %v3569_v11, %v1027_v13  ;;  %vm1107_vm4 = vweird.f32 %v4637_v7  ;;  %v1111_v15 = vand.u32 2147483647, %v4637_v7  ;;  %vm1097_vm6 = vcmp.eq.f32.partialorder %v1096_v59, 8.507059e+37  ;;  %v3415_v7 = vld [vmem:[%s5478_s2 + $0xec] sm:$0xf0] }
 0x147   : > { %v1066_v35 = vadd.f32 %v3571_v37, %v1065_v27  ;;  %v1104_v40 = vsub.f32 1.0, %v1103_v18  ;;  %vm1109_vm5 = vmor %vm1107_vm4, %vm1108_vm1  ;;  %v1114_v3 = vor.u32 1.1754944e-38, %v1113_v14  ;;  %v3416_v18 = vld [vmem:[%s5478_s2 + $0xf4] sm:$0xf0]  ;;  %v3410_v14 = vld [vmem:[%s5478_s2 + $0xcc] sm:$0xf] }
 0x148   : > { %v1032_v39 = vsel %vm1031_vm12, %v3569_v11, %v1028_v32  ;;  %v1091_v11 = vadd.f32 %v4639_v8, %v1090_v45  ;;  %vm1112_vm7 = vcmp.eq.f32.partialorder %v1111_v15, 8.507059e+37  ;;  %v3100_v32 = vld [vmem:[%s5478_s2 + $0xe8] sm:$0xf]  ;;  %v3076_v45 = vld [vmem:[%s5478_s2 + $0xc0] sm:$0xf] }
 0x149   : > { %v1037_v22 = vsel %vm1034_vm14, %v1036_v31, %v1032_v39  ;;  %v1070_v43 = vsel %vm1069_vm13, %v3571_v37, %v1066_v35  ;;  %v1105_v51 = vmul.f32 %v3573_v20, %v1104_v40  ;;  %v1098_v37 = vand.u32 2147483648, %v4597_v21  ;;  %v3092_v21 = vld [vmem:[%s5478_s2 + $0xe0] sm:$0xf]  ;;  %v3102_v39 = vld [vmem:[%s5478_s2 + $0xf8] sm:$0xf0] }
 0x14a   : > { %v1075_v47 = vsel %vm1072_vm15, %v1074_v17, %v1070_v43  ;;  %v1120_v53 = vmul.f32 %v3575_v29, %v1037_v22  ;;  %v1095_v61 = vsel %vm1094_vm3, %v4639_v8, %v1091_v11  ;;  %v3577_v19 = vpop.eup %3576  ;;  %v3413_v8 = vld [vmem:[%s5478_s2 + $0xe4] sm:$0xf]  ;;  %v3101_v17 = vor.u32 %v3416_v18, %v3100_v32  ;;  %v3086_v15 = vld [vmem:[%s5478_s2 + $0xd8] sm:$0xf0] }
 0x14b   : > { %v1118_v28 = vmul.f32 %v1075_v47, %v735_v23  ;;  %v1106_v48 = vadd.f32 %v3573_v20, %v1105_v51  ;;  %v1099_v63 = vor.u32 1.1754944e-38, %v1098_v37  ;;  %v3097_v35 = vor.u32 %v3413_v8, %v3094_v10  ;;  %v3414_v23 = vld [vmem:[%s5478_s2 + $0xec] sm:$0xf]  ;;  %v3411_v47 = vld [vmem:[%s5478_s2 + $0xcc] sm:$0xf0] }
 0x14c   : > { %v3105_v43 = vor.u32 %v3414_v23, %v3102_v39  ;;  %1765 = vmatpush.bf16.msrb.mxu2 %v3101_v17  ;;  %v3412_v37 = vld [vmem:[%s5478_s2 + $0xd4] sm:$0xf0]  ;;  %v3070_v10 = vld [vmem:[%s5478_s2 + $0xb8] sm:$0xf0] }
 0x14d   : > { %v4692_v56 = vadd.f32 %v1120_v53, %v1118_v28  ;;  %v1110_v16 = vsel %vm1109_vm5, %v3573_v20, %v1106_v48  ;;  %v1100_v5 = vsel %vm1097_vm6, %v1099_v63, %v1095_v61  ;;  %v3093_v20 = vor.u32 %v3415_v7, %v3092_v21  ;;  %1751 = vmatpush.bf16.msrb.mxu1 %v3097_v35  ;;  %v3409_v53 = vld [vmem:[%s5478_s2 + $0xc4] sm:$0xf]  ;;  %v3078_v28 = vld [vmem:[%s5478_s2 + $0xd0] sm:$0xf0]  ;;  %v3084_v48 = vld [vmem:[%s5478_s2 + $0xc8] sm:$0xf] }
 0x14e   : > { %v1115_v6 = vsel %vm1112_vm7, %v1114_v3, %v1110_v16  ;;  %v1125_v27 = vmul.f32 %v3577_v19, %v1100_v5  ;;  %1779 = vmatpush.bf16.msrb.mxu3 %v3105_v43  ;;  %v3081_v11 = vor.u32 %v3409_v53, %v3078_v28  ;;  %v3085_v59 = vor.u32 %v3412_v37, %v3084_v48  ;;  %v3060_v16 = vld [vmem:[%s5478_s2 + $0xa0] sm:$0xf]  ;;  %v3407_v19 = vld [vmem:[%s5478_s2 + $0xac] sm:$0xf0]  ;;  %v3405_v63 = vld [vmem:[%s5478_s2 + $0xa4] sm:$0xf] }
 0x14f   : > { %3578 = vtanh.f32 %v4692_v56  ;;  %1737 = vmatpush.bf16.msrb.mxu0 %v3093_v20  ;;  %v3089_v61 = vor.u32 %v3410_v14, %v3086_v15  ;;  %v3062_v5 = vld [vmem:[%s5478_s2 + $0xb0] sm:$0xf0]  ;;  %v3406_v20 = vld [vmem:[%s5478_s2 + $0xac] sm:$0xf]  ;;  %v3403_v35 = vld [vmem:[%s5478_s2 + $0x8c] sm:$0xf0] }
 0x150   : > { %1766 = vmatpush.bf16.msrb.mxu2 %v3085_v59  ;;  %v3065_v7 = vor.u32 %v3405_v63, %v3062_v5  ;;  %v3046_v43 = vld [vmem:[%s5478_s2 + $0x90] sm:$0xf0]  ;;  %v3054_v28 = vld [vmem:[%s5478_s2 + $0x98] sm:$0xf0]  ;;  %v3399_v37 = vld [vmem:[%s5478_s2 + $0x6c] sm:$0xf0] }
 0x151   : > { %1752 = vmatpush.bf16.msrb.mxu1 %v3081_v11  ;;  %v3028_v11 = vld [vmem:[%s5478_s2 + $0x60] sm:$0xf]  ;;  %v3397_v14 = vld [vmem:[%s5478_s2 + $0x64] sm:$0xf]  ;;  %v3030_v15 = vld [vmem:[%s5478_s2 + $0x70] sm:$0xf0] }
 0x152   : > { %1780 = vmatpush.bf16.msrb.mxu3 %v3089_v61  ;;  %v3036_v61 = vld [vmem:[%s5478_s2 + $0x68] sm:$0xf]  ;;  %v3400_v5 = vld [vmem:[%s5478_s2 + $0x74] sm:$0xf0] }
 0x155   : > { %v3579_v13 = vpop.eup %3578  ;;  %1753 = vmatpush.bf16.msrb.mxu1 %v3065_v7 }
 0x156   : > { %v1126_v9 = vmul.f32 %v3579_v13, %v1115_v6  ;;  %v3061_v13 = vor.u32 %v3407_v19, %v3060_v16  ;;  %v3068_v6 = vld [vmem:[%s5478_s2 + $0xa8] sm:$0xf] }
 0x158   : > { %v1144_v25 = vpack.c.bf16 %v1126_v9, %v1125_v27  ;;  %v3408_v27 = vld [vmem:[%s5478_s2 + $0xb4] sm:$0xf0] }
 0x159   : > { %v3069_v8 = vor.u32 %v3408_v27, %v3068_v6  ;;  %v3398_v6 = vld [vmem:[%s5478_s2 + $0x6c] sm:$0xf]  ;;  %v3038_v27 = vld [vmem:[%s5478_s2 + $0x78] sm:$0xf0] }
 0x15a   : > { %1345 = vmatmul.bf16.vlgmr.msra.gmra.mxu0 %v1144_v25  ;;  %1359 = vmatmul.bf16.vlgmr.msra.gmra.mxu1 %v1144_v25 }
 0x15b   : > { %1373 = vmatmul.bf16.vlgmr.msra.gmra.mxu2 %v1144_v25  ;;  %1387 = vmatmul.bf16.vlgmr.msra.gmra.mxu3 %v1144_v25 }
 0x15c   : > { %1767 = vmatpush.bf16.msrb.mxu2 %v3069_v8 }
 0x1d7   : > { %v1346_v29 = vpop.f32.mrf.mxu0  ;;  %v1360_v31 = vpop.f32.mrf.mxu1 }
 0x1d8   : > { %v1393_v40 = vadd.f32 %v1346_v29, %v4353_v24  ;;  %v1394_v22 = vadd.f32 %v1360_v31, %v4356_v26  ;;  %v3077_v26 = vor.u32 %v3411_v47, %v3076_v45  ;;  %v3073_v29 = vor.u32 %v3406_v20, %v3070_v10  ;;  %v3044_v31 = vld [vmem:[%s5478_s2 + $0x80] sm:$0xf] }
 0x1d9   : > { %v3045_v39 = vor.u32 %v3403_v35, %v3044_v31  ;;  %v3041_v10 = vor.u32 %v3398_v6, %v3038_v27 }
 0x1da   : > { %v2972_v51 = vmul.f32 -1.442695, %v1393_v40  ;;  %v2974_v24 = vmul.f32 -1.442695, %v1394_v22  ;;  %1738 = vmatpush.bf16.msrb.mxu0 %v3077_v26  ;;  %1781 = vmatpush.bf16.msrb.mxu3 %v3073_v29  ;;  %v3402_v26 = vld [vmem:[%s5478_s2 + $0x8c] sm:$0xf] }
 0x1db   : > { %v3057_v63 = vor.u32 %v3402_v26, %v3054_v28 }
 0x1dc   : > { %3580 = vpow2.f32 %v2972_v51  ;;  %v3052_v51 = vld [vmem:[%s5478_s2 + $0x88] sm:$0xf] }
 0x1dd   : > { %3582 = vpow2.f32 %v2974_v24  ;;  %v3404_v24 = vld [vmem:[%s5478_s2 + $0x94] sm:$0xf0] }
 0x1de   : > { %v1388_v3 = vpop.f32.mrf.mxu3  ;;  %1739 = vmatpush.bf16.msrb.mxu0 %v3061_v13  ;;  %v1374_v47 = vpop.f32.mrf.mxu2  ;;  %v3053_v59 = vor.u32 %v3404_v24, %v3052_v51  ;;  %v3033_v13 = vor.u32 %v3397_v14, %v3030_v15  ;;  %1782 = vmatpush.bf16.msrb.mxu3 %v3057_v63  ;;  %v3393_v24 = vld [vmem:[%s5478_s2 + $0x44] sm:$0xf]  ;;  %v3022_v15 = vld [vmem:[%s5478_s2 + $0x58] sm:$0xf0]  ;;  %v3388_v63 = vld [vmem:[%s5478_s2 + $0x14] sm:$0xf0] }
 0x1df   : > { %v1396_v9 = vadd.f32 %v1388_v3, %v4366_v33  ;;  %v1348_v25 = vpop.f32.mrf.mxu0  ;;  %v1362_v21 = vpop.f32.mrf.mxu1  ;;  %v1395_v19 = vadd.f32 %v1374_v47, %v4363_v30  ;;  %v3029_v3 = vor.u32 %v3399_v37, %v3028_v11  ;;  %v3037_v30 = vor.u32 %v3400_v5, %v3036_v61  ;;  %v3395_v47 = vld [vmem:[%s5478_s2 + $0x4c] sm:$0xf0]  ;;  %v3014_v11 = vld [vmem:[%s5478_s2 + $0x50] sm:$0xf0]  ;;  %v3396_v37 = vld [vmem:[%s5478_s2 + $0x54] sm:$0xf0] }
 0x1e0   : > { %v1397_v32 = vadd.f32 %v1348_v25, %v4369_v34  ;;  %v1398_v18 = vadd.f32 %v1362_v21, %v4372_v36  ;;  %v3401_v34 = vld [vmem:[%s5478_s2 + $0x84] sm:$0xf]  ;;  %1768 = vmatpush.bf16.msrb.mxu2 %v3053_v59  ;;  %v2996_v5 = vld [vmem:[%s5478_s2 + $0x20] sm:$0xf] }
 0x1e1   : > { %v2976_v33 = vmul.f32 -1.442695, %v1396_v9  ;;  %v3049_v53 = vor.u32 %v3401_v34, %v3046_v43  ;;  %v3012_v43 = vld [vmem:[%s5478_s2 + $0x40] sm:$0xf] }
 0x1e2   : > { %v3581_v17 = vpop.eup %3580  ;;  %v2973_v23 = vmul.f32 -1.442695, %v1397_v32  ;;  %v2975_v22 = vmul.f32 -1.442695, %v1398_v18  ;;  %1740 = vmatpush.bf16.msrb.mxu0 %v3045_v39  ;;  %1783 = vmatpush.bf16.msrb.mxu3 %v3041_v10  ;;  %v2998_v10 = vld [vmem:[%s5478_s2 + $0x30] sm:$0xf0] }
 0x1e3   : > { %v3583_v36 = vpop.eup %3582  ;;  %v4789_v40 = vadd.f32 1.0, %v3581_v17  ;;  %3584 = vpow2.f32 %v2976_v33  ;;  %1754 = vmatpush.bf16.msrb.mxu1 %v3049_v53 }
 0x1e4   : > { %v4794_v45 = vadd.f32 1.0, %v3583_v36  ;;  %3586 = vpow2.f32 %v2973_v23  ;;  %1769 = vmatpush.bf16.msrb.mxu2 %v3037_v30  ;;  %v3391_v30 = vld [vmem:[%s5478_s2 + $0x2c] sm:$0xf0] }
 0x1e5   : > { %3588 = vrcp.f32 %v4789_v40  ;;  %v1418_v7 = vand.u32 2147483647, %v4789_v40  ;;  %vm1414_vm12 = vweird.f32 %v4789_v40 }
 0x1e6   : > { %3590 = vrcp.f32 %v4794_v45  ;;  %v1390_v48 = vpop.f32.mrf.mxu3  ;;  %1741 = vmatpush.bf16.msrb.mxu0 %v3029_v3  ;;  %v1458_v31 = vand.u32 2147483648, %v4794_v45  ;;  %v1456_v35 = vand.u32 2147483647, %v4794_v45  ;;  %v1376_v39 = vpop.f32.mrf.mxu2  ;;  %vm1452_vm11 = vweird.f32 %v4794_v45 }
 0x1e7   : > { %3592 = vpow2.f32 %v2975_v22  ;;  %v1400_v25 = vadd.f32 %v1390_v48, %v4378_v41  ;;  %v1420_v41 = vand.u32 2147483648, %v4789_v40  ;;  %1755 = vmatpush.bf16.msrb.mxu1 %v3033_v13  ;;  %vm4856_vm9 = vcmp.eq.f32.partialorder %v1418_v7, 8.507059e+37  ;;  %v3020_v48 = vld [vmem:[%s5478_s2 + $0x48] sm:$0xf]  ;;  %v3389_v7 = vld [vmem:[%s5478_s2 + $0x24] sm:$0xf] }
 0x1e8   : > { %3594 = vtanh.f32 %v1395_v19  ;;  %v1399_v28 = vadd.f32 %v1376_v39, %v4375_v38  ;;  %v1459_v14 = vor.u32 1.1754944e-38, %v1458_v31  ;;  %v3013_v38 = vor.u32 %v3395_v47, %v3012_v43  ;;  %v3392_v31 = vld [vmem:[%s5478_s2 + $0x34] sm:$0xf0]  ;;  %v2980_v22 = vld [vmem:[%s5478_s2] sm:$0xf] }
 0x1e9   : > { %v3585_v16 = vpop.eup %3584  ;;  %v2977_v34 = vmul.f32 -1.442695, %v1400_v25  ;;  %v1421_v51 = vor.u32 1.1754944e-38, %v1420_v41  ;;  %vm4906_vm15 = vcmp.eq.f32.partialorder %v1456_v35, 8.507059e+37  ;;  %v3021_v25 = vor.u32 %v3396_v37, %v3020_v48  ;;  %v3390_v35 = vld [vmem:[%s5478_s2 + $0x2c] sm:$0xf] }
 0x1ea   : > { %v3587_v9 = vpop.eup %3586  ;;  %v4839_v8 = vadd.f32 1.0, %v3585_v16  ;;  %1742 = vmatpush.bf16.msrb.mxu0 %v3013_v38  ;;  %v3387_v43 = vld [vmem:[%s5478_s2 + $0xc] sm:$0xf0]  ;;  %v3001_v37 = vor.u32 %v3389_v7, %v2998_v10  ;;  %v2990_v7 = vld [vmem:[%s5478_s2 + $0x18] sm:$0xf0] }
 0x1eb   : > { %v4836_v21 = vpop.eup %3588  ;;  %v4841_v20 = vadd.f32 1.0, %v3587_v9  ;;  %v3017_v9 = vor.u32 %v3393_v24, %v3014_v11  ;;  %1770 = vmatpush.bf16.msrb.mxu2 %v3021_v25 }
 0x1ec   : > { %v4843_v32 = vpop.eup %3590  ;;  %v1410_v18 = vmul.f32 %v4836_v21, %v4789_v40  ;;  %vm1415_vm8 = vweird.f32 %v4836_v21 }
 0x1ed   : > { %v3593_v29 = vpop.eup %3592  ;;  %v1448_v33 = vmul.f32 %v4843_v32, %v4794_v45  ;;  %3596 = vrcp.f32 %v4841_v20  ;;  %vm1453_vm10 = vweird.f32 %v4843_v32  ;;  %vm4889_vm13 = vmor %vm1414_vm12, %vm1415_vm8  ;;  %v3394_v45 = vld [vmem:[%s5478_s2 + $0x4c] sm:$0xf]  ;;  %v1433_v13 = vand.u32 2147483647, %v4841_v20  ;;  %1756 = vmatpush.bf16.msrb.mxu1 %v3017_v9 }
 0x1ee   : > { %v1411_v17 = vsub.f32 1.0, %v1410_v18  ;;  %v4853_v23 = vadd.f32 1.0, %v3593_v29  ;;  %3598 = vrcp.f32 %v4839_v8  ;;  %v3595_v61 = vpop.eup %3594  ;;  %vm4901_vm14 = vmor %vm1452_vm11, %vm1453_vm10  ;;  %vm1429_vm0 = vweird.f32 %v4841_v20 }
 0x1ef   : > { %v1449_v36 = vsub.f32 1.0, %v1448_v33  ;;  %v3004_v33 = vld [vmem:[%s5478_s2 + $0x28] sm:$0xf]  ;;  %v1435_v24 = vand.u32 2147483648, %v4841_v20  ;;  %vm1434_vm5 = vcmp.eq.f32.partialorder %v1433_v13, 8.507059e+37 }
 0x1f0   : > { %v1412_v53 = vmul.f32 %v4836_v21, %v1411_v17  ;;  %3600 = vrcp.f32 %v4853_v23  ;;  %v1473_v3 = vand.u32 2147483648, %v4853_v23  ;;  %v1471_v25 = vand.u32 2147483647, %v4853_v23 }
 0x1f1   : > { %v1450_v26 = vmul.f32 %v4843_v32, %v1449_v36  ;;  %3602 = vpow2.f32 %v2977_v34  ;;  %v3025_v34 = vor.u32 %v3394_v45, %v3022_v15  ;;  %v3006_v36 = vld [vmem:[%s5478_s2 + $0x38] sm:$0xf0]  ;;  %1757 = vmatpush.bf16.msrb.mxu1 %v3001_v37  ;;  %vm1467_vm3 = vweird.f32 %v4853_v23 }
 0x1f2   : > { %v1413_v59 = vadd.f32 %v4836_v21, %v1412_v53  ;;  %3604 = vtanh.f32 %v1399_v28  ;;  %v2982_v28 = vld [vmem:[%s5478_s2 + $0x10] sm:$0xf0]  ;;  %v3009_v15 = vor.u32 %v3390_v35, %v3006_v36  ;;  %v1436_v10 = vor.u32 1.1754944e-38, %v1435_v24 }
 0x1f3   : > { %v1451_v19 = vadd.f32 %v4843_v32, %v1450_v26  ;;  %v4915_v6 = vpop.eup %3596  ;;  %v3385_v26 = vld [vmem:[%s5478_s2 + $0x4] sm:$0xf]  ;;  %1784 = vmatpush.bf16.msrb.mxu3 %v3025_v34  ;;  %vm1472_vm7 = vcmp.eq.f32.partialorder %v1471_v25, 8.507059e+37 }
 0x1f4   : > { %v1417_v27 = vsel %vm4889_vm13, %v4836_v21, %v1413_v59  ;;  %v4929_v18 = vpop.eup %3598  ;;  %v1425_v29 = vmul.f32 %v4915_v6, %v4841_v20  ;;  %vm1430_vm1 = vweird.f32 %v4915_v6  ;;  %v2985_v16 = vor.u32 %v3385_v26, %v2982_v28 }
 0x1f5   : > { %v1422_v21 = vsel %vm4856_vm9, %v1421_v51, %v1417_v27  ;;  %v1455_v41 = vsel %vm4901_vm14, %v4843_v32, %v1451_v19  ;;  %v1488_v48 = vmul.f32 %v4929_v18, %v4839_v8  ;;  %v2988_v19 = vld [vmem:[%s5478_s2 + $0x8] sm:$0xf]  ;;  %vm1431_vm4 = vmor %vm1429_vm0, %vm1430_vm1  ;;  %vm1493_vm8 = vweird.f32 %v4929_v18 }
 0x1f6   : > { %v4947_v17 = vpop.eup %3600  ;;  %v1460_v32 = vsel %vm4906_vm15, %v1459_v14, %v1455_v41  ;;  %v1519_v39 = vmul.f32 %v3595_v61, %v1422_v21  ;;  %v1426_v53 = vsub.f32 1.0, %v1425_v29  ;;  %v3005_v14 = vor.u32 %v3392_v31, %v3004_v33  ;;  %1758 = vmatpush.bf16.msrb.mxu1 %v2985_v16 }
 0x1f7   : > { %v1517_v47 = vmul.f32 %v1460_v32, %v4671_v55  ;;  %v1463_v51 = vmul.f32 %v4947_v17, %v4853_v23  ;;  %v3603_v11 = vpop.eup %3602  ;;  %v2997_v55 = vor.u32 %v3391_v30, %v2996_v5  ;;  %v2981_v61 = vor.u32 %v3387_v43, %v2980_v22  ;;  %v3386_v30 = vld [vmem:[%s5478_s2 + $0xc] sm:$0xf]  ;;  %1785 = vmatpush.bf16.msrb.mxu3 %v3009_v15 }
 0x1f8   : > { %v1427_v38 = vmul.f32 %v4915_v6, %v1426_v53  ;;  %v4977_v45 = vadd.f32 1.0, %v3603_v11  ;;  %v3605_v5 = vpop.eup %3604  ;;  %vm1468_vm2 = vweird.f32 %v4947_v17  ;;  %1771 = vmatpush.bf16.msrb.mxu2 %v3005_v14  ;;  %v1489_v21 = vsub.f32 1.0, %v1488_v48 }
 0x1f9   : > { %v4973_v59 = vadd.f32 %v1519_v39, %v1517_v47  ;;  %v1464_v40 = vsub.f32 1.0, %v1463_v51  ;;  %1743 = vmatpush.bf16.msrb.mxu0 %v2997_v55  ;;  %v2989_v33 = vor.u32 %v3388_v63, %v2988_v19  ;;  %vm1469_vm6 = vmor %vm1467_vm3, %vm1468_vm2  ;;  %v1474_v31 = vor.u32 1.1754944e-38, %v1473_v3  ;;  %v3228_v19 = vld [vmem:[%s5478_s2 + $0xf0] sm:$0xf0]  ;;  %v3234_v63 = vld [vmem:[%s5478_s2 + $0xe8] sm:$0xf] }
 0x1fa   : > { %v1428_v9 = vadd.f32 %v4915_v6, %v1427_v38  ;;  %3606 = vrcp.f32 %v4977_v45  ;;  %v2993_v20 = vor.u32 %v3386_v30, %v2990_v7  ;;  %vm1492_vm9 = vweird.f32 %v4839_v8  ;;  %v3446_v7 = vld [vmem:[%s5478_s2 + $0xec] sm:$0xf] }
 0x1fb   : > { %v1465_v27 = vmul.f32 %v4947_v17, %v1464_v40  ;;  %3608 = vtanh.f32 %v4973_v59  ;;  %v1498_v43 = vand.u32 2147483648, %v4839_v8  ;;  %v1496_v47 = vand.u32 2147483647, %v4839_v8  ;;  %vm1494_vm11 = vmor %vm1492_vm9, %vm1493_vm8 }
 0x1fc   : > { %v1432_v41 = vsel %vm1431_vm4, %v4915_v6, %v1428_v9  ;;  %1772 = vmatpush.bf16.msrb.mxu2 %v2989_v33  ;;  %1786 = vmatpush.bf16.msrb.mxu3 %v2993_v20  ;;  %v1490_v6 = vmul.f32 %v4929_v18, %v1489_v21  ;;  %v1511_v51 = vand.u32 2147483647, %v4977_v45  ;;  %vm1507_vm12 = vweird.f32 %v4977_v45  ;;  %v3210_v33 = vld [vmem:[%s5478_s2 + $0xc0] sm:$0xf] }
 0x1fd   : > { %v1466_v29 = vadd.f32 %v4947_v17, %v1465_v27  ;;  %v1437_v35 = vsel %vm1434_vm5, %v1436_v10, %v1432_v41  ;;  %1744 = vmatpush.bf16.msrb.mxu0 %v2981_v61  ;;  %v1499_v11 = vor.u32 1.1754944e-38, %v1498_v43  ;;  %vm1497_vm14 = vcmp.eq.f32.partialorder %v1496_v47, 8.507059e+37  ;;  %v3445_v61 = vld [vmem:[%s5478_s2 + $0xe4] sm:$0xf]  ;;  %v3236_v10 = vld [vmem:[%s5478_s2 + $0xf8] sm:$0xf0] }
 0x1fe   : > { %v1520_v32 = vmul.f32 %v3605_v5, %v1437_v35  ;;  %v1491_v3 = vadd.f32 %v4929_v18, %v1490_v6  ;;  %vm1512_vm15 = vcmp.eq.f32.partialorder %v1511_v51, 8.507059e+37  ;;  %v3448_v5 = vld [vmem:[%s5478_s2 + $0xf4] sm:$0xf0]  ;;  %v3231_v25 = vor.u32 %v3445_v61, %v3228_v19  ;;  %v3441_v35 = vld [vmem:[%s5478_s2 + $0xc4] sm:$0xf] }
 0x1ff   : > { %v1470_v13 = vsel %vm1469_vm6, %v4947_v17, %v1466_v29  ;;  %v3235_v30 = vor.u32 %v3448_v5, %v3234_v63  ;;  %v3239_v29 = vor.u32 %v3446_v7, %v3236_v10  ;;  %v3444_v6 = vld [vmem:[%s5478_s2 + $0xd4] sm:$0xf0]  ;;  %v3439_v43 = vld [vmem:[%s5478_s2 + $0xac] sm:$0xf0]  ;;  %v3196_v51 = vld [vmem:[%s5478_s2 + $0xb0] sm:$0xf0] }
 0x200   : > { %v1475_v39 = vsel %vm1472_vm7, %v1474_v31, %v1470_v13  ;;  %v3607_v36 = vpop.eup %3606  ;;  %v1495_v24 = vsel %vm1494_vm11, %v4929_v18, %v1491_v3  ;;  %v3226_v18 = vld [vmem:[%s5478_s2 + $0xe0] sm:$0xf]  ;;  %2151 = vmatpush.bf16.msra.mxu1 %v3231_v25  ;;  %v3443_v31 = vld [vmem:[%s5478_s2 + $0xcc] sm:$0xf0]  ;;  %v3212_v13 = vld [vmem:[%s5478_s2 + $0xd0] sm:$0xf0] }
 0x201   : > { %v1518_v34 = vmul.f32 %v1475_v39, %v4692_v56  ;;  %v1503_v23 = vmul.f32 %v3607_v36, %v4977_v45  ;;  %v1513_v56 = vand.u32 2147483648, %v4977_v45  ;;  %vm1508_vm10 = vweird.f32 %v3607_v36  ;;  %v3609_v28 = vpop.eup %3608  ;;  %v3447_v45 = vld [vmem:[%s5478_s2 + $0xec] sm:$0xf0]  ;;  %2165 = vmatpush.bf16.msra.mxu2 %v3235_v30  ;;  %2179 = vmatpush.bf16.msra.mxu3 %v3239_v29  ;;  %v3218_v39 = vld [vmem:[%s5478_s2 + $0xc8] sm:$0xf] }
 0x202   : > { %vm1509_vm13 = vmor %vm1507_vm12, %vm1508_vm10  ;;  %v1500_v14 = vsel %vm1497_vm14, %v1499_v11, %v1495_v24  ;;  %v3227_v16 = vor.u32 %v3447_v45, %v3226_v18  ;;  %v3202_v24 = vld [vmem:[%s5478_s2 + $0xa8] sm:$0xf]  ;;  %v3178_v18 = vld [vmem:[%s5478_s2 + $0x80] sm:$0xf] }
 0x203   : > { %v5010_v22 = vadd.f32 %v1520_v32, %v1518_v34  ;;  %v1504_v17 = vsub.f32 1.0, %v1503_v23  ;;  %v1514_v48 = vor.u32 1.1754944e-38, %v1513_v56  ;;  %v1525_v40 = vmul.f32 %v3609_v28, %v1500_v14  ;;  %v3442_v34 = vld [vmem:[%s5478_s2 + $0xcc] sm:$0xf]  ;;  %v3220_v23 = vld [vmem:[%s5478_s2 + $0xd8] sm:$0xf0] }
 0x204   : > { %2137 = vmatpush.bf16.msra.mxu0 %v3227_v16  ;;  %v3215_v32 = vor.u32 %v3441_v35, %v3212_v13  ;;  %v3223_v3 = vor.u32 %v3442_v34, %v3220_v23  ;;  %v3437_v56 = vld [vmem:[%s5478_s2 + $0xa4] sm:$0xf]  ;;  %v3438_v14 = vld [vmem:[%s5478_s2 + $0xac] sm:$0xf]  ;;  %v3435_v45 = vld [vmem:[%s5478_s2 + $0x8c] sm:$0xf0] }
 0x205   : > { %3610 = vtanh.f32 %v5010_v22  ;;  %v1505_v53 = vmul.f32 %v3607_v36, %v1504_v17  ;;  %v3194_v17 = vld [vmem:[%s5478_s2 + $0xa0] sm:$0xf]  ;;  %v3179_v19 = vor.u32 %v3435_v45, %v3178_v18  ;;  %v3186_v7 = vld [vmem:[%s5478_s2 + $0x88] sm:$0xf]  ;;  %v3436_v10 = vld [vmem:[%s5478_s2 + $0x94] sm:$0xf0] }
 0x206   : > { %2152 = vmatpush.bf16.msra.mxu1 %v3215_v32  ;;  %2180 = vmatpush.bf16.msra.mxu3 %v3223_v3  ;;  %v3162_v29 = vld [vmem:[%s5478_s2 + $0x60] sm:$0xf]  ;;  %v3429_v35 = vld [vmem:[%s5478_s2 + $0x64] sm:$0xf]  ;;  %v3430_v23 = vld [vmem:[%s5478_s2 + $0x6c] sm:$0xf] }
 0x207   : > { %v1506_v26 = vadd.f32 %v3607_v36, %v1505_v53  ;;  %v3195_v53 = vor.u32 %v3439_v43, %v3194_v17  ;;  %v3172_v3 = vld [vmem:[%s5478_s2 + $0x78] sm:$0xf0]  ;;  %v3146_v18 = vld [vmem:[%s5478_s2 + $0x40] sm:$0xf]  ;;  %v3427_v45 = vld [vmem:[%s5478_s2 + $0x4c] sm:$0xf0] }
 0x209   : > { %v1510_v37 = vsel %vm1509_vm13, %v3607_v36, %v1506_v26  ;;  %v3219_v36 = vor.u32 %v3444_v6, %v3218_v39  ;;  %v3440_v26 = vld [vmem:[%s5478_s2 + $0xb4] sm:$0xf0] }
 0x20a   : > { %v1515_v8 = vsel %vm1512_vm15, %v1514_v48, %v1510_v37  ;;  %v3203_v37 = vor.u32 %v3440_v26, %v3202_v24  ;;  %v3175_v24 = vor.u32 %v3430_v23, %v3172_v3 }
 0x20b   : > { %v3611_v55 = vpop.eup %3610  ;;  %2166 = vmatpush.bf16.msra.mxu2 %v3219_v36  ;;  %v3432_v36 = vld [vmem:[%s5478_s2 + $0x74] sm:$0xf0] }
 0x20c   : > { %v1526_v38 = vmul.f32 %v3611_v55, %v1515_v8  ;;  %v3199_v55 = vor.u32 %v3437_v56, %v3196_v51  ;;  %v3204_v8 = vld [vmem:[%s5478_s2 + $0xb8] sm:$0xf0] }
 0x20e   : > { %v1544_v15 = vpack.c.bf16 %v1526_v38, %v1525_v40  ;;  %2153 = vmatpush.bf16.msra.mxu1 %v3199_v55 }
 0x20f   : > { %2167 = vmatpush.bf16.msra.mxu2 %v3203_v37 }
 0x210   : > { %1745 = vmatmul.bf16.vlgmr.msrb.gmra.mxu0 %v1544_v15  ;;  %1759 = vmatmul.bf16.vlgmr.msrb.gmra.mxu1 %v1544_v15 }
 0x211   : > { %1773 = vmatmul.bf16.vlgmr.msrb.gmra.mxu2 %v1544_v15  ;;  %1787 = vmatmul.bf16.vlgmr.msrb.gmra.mxu3 %v1544_v15  ;;  %v3207_v15 = vor.u32 %v3438_v14, %v3204_v8 }
 0x213   : > { %2181 = vmatpush.bf16.msra.mxu3 %v3207_v15 }
 0x28d   : > { %v1746_v27 = vpop.f32.mrf.mxu0  ;;  %v1760_v9 = vpop.f32.mrf.mxu1 }
 0x28e   : > { %v1793_v21 = vadd.f32 %v1746_v27, %v4381_v42  ;;  %v1794_v41 = vadd.f32 %v1760_v9, %v4384_v44  ;;  %v3211_v44 = vor.u32 %v3443_v31, %v3210_v33  ;;  %v3180_v27 = vld [vmem:[%s5478_s2 + $0x90] sm:$0xf0]  ;;  %v3431_v31 = vld [vmem:[%s5478_s2 + $0x6c] sm:$0xf0] }
 0x28f   : > { %v3163_v6 = vor.u32 %v3431_v31, %v3162_v29 }
 0x290   : > { %v3106_v20 = vmul.f32 -1.442695, %v1793_v21  ;;  %v3108_v42 = vmul.f32 -1.442695, %v1794_v41  ;;  %2138 = vmatpush.bf16.msra.mxu0 %v3211_v44  ;;  %v3434_v21 = vld [vmem:[%s5478_s2 + $0x8c] sm:$0xf] }
 0x291   : > { %v3188_v41 = vld [vmem:[%s5478_s2 + $0x98] sm:$0xf0]  ;;  %v3170_v44 = vld [vmem:[%s5478_s2 + $0x68] sm:$0xf] }
 0x292   : > { %3612 = vpow2.f32 %v3106_v20  ;;  %v3187_v20 = vor.u32 %v3436_v10, %v3186_v7  ;;  %v3191_v39 = vor.u32 %v3434_v21, %v3188_v41  ;;  %v3156_v10 = vld [vmem:[%s5478_s2 + $0x58] sm:$0xf0] }
 0x293   : > { %3614 = vpow2.f32 %v3108_v42  ;;  %v3164_v42 = vld [vmem:[%s5478_s2 + $0x70] sm:$0xf0]  ;;  %v3124_v41 = vld [vmem:[%s5478_s2 + $0x18] sm:$0xf0] }
 0x294   : > { %v1788_v47 = vpop.f32.mrf.mxu3  ;;  %2139 = vmatpush.bf16.msra.mxu0 %v3195_v53  ;;  %v1774_v25 = vpop.f32.mrf.mxu2  ;;  %v3167_v34 = vor.u32 %v3429_v35, %v3164_v42  ;;  %2168 = vmatpush.bf16.msra.mxu2 %v3187_v20  ;;  %v3130_v20 = vld [vmem:[%s5478_s2 + $0x20] sm:$0xf] }
 0x295   : > { %v1796_v28 = vadd.f32 %v1788_v47, %v4390_v49  ;;  %v1748_v11 = vpop.f32.mrf.mxu0  ;;  %v1762_v48 = vpop.f32.mrf.mxu1  ;;  %v1795_v32 = vadd.f32 %v1774_v25, %v4387_v46  ;;  %v3171_v46 = vor.u32 %v3432_v36, %v3170_v44  ;;  %2182 = vmatpush.bf16.msra.mxu3 %v3191_v39  ;;  %v3428_v25 = vld [vmem:[%s5478_s2 + $0x54] sm:$0xf0]  ;;  %v3423_v39 = vld [vmem:[%s5478_s2 + $0x2c] sm:$0xf0] }
 0x296   : > { %v1797_v40 = vadd.f32 %v1748_v11, %v4393_v50  ;;  %v1798_v38 = vadd.f32 %v1762_v48, %v4396_v52  ;;  %v3433_v50 = vld [vmem:[%s5478_s2 + $0x84] sm:$0xf] }
 0x297   : > { %v3110_v49 = vmul.f32 -1.442695, %v1796_v28  ;;  %v3183_v30 = vor.u32 %v3433_v50, %v3180_v27  ;;  %v3154_v27 = vld [vmem:[%s5478_s2 + $0x48] sm:$0xf] }
 0x298   : > { %v3613_v61 = vpop.eup %3612  ;;  %v3107_v16 = vmul.f32 -1.442695, %v1797_v40  ;;  %v3109_v5 = vmul.f32 -1.442695, %v1798_v38  ;;  %2140 = vmatpush.bf16.msra.mxu0 %v3179_v19  ;;  %2169 = vmatpush.bf16.msra.mxu2 %v3171_v46  ;;  %v3425_v19 = vld [vmem:[%s5478_s2 + $0x44] sm:$0xf] }
 0x299   : > { %v3615_v52 = vpop.eup %3614  ;;  %v5110_v63 = vadd.f32 1.0, %v3613_v61  ;;  %3616 = vpow2.f32 %v3110_v49  ;;  %2154 = vmatpush.bf16.msra.mxu1 %v3183_v30  ;;  %2183 = vmatpush.bf16.msra.mxu3 %v3175_v24  ;;  %v3424_v46 = vld [vmem:[%s5478_s2 + $0x34] sm:$0xf0] }
 0x29a   : > { %v5115_v9 = vadd.f32 1.0, %v3615_v52  ;;  %3618 = vpow2.f32 %v3107_v16 }
 0x29b   : > { %3620 = vrcp.f32 %v5110_v63  ;;  %v1818_v47 = vand.u32 2147483647, %v5110_v63  ;;  %vm1814_vm4 = vweird.f32 %v5110_v63 }
 0x29c   : > { %3622 = vrcp.f32 %v5115_v9  ;;  %v1790_v33 = vpop.f32.mrf.mxu3  ;;  %2141 = vmatpush.bf16.msra.mxu0 %v3163_v6  ;;  %v1858_v55 = vand.u32 2147483648, %v5115_v9  ;;  %v1856_v37 = vand.u32 2147483647, %v5115_v9  ;;  %v1776_v40 = vpop.f32.mrf.mxu2  ;;  %vm1852_vm3 = vweird.f32 %v5115_v9  ;;  %v3421_v6 = vld [vmem:[%s5478_s2 + $0x24] sm:$0xf] }
 0x29d   : > { %3624 = vpow2.f32 %v3109_v5  ;;  %v1800_v43 = vadd.f32 %v1790_v33, %v4402_v57  ;;  %v1820_v57 = vand.u32 2147483648, %v5110_v63  ;;  %2155 = vmatpush.bf16.msra.mxu1 %v3167_v34  ;;  %vm5177_vm1 = vcmp.eq.f32.partialorder %v1818_v47, 8.507059e+37  ;;  %v3148_v5 = vld [vmem:[%s5478_s2 + $0x50] sm:$0xf0] }
 0x29e   : > { %3626 = vtanh.f32 %v1795_v32  ;;  %v1799_v52 = vadd.f32 %v1776_v40, %v4399_v54  ;;  %v1859_v30 = vor.u32 1.1754944e-38, %v1858_v55  ;;  %v3147_v54 = vor.u32 %v3427_v45, %v3146_v18  ;;  %v3132_v34 = vld [vmem:[%s5478_s2 + $0x30] sm:$0xf0] }
 0x29f   : > { %v3617_v13 = vpop.eup %3616  ;;  %v3111_v38 = vmul.f32 -1.442695, %v1800_v43  ;;  %v1821_v16 = vor.u32 1.1754944e-38, %v1820_v57  ;;  %vm5227_vm7 = vcmp.eq.f32.partialorder %v1856_v37, 8.507059e+37  ;;  %v3155_v32 = vor.u32 %v3428_v25, %v3154_v27  ;;  %v3138_v43 = vld [vmem:[%s5478_s2 + $0x28] sm:$0xf] }
 0x2a0   : > { %v3619_v17 = vpop.eup %3618  ;;  %v5160_v53 = vadd.f32 1.0, %v3617_v13  ;;  %2142 = vmatpush.bf16.msra.mxu0 %v3147_v54  ;;  %v3151_v13 = vor.u32 %v3425_v19, %v3148_v5  ;;  %v3140_v57 = vld [vmem:[%s5478_s2 + $0x38] sm:$0xf0]  ;;  %v3135_v45 = vor.u32 %v3421_v6, %v3132_v34 }
 0x2a1   : > { %v5157_v56 = vpop.eup %3620  ;;  %v5162_v51 = vadd.f32 1.0, %v3619_v17  ;;  %2170 = vmatpush.bf16.msra.mxu2 %v3155_v32 }
 0x2a2   : > { %v5164_v26 = vpop.eup %3622  ;;  %v1810_v28 = vmul.f32 %v5157_v56, %v5110_v63  ;;  %vm1815_vm0 = vweird.f32 %v5157_v56  ;;  %2156 = vmatpush.bf16.msra.mxu1 %v3151_v13 }
 0x2a3   : > { %v3625_v11 = vpop.eup %3624  ;;  %v1848_v48 = vmul.f32 %v5164_v26, %v5115_v9  ;;  %3628 = vrcp.f32 %v5162_v51  ;;  %vm1853_vm2 = vweird.f32 %v5164_v26  ;;  %vm5210_vm5 = vmor %vm1814_vm4, %vm1815_vm0  ;;  %v3426_v9 = vld [vmem:[%s5478_s2 + $0x4c] sm:$0xf]  ;;  %v1833_v35 = vand.u32 2147483647, %v5162_v51 }
 0x2a4   : > { %v1811_v14 = vsub.f32 1.0, %v1810_v28  ;;  %v5174_v8 = vadd.f32 1.0, %v3625_v11  ;;  %3630 = vrcp.f32 %v5160_v53  ;;  %v3627_v21 = vpop.eup %3626  ;;  %vm5222_vm6 = vmor %vm1852_vm3, %vm1853_vm2  ;;  %vm1829_vm8 = vweird.f32 %v5162_v51  ;;  %v3114_v11 = vld [vmem:[%s5478_s2] sm:$0xf] }
 0x2a5   : > { %v1849_v15 = vsub.f32 1.0, %v1848_v48  ;;  %v3159_v28 = vor.u32 %v3426_v9, %v3156_v10  ;;  %v3419_v48 = vld [vmem:[%s5478_s2 + $0xc] sm:$0xf0]  ;;  %v1835_v40 = vand.u32 2147483648, %v5162_v51  ;;  %vm1834_vm13 = vcmp.eq.f32.partialorder %v1833_v35, 8.507059e+37 }
 0x2a6   : > { %v1812_v61 = vmul.f32 %v5157_v56, %v1811_v14  ;;  %3632 = vrcp.f32 %v5174_v8  ;;  %v1873_v31 = vand.u32 2147483648, %v5174_v8  ;;  %2157 = vmatpush.bf16.msra.mxu1 %v3135_v45  ;;  %v3115_v27 = vor.u32 %v3419_v48, %v3114_v11 }
 0x2a7   : > { %v1850_v50 = vmul.f32 %v5164_v26, %v1849_v15  ;;  %3634 = vpow2.f32 %v3111_v38  ;;  %v3417_v38 = vld [vmem:[%s5478_s2 + $0x4] sm:$0xf]  ;;  %v3116_v15 = vld [vmem:[%s5478_s2 + $0x10] sm:$0xf0]  ;;  %2184 = vmatpush.bf16.msra.mxu3 %v3159_v28  ;;  %v1871_v10 = vand.u32 2147483647, %v5174_v8  ;;  %vm1867_vm11 = vweird.f32 %v5174_v8 }
 0x2a8   : > { %v1813_v7 = vadd.f32 %v5157_v56, %v1812_v61  ;;  %3636 = vtanh.f32 %v1799_v52  ;;  %v3139_v61 = vor.u32 %v3424_v46, %v3138_v43  ;;  %v3119_v25 = vor.u32 %v3417_v38, %v3116_v15 }
 0x2a9   : > { %v1851_v29 = vadd.f32 %v5164_v26, %v1850_v50  ;;  %v5236_v42 = vpop.eup %3628  ;;  %v1874_v32 = vor.u32 1.1754944e-38, %v1873_v31  ;;  %vm1872_vm15 = vcmp.eq.f32.partialorder %v1871_v10, 8.507059e+37  ;;  %v1898_v46 = vand.u32 2147483648, %v5160_v53 }
 0x2aa   : > { %v1817_v44 = vsel %vm5210_vm5, %v5157_v56, %v1813_v7  ;;  %v5250_v36 = vpop.eup %3630  ;;  %v1825_v17 = vmul.f32 %v5236_v42, %v5162_v51  ;;  %v3422_v56 = vld [vmem:[%s5478_s2 + $0x2c] sm:$0xf]  ;;  %vm1830_vm9 = vweird.f32 %v5236_v42  ;;  %v3420_v7 = vld [vmem:[%s5478_s2 + $0x14] sm:$0xf0]  ;;  %2171 = vmatpush.bf16.msra.mxu2 %v3139_v61  ;;  %2158 = vmatpush.bf16.msra.mxu1 %v3119_v25 }
 0x2ab   : > { %v1822_v23 = vsel %vm5177_vm1, %v1821_v16, %v1817_v44  ;;  %v1855_v3 = vsel %vm5222_vm6, %v5164_v26, %v1851_v29  ;;  %v1888_v18 = vmul.f32 %v5250_v36, %v5160_v53  ;;  %v3143_v5 = vor.u32 %v3422_v56, %v3140_v57  ;;  %vm1831_vm12 = vmor %vm1829_vm8, %vm1830_vm9 }
 0x2ac   : > { %v5268_v47 = vpop.eup %3632  ;;  %v1860_v24 = vsel %vm5227_vm7, %v1859_v30, %v1855_v3  ;;  %v1919_v26 = vmul.f32 %v3627_v21, %v1822_v23  ;;  %v1826_v37 = vsub.f32 1.0, %v1825_v17  ;;  %v3122_v30 = vld [vmem:[%s5478_s2 + $0x8] sm:$0xf]  ;;  %v3418_v21 = vld [vmem:[%s5478_s2 + $0xc] sm:$0xf]  ;;  %v1836_v29 = vor.u32 1.1754944e-38, %v1835_v40 }
 0x2ad   : > { %v1917_v55 = vmul.f32 %v1860_v24, %v4973_v59  ;;  %v1863_v14 = vmul.f32 %v5268_v47, %v5174_v8  ;;  %v3635_v49 = vpop.eup %3634  ;;  %v3131_v59 = vor.u32 %v3423_v39, %v3130_v20  ;;  %vm1868_vm10 = vweird.f32 %v5268_v47  ;;  %2185 = vmatpush.bf16.msra.mxu3 %v3143_v5 }
 0x2ae   : > { %v1827_v50 = vmul.f32 %v5236_v42, %v1826_v37  ;;  %v5298_v52 = vadd.f32 1.0, %v3635_v49  ;;  %v3637_v63 = vpop.eup %3636  ;;  %v1889_v33 = vsub.f32 1.0, %v1888_v18  ;;  %v3123_v13 = vor.u32 %v3420_v7, %v3122_v30  ;;  %vm1869_vm14 = vmor %vm1867_vm11, %vm1868_vm10 }
 0x2af   : > { %v5294_v16 = vadd.f32 %v1919_v26, %v1917_v55  ;;  %v1864_v19 = vsub.f32 1.0, %v1863_v14  ;;  %2143 = vmatpush.bf16.msra.mxu0 %v3131_v59  ;;  %v3127_v51 = vor.u32 %v3418_v21, %v3124_v41  ;;  %vm1893_vm0 = vweird.f32 %v5250_v36 }
 0x2b0   : > { %v1828_v9 = vadd.f32 %v5236_v42, %v1827_v50  ;;  %3638 = vrcp.f32 %v5298_v52  ;;  %2172 = vmatpush.bf16.msra.mxu2 %v3123_v13  ;;  %vm1892_vm1 = vweird.f32 %v5160_v53  ;;  %v1896_v56 = vand.u32 2147483647, %v5160_v53 }
 0x2b1   : > { %v1865_v54 = vmul.f32 %v5268_v47, %v1864_v19  ;;  %2186 = vmatpush.bf16.msra.mxu3 %v3127_v51  ;;  %3640 = vtanh.f32 %v5294_v16  ;;  %v1911_v24 = vand.u32 2147483647, %v5298_v52  ;;  %vm1894_vm3 = vmor %vm1892_vm1, %vm1893_vm0  ;;  %vm1907_vm4 = vweird.f32 %v5298_v52 }
 0x2b2   : > { %v1832_v20 = vsel %vm1831_vm12, %v5236_v42, %v1828_v9  ;;  %v1890_v42 = vmul.f32 %v5250_v36, %v1889_v33  ;;  %v1899_v11 = vor.u32 1.1754944e-38, %v1898_v46  ;;  %vm1897_vm6 = vcmp.eq.f32.partialorder %v1896_v56, 8.507059e+37 }
 0x2b3   : > { %v1866_v44 = vadd.f32 %v5268_v47, %v1865_v54  ;;  %v1837_v39 = vsel %vm1834_vm13, %v1836_v29, %v1832_v20  ;;  %2144 = vmatpush.bf16.msra.mxu0 %v3115_v27  ;;  %vm1912_vm7 = vcmp.eq.f32.partialorder %v1911_v24, 8.507059e+37 }
 0x2b4   : > { %v1920_v6 = vmul.f32 %v3637_v63, %v1837_v39  ;;  %v1891_v31 = vadd.f32 %v5250_v36, %v1890_v42 }
 0x2b5   : > { %v1870_v35 = vsel %vm1869_vm14, %v5268_v47, %v1866_v44 }
 0x2b6   : > { %v1875_v34 = vsel %vm1872_vm15, %v1874_v32, %v1870_v35  ;;  %v3639_v3 = vpop.eup %3638  ;;  %v1895_v26 = vsel %vm1894_vm3, %v5250_v36, %v1891_v31 }
 0x2b7   : > { %v1918_v23 = vmul.f32 %v1875_v34, %v5010_v22  ;;  %v1903_v8 = vmul.f32 %v3639_v3, %v5298_v52  ;;  %v1913_v22 = vand.u32 2147483648, %v5298_v52  ;;  %vm1908_vm2 = vweird.f32 %v3639_v3  ;;  %v3641_v57 = vpop.eup %3640 }
 0x2b8   : > { %vm1909_vm5 = vmor %vm1907_vm4, %vm1908_vm2  ;;  %v1900_v14 = vsel %vm1897_vm6, %v1899_v11, %v1895_v26 }
 0x2b9   : > { %v5331_v17 = vadd.f32 %v1920_v6, %v1918_v23  ;;  %v1904_v43 = vsub.f32 1.0, %v1903_v8  ;;  %v1914_v48 = vor.u32 1.1754944e-38, %v1913_v22  ;;  %v1925_v40 = vmul.f32 %v3641_v57, %v1900_v14 }
 0x2bb   : > { %3642 = vtanh.f32 %v5331_v17  ;;  %v1905_v47 = vmul.f32 %v3639_v3, %v1904_v43 }
 0x2bd   : > { %v1906_v28 = vadd.f32 %v3639_v3, %v1905_v47 }
 0x2bf   : > { %v1910_v37 = vsel %vm1909_vm5, %v3639_v3, %v1906_v28 }
 0x2c0   : > { %v1915_v53 = vsel %vm1912_vm7, %v1914_v48, %v1910_v37 }
 0x2c1   : > { %v3643_v55 = vpop.eup %3642 }
 0x2c2   : > { %v1926_v38 = vmul.f32 %v3643_v55, %v1915_v53 }
 0x2c4   : > { %v1944_v15 = vpack.c.bf16 %v1926_v38, %v1925_v40 }
 0x2c6   : > { %2145 = vmatmul.bf16.vlgmr.msra.gmra.mxu0 %v1944_v15  ;;  %2159 = vmatmul.bf16.vlgmr.msra.gmra.mxu1 %v1944_v15 }
 0x2c7   : > { %2173 = vmatmul.bf16.vlgmr.msra.gmra.mxu2 %v1944_v15  ;;  %2187 = vmatmul.bf16.vlgmr.msra.gmra.mxu3 %v1944_v15 }
 0x343   : > { %v2146_v36 = vpop.f32.mrf.mxu0  ;;  %v2160_v49 = vpop.f32.mrf.mxu1 }
 0x344   : > { %v2193_v18 = vadd.f32 %v2146_v36, %v4405_v58  ;;  %v2194_v59 = vadd.f32 %v2160_v49, %v4408_v60 }
 0x346   : > { %v3240_v45 = vmul.f32 -1.442695, %v2193_v18  ;;  %v3242_v61 = vmul.f32 -1.442695, %v2194_v59 }
 0x348   : > { %3644 = vpow2.f32 %v3240_v45 }
 0x349   : > { %3646 = vpow2.f32 %v3242_v61 }
 0x34a   : > { %v2188_v19 = vpop.f32.mrf.mxu3  ;;  %v2174_v10 = vpop.f32.mrf.mxu2 }
 0x34b   : > { %v2196_v50 = vadd.f32 %v2188_v19, %v4414_v1  ;;  %v2148_v52 = vpop.f32.mrf.mxu0  ;;  %v2162_v5 = vpop.f32.mrf.mxu1  ;;  %v2195_v41 = vadd.f32 %v2174_v10, %v4411_v62 }
 0x34c   : > { %v2197_v27 = vadd.f32 %v2148_v52, %v4417_v2  ;;  %v2198_v25 = vadd.f32 %v2162_v5, %v4420_v4 }
 0x34d   : > { %v3244_v30 = vmul.f32 -1.442695, %v2196_v50 }
 0x34e   : > { %v3645_v7 = vpop.eup %3644  ;;  %v3241_v63 = vmul.f32 -1.442695, %v2197_v27  ;;  %v3243_v60 = vmul.f32 -1.442695, %v2198_v25 }
 0x34f   : > { %v3647_v54 = vpop.eup %3646  ;;  %v2207_v58 = vadd.f32 1.0, %v3645_v7  ;;  %3648 = vpow2.f32 %v3244_v30 }
 0x350   : > { %v2245_v9 = vadd.f32 1.0, %v3647_v54  ;;  %3650 = vpow2.f32 %v3241_v63 }
 0x351   : > { %3652 = vrcp.f32 %v2207_v58  ;;  %v2218_v42 = vand.u32 2147483647, %v2207_v58  ;;  %vm2214_vm10 = vweird.f32 %v2207_v58 }
 0x352   : > { %3654 = vrcp.f32 %v2245_v9  ;;  %v2190_v1 = vpop.f32.mrf.mxu3  ;;  %v2258_v34 = vand.u32 2147483648, %v2245_v9  ;;  %v2176_v23 = vpop.f32.mrf.mxu2  ;;  %v2256_v8 = vand.u32 2147483647, %v2245_v9  ;;  %vm2252_vm11 = vweird.f32 %v2245_v9 }
 0x353   : > { %3656 = vpow2.f32 %v3243_v60  ;;  %v2200_v4 = vadd.f32 %v2190_v1, %v4478_v0  ;;  %v2220_v0 = vand.u32 2147483648, %v2207_v58  ;;  %v2199_v22 = vadd.f32 %v2176_v23, %v4469_v12 }
 0x354   : > { %v2259_v57 = vor.u32 1.1754944e-38, %v2258_v34  ;;  %vm2219_vm14 = vcmp.eq.f32.partialorder %v2218_v42, 8.507059e+37  ;;  %vm2257_vm15 = vcmp.eq.f32.partialorder %v2256_v8, 8.507059e+37 }
 0x355   : > { %v3649_v21 = vpop.eup %3648  ;;  %v3245_v62 = vmul.f32 -1.442695, %v2200_v4  ;;  %v2221_v47 = vor.u32 1.1754944e-38, %v2220_v0 }
 0x356   : > { %v3651_v2 = vpop.eup %3650  ;;  %v5351_v29 = vadd.f32 1.0, %v3649_v21 }
 0x357   : > { %v3653_v33 = vpop.eup %3652  ;;  %v5354_v20 = vadd.f32 1.0, %v3651_v2 }
 0x358   : > { %v3655_v44 = vpop.eup %3654  ;;  %v2210_v13 = vmul.f32 %v3653_v33, %v2207_v58  ;;  %3658 = vrcp.f32 %v5351_v29  ;;  %vm2215_vm8 = vweird.f32 %v3653_v33  ;;  %v2298_v38 = vand.u32 2147483648, %v5351_v29 }
 0x359   : > { %v3657_v32 = vpop.eup %3656  ;;  %v2248_v39 = vmul.f32 %v3655_v44, %v2245_v9  ;;  %3660 = vtanh.f32 %v2195_v41  ;;  %vm2253_vm9 = vweird.f32 %v3655_v44  ;;  %vm2216_vm12 = vmor %vm2214_vm10, %vm2215_vm8  ;;  %vm2229_vm0 = vweird.f32 %v5354_v20 }
 0x35a   : > { %v2211_v51 = vsub.f32 1.0, %v2210_v13  ;;  %3662 = vrcp.f32 %v5354_v20  ;;  %v5358_v35 = vadd.f32 1.0, %v3657_v32  ;;  %vm2254_vm13 = vmor %vm2252_vm11, %vm2253_vm9  ;;  %v2233_v61 = vand.u32 2147483647, %v5354_v20 }
 0x35b   : > { %v2249_v6 = vsub.f32 1.0, %v2248_v39  ;;  %v2235_v19 = vand.u32 2147483648, %v5354_v20  ;;  %vm2292_vm4 = vweird.f32 %v5351_v29  ;;  %v2296_v54 = vand.u32 2147483647, %v5351_v29 }
 0x35c   : > { %v2212_v3 = vmul.f32 %v3653_v33, %v2211_v51  ;;  %3664 = vrcp.f32 %v5358_v35  ;;  %v2273_v45 = vand.u32 2147483648, %v5358_v35  ;;  %v2271_v27 = vand.u32 2147483647, %v5358_v35 }
 0x35d   : > { %v2250_v31 = vmul.f32 %v3655_v44, %v2249_v6  ;;  %3666 = vpow2.f32 %v3245_v62  ;;  %v2236_v58 = vor.u32 1.1754944e-38, %v2235_v19  ;;  %vm2267_vm7 = vweird.f32 %v5358_v35 }
 0x35e   : > { %v5361_v43 = vpop.eup %3658  ;;  %v2213_v46 = vadd.f32 %v3653_v33, %v2212_v3  ;;  %3668 = vtanh.f32 %v2199_v22  ;;  %vm2234_vm8 = vcmp.eq.f32.partialorder %v2233_v61, 8.507059e+37  ;;  %v2274_v21 = vor.u32 1.1754944e-38, %v2273_v45 }
 0x35f   : > { %v3661_v56 = vpop.eup %3660  ;;  %v2251_v24 = vadd.f32 %v3655_v44, %v2250_v31  ;;  %v2288_v26 = vmul.f32 %v5361_v43, %v5351_v29  ;;  %vm2293_vm2 = vweird.f32 %v5361_v43  ;;  %v2299_v2 = vor.u32 1.1754944e-38, %v2298_v38 }
 0x360   : > { %v3663_v28 = vpop.eup %3662  ;;  %v2217_v11 = vsel %vm2216_vm12, %v3653_v33, %v2213_v46  ;;  %vm5382_vm6 = vmor %vm2292_vm4, %vm2293_vm2  ;;  %vm2272_vm10 = vcmp.eq.f32.partialorder %v2271_v27, 8.507059e+37  ;;  %vm2297_vm11 = vcmp.eq.f32.partialorder %v2296_v54, 8.507059e+37 }
 0x361   : > { %v2222_v48 = vsel %vm2219_vm14, %v2221_v47, %v2217_v11  ;;  %v2255_v55 = vsel %vm2254_vm13, %v3655_v44, %v2251_v24  ;;  %v2289_v37 = vsub.f32 1.0, %v2288_v26  ;;  %v2225_v12 = vmul.f32 %v3663_v28, %v5354_v20 }
 0x362   : > { %v3665_v14 = vpop.eup %3664  ;;  %v2260_v53 = vsel %vm2257_vm15, %v2259_v57, %v2255_v55  ;;  %v2319_v40 = vmul.f32 %v3661_v56, %v2222_v48  ;;  %vm2230_vm1 = vweird.f32 %v3663_v28 }
 0x363   : > { %v2317_v15 = vmul.f32 %v2260_v53, %v5294_v16  ;;  %v2290_v36 = vmul.f32 %v5361_v43, %v2289_v37  ;;  %v2226_v49 = vsub.f32 1.0, %v2225_v12  ;;  %v2263_v18 = vmul.f32 %v3665_v14, %v5358_v35  ;;  %v3667_v59 = vpop.eup %3666  ;;  %vm2231_vm5 = vmor %vm2229_vm0, %vm2230_vm1 }
 0x364   : > { %v2286_v25 = vadd.f32 1.0, %v3667_v59  ;;  %vm2268_vm3 = vweird.f32 %v3665_v14  ;;  %v3669_v63 = vpop.eup %3668 }
 0x365   : > { %v2321_v50 = vadd.f32 %v2319_v40, %v2317_v15  ;;  %v2264_v52 = vsub.f32 1.0, %v2263_v18  ;;  %v2227_v5 = vmul.f32 %v3663_v28, %v2226_v49  ;;  %v2291_v16 = vadd.f32 %v5361_v43, %v2290_v36  ;;  %vm2269_vm9 = vmor %vm2267_vm7, %vm2268_vm3 }
 0x366   : > { %v2313_v6 = vand.u32 2147483648, %v2286_v25  ;;  %v2311_v42 = vand.u32 2147483647, %v2286_v25  ;;  %vm2307_vm13 = vweird.f32 %v2286_v25 }
 0x367   : > { %3670 = vtanh.f32 %v2321_v50  ;;  %2329 = vst [vmem:[#allocation3 + $0x8] sm:$0xff] %v2321_v50  ;;  %v2265_v30 = vmul.f32 %v3665_v14, %v2264_v52  ;;  %v2228_v7 = vadd.f32 %v3663_v28, %v2227_v5  ;;  %v2295_v1 = vsel %vm5382_vm6, %v5361_v43, %v2291_v16 }
 0x368   : > { %3672 = vrcp.f32 %v2286_v25  ;;  %v2300_v44 = vsel %vm2297_vm11, %v2299_v2, %v2295_v1  ;;  %v2314_v23 = vor.u32 1.1754944e-38, %v2313_v6  ;;  %vm2312_vm15 = vcmp.eq.f32.partialorder %v2311_v42, 8.507059e+37 }
 0x369   : > { %v2232_v9 = vsel %vm2231_vm5, %v3663_v28, %v2228_v7  ;;  %v2266_v10 = vadd.f32 %v3665_v14, %v2265_v30 }
 0x36a   : > { %v2237_v41 = vsel %vm2234_vm8, %v2236_v58, %v2232_v9 }
 0x36b   : > { %v2270_v29 = vsel %vm2269_vm9, %v3665_v14, %v2266_v10  ;;  %v2320_v4 = vmul.f32 %v3669_v63, %v2237_v41 }
 0x36c   : > { %v2275_v33 = vsel %vm2272_vm10, %v2274_v21, %v2270_v29 }
 0x36d   : > { %v3671_v20 = vpop.eup %3670  ;;  %v2318_v13 = vmul.f32 %v2275_v33, %v5331_v17 }
 0x36e   : > { %v3673_v32 = vpop.eup %3672  ;;  %v2325_v39 = vmul.f32 %v3671_v20, %v2300_v44 }
 0x36f   : > { %v2322_v51 = vadd.f32 %v2320_v4, %v2318_v13  ;;  %v2303_v35 = vmul.f32 %v3673_v32, %v2286_v25  ;;  %vm2308_vm12 = vweird.f32 %v3673_v32 }
 0x370   : > { %2327 = vst [vmem:[#allocation2] sm:$0xff] %v2325_v39  ;;  %vm2309_vm14 = vmor %vm2307_vm13, %vm2308_vm12 }
 0x371   : > { %3674 = vtanh.f32 %v2322_v51  ;;  %2330 = vst [vmem:[#allocation3] sm:$0xff] %v2322_v51  ;;  %v2304_v62 = vsub.f32 1.0, %v2303_v35 }
 0x373   : > { %v2305_v34 = vmul.f32 %v3673_v32, %v2304_v62 }
 0x375   : > { %v2306_v0 = vadd.f32 %v3673_v32, %v2305_v34 }
 0x377   : > { %v3675_v3 = vpop.eup %3674  ;;  %v2310_v8 = vsel %vm2309_vm14, %v3673_v32, %v2306_v0  ;;  %2334 = sbr.rel (%p3246_p4) target bundleno = 1202 (0x4b2), region = 93 }
 0x378   : > { %v2315_v17 = vsel %vm2312_vm15, %v2314_v23, %v2310_v8 }
 0x379   : > { %v2326_v31 = vmul.f32 %v3675_v3, %v2315_v17 }
 0x37b   : > { %2328 = vst [vmem:[#allocation2 + $0x8] sm:$0xff] %v2326_v31 }
 0x37c   : > { %v3456_v43 = vld [vmem:[%s5480_s4 + $0x38] sm:$0xff]  ;;  %v3455_v46 = vld [vmem:[%s5480_s4 + $0x30] sm:$0xff]  ;;  %v3454_v22 = vld [vmem:[%s5480_s4 + $0x28] sm:$0xff]  ;;  %vm2422_vm0 = vcmask 523264  }
 0x37d   : > { %2406 = vmatpush.bf16.msra.mxu0 %v3456_v43  ;;  %v3453_v56 = vld [vmem:[%s5480_s4 + $0x20] sm:$0xff]  ;;  %v3452_v47 = vld [vmem:[%s5480_s4 + $0x18] sm:$0xff]  ;;  %v3451_v24 = vld [vmem:[%s5480_s4 + $0x10] sm:$0xff] }
 0x37e   : > { %v3450_v26 = vld [vmem:[%s5480_s4 + $0x8] sm:$0xff]  ;;  %v3449_v28 = vld [vmem:[%s5480_s4] sm:$0xff] }
 0x37f   : > { %v2335_v57 = vld [vmem:[#allocation2] sm:$0xff] }
 0x380   : > { %v3676_v55 = vld [vmem:[%s5481_s5] ss:$0 sm:$0xff] }
 0x381   : > { %2407 = vmatpush.bf16.msra.mxu0 %v3455_v46 }
 0x382   : > { %v2336_v11 = vld [vmem:[#allocation2 + $0x8] sm:$0xff] }
 0x383   : > { %v2337_v48 = vpack.c.bf16 %v2336_v11, %v2335_v57 }
 0x385   : > { %2408 = vmatpush.bf16.msra.mxu0 %v3454_v22 }
 0x389   : > { %2409 = vmatpush.bf16.msra.mxu0 %v3453_v56 }
 0x38d   : > { %2410 = vmatpush.bf16.msra.mxu0 %v3452_v47 }
 0x391   : > { %2411 = vmatpush.bf16.msra.mxu0 %v3451_v24 }
 0x395   : > { %2412 = vmatpush.bf16.msra.mxu0 %v3450_v26 }
 0x399   : > { %2413 = vmatpush.bf16.msra.mxu0 %v3449_v28 }
 0x39c   : > { %2414 = vmatmul.bf16.vlgmr.msra.gmra.mxu0 %v2337_v48 }
 0x419   : > { %v2415_v37 = vpop.f32.mrf.mxu0 }
 0x41a   : > { %v2416_v12 = vadd.f32 %v3676_v55, %v2415_v37 }
 0x41c   : > { %v2420_v14 = vmul.f32 %v2416_v12, %v2416_v12 }
 0x41e   : > { %v2423_v53 = vsel %vm2422_vm0, %v2420_v14, 0.0 }
 0x41f   : > { %2424 = vadd.xlane.f32.xlu0 %v2423_v53 }
 0x421   : > { %v2417_v40 = vpop.f32.mrf.mxu0 }
 0x422   : > { %v2418_v38 = vadd.f32 %v3676_v55, %v2417_v40 }
 0x424   : > { %v2421_v15 = vmul.f32 %v2418_v38, %v2418_v38 }
 0x426   : > { %v2426_v36 = vsel %vm2422_vm0, %v2421_v15, 0.0 }
 0x427   : > { %2427 = vadd.xlane.f32.xlu0 %v2426_v36 }
 0x492   : > { %v2425_v49 = vpop.xlane.xlu0 %2424 }
 0x493   : > { %v2429_v18 = vadd.f32 1e-12, %v2425_v49 }
 0x495   : > { %3677 = vrsqrt.f32 %v2429_v18  ;;  %vm2437_vm2 = vweird.f32 %v2429_v18 }
 0x49a   : > { %v2428_v59 = vpop.xlane.xlu0 %2427 }
 0x49b   : > { %v3678_v45 = vpop.eup %3677  ;;  %v2430_v61 = vadd.f32 1e-12, %v2428_v59 }
 0x49c   : > { %v2432_v19 = vmul.f32 %v3678_v45, %v2429_v18  ;;  %vm2438_vm1 = vweird.f32 %v3678_v45 }
 0x49d   : > { %3679 = vrsqrt.f32 %v2430_v61  ;;  %vm2439_vm3 = vmor %vm2437_vm2, %vm2438_vm1  ;;  %vm2447_vm5 = vweird.f32 %v2430_v61 }
 0x49e   : > { %v2433_v50 = vmul.f32 %v3678_v45, %v2432_v19 }
 0x4a0   : > { %v2434_v52 = vmul.f32 0.5, %v2433_v50 }
 0x4a2   : > { %v2435_v5 = vsub.f32 1.5, %v2434_v52 }
 0x4a3   : > { %v3680_v16 = vpop.eup %3679 }
 0x4a4   : > { %v2436_v27 = vmul.f32 %v3678_v45, %v2435_v5  ;;  %v2442_v25 = vmul.f32 %v3680_v16, %v2430_v61  ;;  %vm2448_vm4 = vweird.f32 %v3680_v16 }
 0x4a5   : > { %vm2449_vm6 = vmor %vm2447_vm5, %vm2448_vm4 }
 0x4a6   : > { %v2440_v30 = vsel %vm2439_vm3, %v3678_v45, %v2436_v27  ;;  %v2443_v7 = vmul.f32 %v3680_v16, %v2442_v25 }
 0x4a7   : > { %v2451_v63 = vmul.f32 %v2440_v30, %v2416_v12 }
 0x4a8   : > { %v2444_v54 = vmul.f32 0.5, %v2443_v7 }
 0x4a9   : > { %2453 = vst.msk [vmem:[%s3938_s12] sm:$0xff] %vm2422_vm0, %v2451_v63 }
 0x4aa   : > { %v2445_v58 = vsub.f32 1.5, %v2444_v54 }
 0x4ac   : > { %v2446_v60 = vmul.f32 %v3680_v16, %v2445_v58 }
 0x4ae   : > { %v2450_v9 = vsel %vm2449_vm6, %v3680_v16, %v2446_v60 }
 0x4af   : > { %v2452_v10 = vmul.f32 %v2450_v9, %v2418_v38 }
 0x4b1   : > { %2454 = vst.msk [vmem:[%s3938_s12 + $0x8] sm:$0xff] %vm2422_vm0, %v2452_v10 }
 0x4b2 PF: > { %s3457_s8 = sshll.u32 %s3779_s27, 4  ;;  %s2468_s26 = sshll.u32 %s3938_s12, 4  ;;  %s2469_s26 = int_to_ptr.vmem [resolvable:$true] %s2468_s26 }
 0x4b3   : > { %s2467_s14 = scalar_lea.hbm %s5482_s6, %s3457_s8  ;;  %s5514_s9 = sand.u32 1, %s3759_s22  }
 0x4b4   : > { %s2470_s11 = sshll.u32 %s2467_s14, 4  ;;  %s2456_s10 = scalar_lea.sflag [#allocation7], %s5514_s9  ;;  %s2471_s11 = int_to_ptr.hbm [resolvable:$true] %s2470_s11 }
 0x4b5   : > { %s3695_s13 = sshra.s32 %s2471_s11, 4  ;;  %s3701_s27 = scalar_lea.hbm %s5482_s6, 32  ;;  %s3696_s13 = int_to_ptr.hbm [resolvable:$true] %s3695_s13 }
 0x4b6   : > { %s3697_s0 = scalar_lea.hbm %s3696_s13, 16  ;;  %p3702_p9 = scmp.lt.s32.totalorder %s3696_s13, %s5482_s6 }
 0x4b7   : > { %p3698_p5 = scmp.ne.s32.totalorder %s3696_s13, %s3697_s0  ;;  %p3703_p10 = scmp.lt.s32.totalorder %s3701_s27, %s3697_s0 }
 0x4b9   : > { %p3699_p6 = pnand %p3698_p5, %p3903_p7  ;;  %p3704_p11 = por %p3703_p10, %p3702_p9 }
 0x4bb   : > { %p3700_p8 = pneg %p3699_p6 }
 0x4bd   : > { %p3705_p13 = pnand %p3704_p11, %p3700_p8 }
 0x4bf   : > { %3708 = shalt.err (!%p3705_p13)
}
 0x4c0   : > { %s3794_s12 = smov 128   ;;  %s3795_s8 = smov 8  }
 0x4c1   : > { %3458 = dma.vmem_to_hbm [thread:$0]  (%p3903_p7), %s2469_s26, 256, %s2471_s11, %s2456_s10, %s3794_s12, %s3794_s12, %s3795_s8  }
 0x4c2 PF: > { %p3464_p0 = scmp.ge.s32.totalorder %s3791_s30, 2  ;;  %s2485_s29 = sand.u32 1, %s3755_s21  }
 0x4c3   : > { %s2486_s17 = scalar_lea.sflag [#allocation7], %s2485_s29 }
 0x4c4   : > { %p3461_p1 = pnand %p3464_p0, %p3911_p12 }
 0x4c6   : > { %p3462_p2 = pneg %p3461_p1 }
 0x4c8   : > { %3750 = dma.done.wait (%p3462_p2), %s2486_s17, 256  }
 0x4c9   : > { %3752 = vsyncadd (%p3462_p2), %s2486_s17, 4294967040  ;;  %s19_s30 = sadd.s32 1, %s3791_s30   ;;  %s5515_s15 = sld [smem:[#allocation12_spill]] }
 0x4ca   : > { %p16_p3 = scmp.ge.s32.totalorder %s19_s30, 6   ;;  %s5516_s27 = sld [smem:[#allocation9_spill]] }
 0x4cb   : > { %s5517_s14 = sld [smem:[#allocation10_spill]]  ;;  %s5519_s21 = smov %s3759_s22 }
 0x4cc   : > { %s5518_s29 = sld [smem:[#allocation11_spill]]  ;;  %s5520_s22 = smov %s3763_s23 }
 0x4cd   : > { %s5521_s23 = smov %s3916_s19  ;;  %s5522_s24 = smov %s3771_s25 }
 0x4ce   : > { %s5524_s26 = smov %s3783_s28  ;;  %18 = sbr.rel (!%p16_p3) target bundleno = 8 (0x8), region = 136 }
 0x4cf   : > { %s5523_s25 = smov %s5515_s15 }
 0x4d1   : > { %s5525_s28 = smov %s5517_s14 }
 0x4d3   :  { %2492 = vsyncpa [#allocation7], 1 }
 0x4d4   :  { %2494 = vsyncpa [#allocation7 + $0x1], 1 }

</bundles_post_ra>
